<compile_context>
chip_gen: v7x
topology: tpu7x:2x2x1
jax: 0.10.0
libtpu: 0.0.40
codegen_flags: <defaults>
</compile_context>

<pallas_src>
import jax
import jax.numpy as jnp
from jax import lax
from jax.experimental import pallas as pl
from jax.experimental.pallas import tpu as pltpu


def attention_kernel(f1_ref, f2_ref, w1a_ref, w1b_ref, b1_ref, w2_ref, out_ref):
    # Shapes for this grid step (ND = N * D):
    #   f1_ref : (tile_b, ND)   all N neighbor features of an instance in one row
    #   f2_ref : (tile_b, D)    one "self" feature row per instance
    #   w1a_ref: (ND, ND)       kron(I_N, W1a)  block-diagonal      (resident)
    #   w1b_ref: (D, ND)        [W1b | W1b | ... | W1b]             (resident)
    #   b1_ref : (1, ND)        [b1 | b1 | ... | b1]                (resident)
    #   w2_ref : (N, ND)        neighbor-segmented att2 weight      (resident)
    #   out_ref: (N, tile_b)    lane-dense attention weights
    f32 = jnp.float32
    # HIGHEST precision for f32 operands so the kernel matches the f32 reference
    # bit-closely; for bf16 operands precision is moot (accumulation is f32).
    prec = lax.Precision.HIGHEST if f1_ref.dtype == jnp.float32 else None

    # Per-instance effective bias: f2 @ [W1b ... W1b] + [b1 ... b1], computed
    # once per instance (not once per neighbor row).       -> (tile_b, ND) f32
    bias = jnp.dot(f2_ref[...], w1b_ref[...],
                   precision=prec, preferred_element_type=f32)
    bias = bias + b1_ref[...]

    # att1 for all neighbors at once: one (tile_b, ND) @ (ND, ND) MXU matmul
    # (K = Nout = 256 -> no 32-wide lane padding, good MXU utilization).
    h = jnp.dot(f1_ref[...], w1a_ref[...],
                precision=prec, preferred_element_type=f32)
    h = jnp.maximum(h + bias, 0.0)                       # relu(att1(cat(f1, f2)))

    # att2 (b2 dropped: the dim-0 softmax is shift-invariant).  Contracting the
    # lane axis of both operands (q.kT-style NT dot) lands the logits directly
    # in the lane-dense (N, tile_b) layout -- no in-kernel transpose.
    logits = lax.dot_general(
        w2_ref[...], h, (((1,), (1,)), ((), ())),
        precision=lax.Precision.HIGHEST, preferred_element_type=f32)  # (N, tile_b)

    # Per-instance softmax over the neighbor (sublane) axis; exact division so
    # each instance's weights sum to 1 to f32 precision (review correctness note).
    m = jnp.max(logits, axis=0, keepdims=True)
    e = jnp.exp(logits - m)
    s = jnp.sum(e, axis=0, keepdims=True)
    out_ref[...] = (e / s).astype(out_ref.dtype)


def _default_tile_b(B, max_tile=2048):
    """Largest multiple-of-128 divisor of B, capped at max_tile and B // 2.

    Multiples of 128 keep the (N, tile_b) output blocks lane-dense (unmasked
    stores) and satisfy the (8, 128) block-tiling constraint.  Capping at B//2
    keeps the grid length >= 2 so dimension_semantics=("parallel",) can spread
    steps across both v7x TensorCores; max_tile (~2 MiB of packed f1 per buffer
    in f32, double-buffered) leaves ample headroom under v7x's 64 MiB VMEM.
    Small batches (B < 256) fall back to one whole-batch step, where per-step
    overhead and megacore sharding are irrelevant (the whole problem is tiny).
    """
    best = None
    t = 128
    while t <= min(B // 2, max_tile):
        if B % t == 0:
            best = t
        t += 128
    return best if best is not None else B


def attention_forward_batched(feature1, feature2, w1, b1, w2, b2=None, *,
                              tile_b=None, matmul_dtype=jnp.float32):
    """Batched forward over B independent attention instances.

    feature1: (B, N, D), feature2: (B, D), w1: (2D, D), b1: (D,), w2: (D, 1).
    b2 is accepted for API parity but unused (dim-0 softmax is shift-invariant).
    matmul_dtype=jnp.bfloat16 halves feature1 DMA traffic (f32 accumulation).
    Returns (B, N, 1) attention weights in float32.
    """
    del b2  # mathematically a no-op under the dim-0 softmax
    B, N, D = feature1.shape
    ND = N * D

    if tile_b is None:
        tile_b = _default_tile_b(B)
    assert B % tile_b == 0, "tile_b must divide the batch"
    assert tile_b == B or tile_b % 128 == 0, \
        "tile_b must be B or a multiple of 128 (lane-dense output blocks)"
    grid = (B // tile_b,)

    # Packed inputs / weights (tiny, built once per call; all parameter packing
    # is wrapper-side and off the kernel's critical path):
    #   f1_rows[b]  = concat_j feature1[b, j, :]   -- FREE row-major reshape
    #   w1a_bd      = kron(I_N, W1a)                (ND, ND) block-diagonal
    #   w1b_rep     = [W1b | ... | W1b]             (D, ND)
    #   b1_rep      = [b1 | ... | b1]               (1, ND)
    #   w2_seg[j, j*D:(j+1)*D] = w2[:, 0]           (N, ND)
    w1a, w1b = w1[:D, :], w1[D:, :]
    eye_n = jnp.eye(N, dtype=jnp.float32)
    f1_rows = feature1.reshape(B, ND).astype(matmul_dtype)
    f2_in = feature2.astype(matmul_dtype)
    w1a_bd = jnp.kron(eye_n, w1a).astype(matmul_dtype)
    w1b_rep = jnp.tile(w1b, (1, N)).astype(matmul_dtype)
    b1_rep = jnp.tile(b1, N).reshape(1, ND).astype(jnp.float32)
    w2_seg = jnp.kron(eye_n, w2.reshape(1, D)).astype(jnp.float32)

    out = pl.pallas_call(
        attention_kernel,
        out_shape=jax.ShapeDtypeStruct((N, B), jnp.float32),
        grid=grid,
        in_specs=[
            pl.BlockSpec((tile_b, ND), lambda g: (g, 0)),  # packed feature1
            pl.BlockSpec((tile_b, D),  lambda g: (g, 0)),  # feature2
            pl.BlockSpec((ND, ND),     lambda g: (0, 0)),  # kron(I, W1a)  resident
            pl.BlockSpec((D, ND),      lambda g: (0, 0)),  # tiled W1b     resident
            pl.BlockSpec((1, ND),      lambda g: (0, 0)),  # tiled b1      resident
            pl.BlockSpec((N, ND),      lambda g: (0, 0)),  # segmented w2  resident
        ],
        out_specs=pl.BlockSpec((N, tile_b), lambda g: (0, g)),
        compiler_params=pltpu.CompilerParams(
            dimension_semantics=("parallel",),   # shard batch grid across TCs (v7x)
            vmem_limit_bytes=48 << 20,           # headroom, still < v7x 64 MiB physical
        ),
    )(f1_rows, f2_in, w1a_bd, w1b_rep, b1_rep, w2_seg)

    # (N, B) -> (B, N, 1): tiny wrapper-side transpose, off the kernel path.
    return out.T.reshape(B, N, 1)


def attention_forward(feature1, feature2, w1, b1, w2, b2=None):
    """Single-instance forward matching the PyTorch module's signature.

    feature1: (N, D), feature2: (1, D) -> (N, 1) attention weights.
    """
    N, D = feature1.shape
    out = attention_forward_batched(
        feature1[None], feature2.reshape(1, D), w1, b1, w2, b2, tile_b=1)
    return out[0]


def _reference(feature1, feature2, w1, b1, w2, b2):
    """Pure-JAX reference of the PyTorch forward (keeps b2; HIGHEST precision)."""
    n = feature1.shape[0]
    f2r = jnp.tile(feature2, (n, 1))
    x = jnp.concatenate([feature1, f2r], axis=1)
    h = jax.nn.relu(jnp.dot(x, w1, precision=lax.Precision.HIGHEST) + b1)
    z = jnp.dot(h, w2, precision=lax.Precision.HIGHEST) + b2
    return jax.nn.softmax(z, axis=0)


if __name__ == "__main__":
    embed_dim = 32
    n_neighs = 8
    batch = 256          # default tile_b -> 128, grid=(2,) (exercises pipelining)

    key = jax.random.PRNGKey(0)
    k1, k2, k3, k4, k5, k6 = jax.random.split(key, 6)

    feature1 = jax.random.normal(k1, (batch, n_neighs, embed_dim), dtype=jnp.float32)
    feature2 = jax.random.normal(k2, (batch, embed_dim), dtype=jnp.float32)

    # Parameters (PyTorch Linear-style bounds); weights stored as (in, out).
    lim1 = 1.0 / jnp.sqrt(2.0 * embed_dim)
    w1 = jax.random.uniform(k3, (2 * embed_dim, embed_dim), jnp.float32, -lim1, lim1)
    b1 = jax.random.uniform(k4, (embed_dim,), jnp.float32, -lim1, lim1)
    lim2 = 1.0 / jnp.sqrt(float(embed_dim))
    w2 = jax.random.uniform(k5, (embed_dim, 1), jnp.float32, -lim2, lim2)
    b2 = jax.random.uniform(k6, (1,), jnp.float32, -lim2, lim2)

    # Batched kernel run (f32 matmul operands, HIGHEST precision).
    att_b = attention_forward_batched(feature1, feature2, w1, b1, w2, b2)
    att_b = jax.block_until_ready(att_b)

    # Reference (keeps b2 -- demonstrates the shift-invariance of the softmax).
    ref_b = jax.vmap(
        lambda f1, f2: _reference(f1, f2.reshape(1, -1), w1, b1, w2, b2)
    )(feature1, feature2)
    ref_b = jax.block_until_ready(ref_b)

    assert att_b.shape == (batch, n_neighs, 1)
    assert jnp.allclose(att_b, ref_b, atol=1e-4, rtol=1e-3), "batched mismatch vs reference"
    assert jnp.allclose(jnp.sum(att_b, axis=1), 1.0, atol=1e-4), "weights must sum to 1"

    # Single-instance path matching the original module's forward signature.
    att1 = attention_forward(feature1[0], feature2[0].reshape(1, -1), w1, b1, w2, b2)
    att1 = jax.block_until_ready(att1)
    ref1 = _reference(feature1[0], feature2[0].reshape(1, -1), w1, b1, w2, b2)
    assert att1.shape == (n_neighs, 1)
    assert jnp.allclose(att1, ref1, atol=1e-4, rtol=1e-3), "single-instance mismatch"

    # bf16 matmul-operand path (halves feature1 DMA traffic; f32 accumulation).
    # Typical error vs the f32 reference is ~1e-3 in the attention weights.
    att_bf = attention_forward_batched(
        feature1, feature2, w1, b1, w2, b2, matmul_dtype=jnp.bfloat16)
    att_bf = jax.block_until_ready(att_bf)
    assert jnp.allclose(att_bf, ref_b, atol=1e-2), "bf16 matmul-operand path mismatch"

    print("KERNEL_OK")
</pallas_src>

<mosaic_0001>
module attributes {stable_mosaic.version = 11 : i64} {
  func.func @attention_kernel(%arg0: i32, %arg1: memref<128x256xf32, #tpu.memory_space<vmem>>, %arg2: memref<128x32xf32, #tpu.memory_space<vmem>>, %arg3: memref<256x256xf32, #tpu.memory_space<vmem>>, %arg4: memref<32x256xf32, #tpu.memory_space<vmem>>, %arg5: memref<1x256xf32, #tpu.memory_space<vmem>>, %arg6: memref<8x256xf32, #tpu.memory_space<vmem>>, %arg7: memref<8x128xf32, #tpu.memory_space<vmem>>) attributes {dimension_semantics = [#tpu.dimension_semantics<parallel>], iteration_bounds = array<i64: 2>, scalar_prefetch = 0 : i64, scratch_operands = 0 : i64, tpu.core_type = #tpu.core_type<tc>, window_params = [{transform_indices = @transform_0, window_bounds = array<i64: 128, 256>}, {transform_indices = @transform_1, window_bounds = array<i64: 128, 32>}, {pipeline_mode = #tpu.pipeline_mode<synchronous>, transform_indices = @transform_2, window_bounds = array<i64: 256, 256>}, {pipeline_mode = #tpu.pipeline_mode<synchronous>, transform_indices = @transform_3, window_bounds = array<i64: 32, 256>}, {pipeline_mode = #tpu.pipeline_mode<synchronous>, transform_indices = @transform_4, window_bounds = array<i64: 1, 256>}, {pipeline_mode = #tpu.pipeline_mode<synchronous>, transform_indices = @transform_5, window_bounds = array<i64: 8, 256>}, {transform_indices = @transform_6, window_bounds = array<i64: 8, 128>}]} {
    %c0 = arith.constant 0 : index
    %c0_0 = arith.constant 0 : index
    %0 = vector.load %arg2[%c0, %c0_0] : memref<128x32xf32, #tpu.memory_space<vmem>>, vector<128x32xf32>
    %c0_1 = arith.constant 0 : index
    %c0_2 = arith.constant 0 : index
    %1 = vector.load %arg4[%c0_1, %c0_2] : memref<32x256xf32, #tpu.memory_space<vmem>>, vector<32x256xf32>
    %cst = arith.constant dense<0.000000e+00> : vector<128x256xf32>
    %2 = tpu.matmul %0, %1, %cst {dimension_numbers = #tpu.dot_dimension_numbers<[1], [0], [0], [1], [0, 0, 1, 1], [], []>, precision = #tpu.contract_precision<fp32>} : vector<128x32xf32>, vector<32x256xf32>, vector<128x256xf32> -> vector<128x256xf32>
    %c0_3 = arith.constant 0 : index
    %c0_4 = arith.constant 0 : index
    %3 = vector.load %arg5[%c0_3, %c0_4] : memref<1x256xf32, #tpu.memory_space<vmem>>, vector<1x256xf32>
    %4 = vector.broadcast %3 : vector<1x256xf32> to vector<128x256xf32>
    %5 = arith.addf %2, %4 : vector<128x256xf32>
    %c0_5 = arith.constant 0 : index
    %c0_6 = arith.constant 0 : index
    %6 = vector.load %arg1[%c0_5, %c0_6] : memref<128x256xf32, #tpu.memory_space<vmem>>, vector<128x256xf32>
    %c0_7 = arith.constant 0 : index
    %c0_8 = arith.constant 0 : index
    %7 = vector.load %arg3[%c0_7, %c0_8] : memref<256x256xf32, #tpu.memory_space<vmem>>, vector<256x256xf32>
    %cst_9 = arith.constant dense<0.000000e+00> : vector<128x256xf32>
    %8 = tpu.matmul %6, %7, %cst_9 {dimension_numbers = #tpu.dot_dimension_numbers<[1], [0], [0], [1], [0, 0, 1, 1], [], []>, precision = #tpu.contract_precision<fp32>} : vector<128x256xf32>, vector<256x256xf32>, vector<128x256xf32> -> vector<128x256xf32>
    %9 = arith.addf %8, %5 : vector<128x256xf32>
    %cst_10 = arith.constant 0.000000e+00 : f32
    %10 = vector.broadcast %cst_10 : f32 to vector<128x256xf32>
    %11 = arith.maximumf %9, %10 : vector<128x256xf32>
    %c0_11 = arith.constant 0 : index
    %c0_12 = arith.constant 0 : index
    %12 = vector.load %arg6[%c0_11, %c0_12] : memref<8x256xf32, #tpu.memory_space<vmem>>, vector<8x256xf32>
    %cst_13 = arith.constant dense<0.000000e+00> : vector<8x128xf32>
    %13 = tpu.matmul %12, %11, %cst_13 {dimension_numbers = #tpu.dot_dimension_numbers<[1], [1], [0], [0], [0, 0, 1, 0], [], []>, precision = #tpu.contract_precision<fp32>} : vector<8x256xf32>, vector<128x256xf32>, vector<8x128xf32> -> vector<8x128xf32>
    %cst_14 = arith.constant dense<0xFF800000> : vector<128xf32>
    %14 = vector.multi_reduction <maximumf>, %13, %cst_14 [0] : vector<8x128xf32> to vector<128xf32>
    %15 = vector.shape_cast %14 : vector<128xf32> to vector<1x128xf32>
    %16 = vector.broadcast %15 : vector<1x128xf32> to vector<8x128xf32>
    %17 = arith.subf %13, %16 : vector<8x128xf32>
    %18 = math.exp %17 : vector<8x128xf32>
    %cst_15 = arith.constant dense<0.000000e+00> : vector<128xf32>
    %19 = vector.multi_reduction <add>, %18, %cst_15 [0] : vector<8x128xf32> to vector<128xf32>
    %20 = vector.shape_cast %19 : vector<128xf32> to vector<1x128xf32>
    %21 = vector.broadcast %20 : vector<1x128xf32> to vector<8x128xf32>
    %22 = arith.divf %18, %21 : vector<8x128xf32>
    %c0_16 = arith.constant 0 : index
    %c0_17 = arith.constant 0 : index
    %23 = vector.load %arg7[%c0_16, %c0_17] : memref<8x128xf32, #tpu.memory_space<vmem>>, vector<8x128xf32>
    tpu.vector_store %arg7[%c0_16, %c0_17], %22 {strides = array<i32>} : memref<8x128xf32, #tpu.memory_space<vmem>>, vector<8x128xf32>,
    return
  }
  func.func @transform_0(%arg0: i32) -> (i32, i32) {
    %c0_i32 = arith.constant 0 : i32
    %c0_i32_0 = arith.constant 0 : i32
    return %arg0, %c0_i32 : i32, i32
  }
  func.func @transform_1(%arg0: i32) -> (i32, i32) {
    %c0_i32 = arith.constant 0 : i32
    %c0_i32_0 = arith.constant 0 : i32
    return %arg0, %c0_i32 : i32, i32
  }
  func.func @transform_2(%arg0: i32) -> (i32, i32) {
    %c0_i32 = arith.constant 0 : i32
    %c0_i32_0 = arith.constant 0 : i32
    %c0_i32_1 = arith.constant 0 : i32
    return %c0_i32, %c0_i32_0 : i32, i32
  }
  func.func @transform_3(%arg0: i32) -> (i32, i32) {
    %c0_i32 = arith.constant 0 : i32
    %c0_i32_0 = arith.constant 0 : i32
    %c0_i32_1 = arith.constant 0 : i32
    return %c0_i32, %c0_i32_0 : i32, i32
  }
  func.func @transform_4(%arg0: i32) -> (i32, i32) {
    %c0_i32 = arith.constant 0 : i32
    %c0_i32_0 = arith.constant 0 : i32
    %c0_i32_1 = arith.constant 0 : i32
    return %c0_i32, %c0_i32_0 : i32, i32
  }
  func.func @transform_5(%arg0: i32) -> (i32, i32) {
    %c0_i32 = arith.constant 0 : i32
    %c0_i32_0 = arith.constant 0 : i32
    %c0_i32_1 = arith.constant 0 : i32
    return %c0_i32, %c0_i32_0 : i32, i32
  }
  func.func @transform_6(%arg0: i32) -> (i32, i32) {
    %c0_i32 = arith.constant 0 : i32
    %c0_i32_0 = arith.constant 0 : i32
    return %c0_i32, %arg0 : i32, i32
  }
}

</mosaic_0001>

<bundles_post_ra>
// kernel: tpu_custom_call.1
= control target key start
LH: loop header
LB: loop body
LE: loop exit
PB: predicated region body
PF: predicated region fallthrough
CT: control target
= control target key end

     0   :  { %11 = vsyncpa [#allocation3], 0  ;;  %s9160_s0 = inlined_call_operand.hbm [shape: f32[256,256], index: 0, kind: input, shape index: {}]   ;;  %s9161_s1 = inlined_call_operand.vmem [shape: f32[256,32], index: 1, kind: input, shape index: {}]   ;;  %s9162_s2 = inlined_call_operand.hbm [shape: f32[256,256], index: 2, kind: input, shape index: {}]   ;;  %s9163_s3 = inlined_call_operand.vmem [shape: f32[32,256], index: 3, kind: input, shape index: {}]   ;;  %s9164_s4 = inlined_call_operand.vmem [shape: f32[1,256], index: 4, kind: input, shape index: {}]   ;;  %s9165_s5 = inlined_call_operand.vmem [shape: f32[8,256], index: 5, kind: input, shape index: {}]   ;;  %s9166_s6 = inlined_call_operand.hbm [shape: f32[8,256], index: 6, kind: output, shape index: {}]  }
   0x1   :  { %13 = vsyncpa [#allocation3 + $0x1], 0 }
   0x2   :  { %14 = vsyncpa [#allocation6], 0 }
   0x3   :  { %15 = vsyncpa [#allocation4], 0 }
   0x4   :  { %17 = vsyncpa [#allocation4 + $0x1], 0  ;;  %s6275_s21 = smov 0   ;;  %s6277_s22 = smov 0  }
   0x5   :  { %s6279_s23 = smov 0   ;;  %s6281_s24 = smov 0  }
   0x6 LB: > { %s6296_s25 = sadd.s32 4294967295, %s6232_s24   ;;  %s5002_s26 = sadd.s32 4294967294, %s6232_s24   ;;  %s6232_s24 = sphi %s6281_s24, %s10631_s24   ;;  %s6228_s23 = sphi %s6279_s23, %s10630_s23   ;;  %s6224_s22 = sphi %s6277_s22, %s10629_s22   ;;  %s6220_s21 = sphi %s6275_s21, %s10628_s21  }
   0x7   : > { %p43_p0 = scmp.ne.s32.totalorder %s6224_s22, %s6220_s21  ;;  %p9167_p1 = scmp.eq.s32.totalorder %s6296_s25, 0 }
   0x8   : > { %p183_p3 = scmp.eq.s32.totalorder %s5002_s26, 1  ;;  %p5003_p5 = scmp.ge.s32.totalorder %s6232_s24, 1 }
   0x9   : > { %p6305_p4 = por %p9167_p1, %p43_p0  ;;  %p190_p7 = scmp.lt.s32.totalorder %s6232_s24, 3 }
   0xa   : > { %p6310_p6 = por %p183_p3, %p43_p0  ;;  %s6234_s30 = smov [#allocation5]  }
   0xb   : > { %s9661_s27 = scalar_select %p6305_p4, 1, 0 }
   0xc   : > { %s9662_s28 = scalar_select %p6310_p6, 1, 0 }
   0xd   : > { %p6315_p8 = pnand %p5003_p5, %p190_p7  ;;  %s202_s7 = sshll.u32 %s6234_s30, 4  ;;  %s6319_s7 = int_to_ptr.vmem [resolvable:$true] %s202_s7 }
   0xe   : > { %s6331_s9 = sadd.s32 1, %s6232_s24   ;;  %s30_s10 = sadd.s32 1, %s6228_s23 }
   0xf   : > { %s9663_s29 = scalar_select %p6315_p8, 1, 0 }
  0x10   : > { %p6048_p9 = pneg %p6315_p8  ;;  %s27_s11 = ssub.s32 %s6232_s24, %s6331_s9 }
  0x11   : > { %s6104_s14 = scalar_lea.hbm %s9162_s2, 8192 }
  0x12   : > { %p6326_p11 = pnand %p6048_p9, %p9167_p1  ;;  %p6105_p12 = scmp.ne.s32.totalorder %s9162_s2, %s6104_s14 }
  0x13   : > { %p6111_p5 = scmp.lt.u32.totalorder %s6104_s14, %s9162_s2 }
  0x14   : > { %p6106_p13 = pneg %p6326_p11 }
  0x16   : > { %p6107_p0 = pnand %p6106_p13, %p6105_p12 }
  0x18   : > { %p6108_p3 = pneg %p6107_p0 }
  0x1a   : > { %p6113_p7 = pnand %p6111_p5, %p6108_p3 }
  0x1c   : > { %6116 = shalt.err (!%p6113_p7)
}
  0x1d   : > { %s6117_s19 = scalar_lea.vmem %s6319_s7, 8192  ;;  %p6125_p2 = scmp.lt.s32.totalorder %s6319_s7, %s6319_s7 }
  0x1e   : > { %p6118_p9 = scmp.ne.s32.totalorder %s6319_s7, %s6117_s19  ;;  %p6126_p6 = scmp.lt.s32.totalorder %s6117_s19, %s6117_s19 }
  0x20   : > { %p6120_p10 = pnand %p6118_p9, %p6106_p13  ;;  %p6127_p4 = por %p6126_p6, %p6125_p2 }
  0x22   : > { %p6121_p1 = pneg %p6120_p10 }
  0x24   : > { %p6128_p8 = pnand %p6127_p4, %p6121_p1 }
  0x26   : > { %6131 = shalt.err (!%p6128_p8)
}
  0x27   : > { %s6235_s20 = smov 256   ;;  %s6236_s26 = smov 16  }
  0x28   : > { %6051 = dma.hbm_to_vmem [thread:$0]  (!%p6326_p11), %s9162_s2, 8192, %s6319_s7, [#allocation6], %s6235_s20, %s6235_s20, %s6236_s26  }
  0x29   : > { %p28_p1 = scmp.eq.s32.totalorder %s27_s11, 0  ;;  %p37_p2 = scmp.ne.s32.totalorder %s6228_s23, %s6224_s22 }
  0x2a   : > { %p38_p4 = scmp.eq.s32.totalorder %s6232_s24, 0  ;;  %p6061_p6 = scmp.lt.s32.totalorder %s6232_s24, 2 }
  0x2b   : > { %s6365_s13 = scalar_select %p28_p1, %s6228_s23, %s30_s10  }
  0x2c   : > { %p39_p8 = por %p38_p4, %p37_p2  ;;  %p9665_p10 = scmp.eq.s32.totalorder %s6296_s25, 1 }
  0x2d   : > { %s225_s8 = sand.u32 1, %s6228_s23   ;;  %s5021_s15 = sshll.u32 %s6232_s24, 12 }
  0x2e   : > { %p6369_p12 = por %p9665_p10, %p37_p2  ;;  %s5006_s16 = sshll.u32 %s225_s8, 8 }
  0x2f   : > { %s6378_s19 = scalar_lea.hbm %s9160_s0, %s5021_s15  ;;  %s229_s7 = scalar_lea.vmem [#allocation2], %s5006_s16 }
  0x30   : > { %s237_s10 = sshll.u32 %s229_s7, 4  ;;  %p6380_p11 = pnand %p6061_p6, %p39_p8  ;;  %s6384_s10 = int_to_ptr.vmem [resolvable:$true] %s237_s10 }
  0x31   : > { %s6386_s30 = scalar_lea.sflag [#allocation3], %s225_s8  ;;  %s6132_s12 = scalar_lea.hbm %s6378_s19, 4096 }
  0x32   : > { %p6133_p13 = scmp.ne.s32.totalorder %s6378_s19, %s6132_s12  ;;  %p6134_p0 = pneg %p6380_p11 }
  0x33   : > { %s6137_s17 = scalar_lea.hbm %s9160_s0, 8192  ;;  %p6138_p7 = scmp.lt.u32.totalorder %s6378_s19, %s9160_s0 }
  0x34   : > { %p6135_p3 = pnand %p6134_p0, %p6133_p13  ;;  %p6139_p9 = scmp.lt.u32.totalorder %s6137_s17, %s6132_s12 }
  0x35   : > { %p6141_p2 = scmp.lt.u32.totalorder %s6132_s12, %s6378_s19 }
  0x36   : > { %p6136_p5 = pneg %p6135_p3  ;;  %p6140_p1 = por %p6139_p9, %p6138_p7 }
  0x38   : > { %p6142_p4 = por %p6141_p2, %p6140_p1 }
  0x3a   : > { %p6143_p6 = pnand %p6142_p4, %p6136_p5 }
  0x3c   : > { %6146 = shalt.err (!%p6143_p6)
}
  0x3d   : > { %s6147_s8 = scalar_lea.vmem %s6384_s10, 4096  ;;  %s6237_s15 = smov [#allocation2]  }
  0x3e   : > { %p6148_p8 = scmp.ne.s32.totalorder %s6384_s10, %s6147_s8  ;;  %s6152_s16 = sshll.u32 %s6237_s15, 4  ;;  %s6153_s16 = int_to_ptr.vmem [resolvable:$false] %s6152_s16 }
  0x3f   : > { %s6154_s18 = scalar_lea.vmem %s6153_s16, 8192  ;;  %p6155_p3 = scmp.lt.s32.totalorder %s6384_s10, %s6153_s16 }
  0x40   : > { %p6150_p10 = pnand %p6148_p8, %p6134_p0  ;;  %p6156_p7 = scmp.lt.s32.totalorder %s6154_s18, %s6147_s8 }
  0x42   : > { %p6151_p13 = pneg %p6150_p10  ;;  %p6157_p9 = por %p6156_p7, %p6155_p3 }
  0x44   : > { %p6158_p1 = pnand %p6157_p9, %p6151_p13 }
  0x46   : > { %6161 = shalt.err (!%p6158_p1)
}
  0x47   : > { %6055 = dma.hbm_to_vmem [thread:$0]  (!%p6380_p11), %s6378_s19, 4096, %s6384_s10, %s6386_s30, %s6235_s20, %s6235_s20, %s6236_s26  }
  0x48   : > { %p9668_p0 = scmp.ne.s32.totalorder %s9663_s29, 0 }
  0x4a   : > { %258 = sbr.rel (%p9668_p0) target bundleno = 1516 (0x5ec), region = 44 }
  0x51   : > { %s6420_s12 = sand.u32 1, %s6224_s22   ;;  %p9669_p5 = scmp.ne.s32.totalorder %s9661_s27, 0 }
  0x52   : > { %s5011_s17 = sshll.u32 %s6420_s12, 8  ;;  %s261_s7 = scalar_lea.sflag [#allocation3], %s6420_s12 }
  0x53   : > { %s6424_s8 = scalar_lea.vmem [#allocation2], %s5011_s17 }
  0x54   : > { %6207 = dma.done.wait (%p9669_p5), %s261_s7, 4096  }
  0x55   : > { %6209 = vsyncadd (%p9669_p5), %s261_s7, 4294963200  ;;  %p9670_p11 = scmp.eq.s32.totalorder %s6296_s25, 0 }
  0x57   : > { %6211 = dma.done.wait (%p9670_p11), [#allocation6], 8192   ;;  %p9671_p2 = pmov %p9670_p11 }
  0x58   : > { %s5014_s29 = sshll.u32 %s6296_s25, 4  ;;  %v9212_v0 = vmov 0.0   ;;  %v326_v1 = vld [vmem:[%s9163_s3 + $0x8] sm:$0xff]  ;;  %v328_v2 = vld [vmem:[%s9163_s3 + $0x18] sm:$0xff]  ;;  %v325_v3 = vld [vmem:[%s9163_s3] sm:$0xff]  ;;  %vm345_vm0 = vcmask 261120  }
  0x59   : > { %6213 = vsyncadd (%p9671_p2), [#allocation6], 4294959104  ;;  %1141 = vmatprep.mubr.f32.mxu0 %v9212_v0  ;;  %p304_p4 = scmp.lt.s32.totalorder %s5014_s29, 31  ;;  %466 = vmatprep.mubr.f32.mxu1 %v9212_v0  ;;  %v394_v4 = vand.u32 4294901760, %v326_v1  ;;  %v398_v5 = vand.u32 4294901760, %v328_v2  ;;  %v327_v6 = vld [vmem:[%s9163_s3 + $0x10] sm:$0xff] }
  0x5a   : > { %v396_v7 = vand.u32 4294901760, %v325_v3  ;;  %v330_v8 = vld [vmem:[%s9163_s3 + $0x28] sm:$0xff]  ;;  %v332_v9 = vld [vmem:[%s9163_s3 + $0x38] sm:$0xff]  ;;  %v400_v10 = vand.u32 4294901760, %v327_v6  ;;  %v329_v13 = vld [vmem:[%s9163_s3 + $0x20] sm:$0xff]  ;;  %s4897_s15 = scalar_lea.sflag [#allocation4], %s6420_s12 }
  0x5b   : > { %s10633_s29 = smov (!%p304_p4, %s5014_s29), 31  ;;  %v402_v11 = vand.u32 4294901760, %v330_v8  ;;  %v406_v12 = vand.u32 4294901760, %v332_v9  ;;  %v331_v14 = vld [vmem:[%s9163_s3 + $0x30] sm:$0xff]  ;;  %v6467_v16 = vpack.c.bf16 %v398_v5, %v394_v4  ;;  %v6469_v17 = vsub.f32 %v326_v1, %v394_v4 }
  0x5c   : > { %s5015_s20 = sshll.u32 %s10633_s29, 3  ;;  %v6471_v18 = vsub.f32 %v328_v2, %v398_v5  ;;  %v6473_v19 = vsub.f32 %v325_v3, %v396_v7  ;;  %v6475_v20 = vpack.c.bf16 %v400_v10, %v396_v7  ;;  %v6477_v21 = vsub.f32 %v327_v6, %v400_v10  ;;  %v6566_v3 = vld [vmem:[#allocation5 + $0x8] sm:$0xff]  ;;  %v6576_v7 = vld [vmem:[#allocation5 + $0x18] sm:$0xff]  ;;  %s5013_s29 = sshll.u32 %s6420_s12, 3 }
  0x5d   : > { %s6440_s27 = scalar_lea.vmem %s9161_s1, %s5015_s20  ;;  %9672 = vst [vmem:[#allocation11_spill] sm:$0xff] %v6469_v17  ;;  %v6479_v22 = vpack.c.bf16 %v406_v12, %v402_v11  ;;  %5047 = vmatprep.subr.bf16.mxu0 %v6467_v16  ;;  %v404_v23 = vand.u32 4294901760, %v329_v13  ;;  %v408_v24 = vand.u32 4294901760, %v331_v14  ;;  %5023 = vmatprep.subr.bf16.mxu1 %v6467_v16  ;;  %v9186_v29 = vand.u32 4294901760, %v6469_v17  ;;  %s5017_s20 = sshll.u32 %s6296_s25, 7 }
  0x5e   : > { %v309_v15 = vld [vmem:[%s6440_s27] sm:$0xff]  ;;  %9673 = vst [vmem:[#allocation12_spill] sm:$0xff] %v6471_v18  ;;  %9674 = vst [vmem:[#allocation13_spill] sm:$0xff] %v6473_v19  ;;  %v310_v26 = vld [vmem:[%s6440_s27 + $0x8] sm:$0xff]  ;;  %5049 = vmatpush1.bf16.msra.mxu0 %v6475_v20  ;;  %v9181_v30 = vand.u32 4294901760, %v6471_v18  ;;  %v9177_v31 = vand.u32 4294901760, %v6473_v19  ;;  %5025 = vmatpush1.bf16.msra.mxu1 %v6475_v20  ;;  %v6521_v45 = vsub.f32 %v330_v8, %v402_v11  ;;  %s9116_s30 = scalar_lea.hbm %s9166_s6, %s5017_s20 }
  0x5f   : > { %9675 = vst [vmem:[#allocation14_spill] sm:$0xff] %v6477_v21  ;;  %v347_v25 = vsel %vm345_vm0, %v309_v15, 0  ;;  %v311_v27 = vld [vmem:[%s6440_s27 + $0x10] sm:$0xff]  ;;  %5051 = vmatprep.subr.bf16.mxu0 %v6479_v22  ;;  %v6494_v32 = vpack.c.bf16 %v408_v24, %v404_v23  ;;  %v9176_v33 = vand.u32 4294901760, %v6477_v21  ;;  %v312_v34 = vld [vmem:[%s6440_s27 + $0x18] sm:$0xff]  ;;  %5027 = vmatprep.subr.bf16.mxu1 %v6479_v22  ;;  %v350_v37 = vsel %vm345_vm0, %v310_v26, 0 }
  0x60   : > { %v6487_v28 = vand.u32 4294901760, %v347_v25  ;;  %v5054_v36 = vpack.c.bf16 %v9181_v30, %v9186_v29  ;;  %v353_v38 = vsel %vm345_vm0, %v311_v27, 0  ;;  %v6508_v39 = vand.u32 4294901760, %v350_v37  ;;  %v313_v44 = vld [vmem:[%s6440_s27 + $0x20] sm:$0xff]  ;;  %9680 = vst [vmem:[#allocation19_spill] sm:$0xff] %v6521_v45  ;;  %v314_v54 = vld [vmem:[%s6440_s27 + $0x28] sm:$0xff] }
  0x61   : > { %v6510_v40 = vand.u32 4294901760, %v353_v38  ;;  %v5056_v42 = vpack.c.bf16 %v9176_v33, %v9177_v31  ;;  %v356_v43 = vsel %vm345_vm0, %v312_v34, 0  ;;  %v6523_v46 = vsub.f32 %v332_v9, %v406_v12  ;;  %v315_v1 = vld [vmem:[%s6440_s27 + $0x30] sm:$0xff]  ;;  %v316_v9 = vld [vmem:[%s6440_s27 + $0x38] sm:$0xff]  ;;  %v1725_v19 = vld [vmem:[#allocation5 + $0xa8] sm:$0xff]  ;;  %s301_s26 = scalar_lea.vmem [#allocation7], %s5013_s29 }
  0x62   : > { %9676 = vst [vmem:[#allocation15_spill] sm:$0xff] %v6487_v28  ;;  %v6500_v35 = vsub.f32 %v347_v25, %v6487_v28  ;;  %9678 = vst [vmem:[#allocation17_spill] sm:$0xff] %v6508_v39  ;;  %5053 = vmatpush1.bf16.msra.mxu0 %v6494_v32  ;;  %5029 = vmatpush1.bf16.msra.mxu1 %v6494_v32  ;;  %v6526_v47 = vsub.f32 %v350_v37, %v6508_v39  ;;  %v6538_v52 = vand.u32 4294901760, %v356_v43  ;;  %v324_v33 = vld [vmem:[%s6440_s27 + $0x78] sm:$0xff]  ;;  %s4910_s19 = sshll.u32 %s301_s26, 4  ;;  %s6239_s25 = smov [#allocation7]   ;;  %s9118_s19 = int_to_ptr.vmem [resolvable:$true] %s4910_s19 }
  0x63   : > { %9679 = vst [vmem:[#allocation18_spill] sm:$0xff] %v6510_v40  ;;  %9681 = vst [vmem:[#allocation20_spill] sm:$0xff] %v6523_v46  ;;  %5055 = vmatprep.subr.bf16.mxu0 %v5054_v36  ;;  %v6528_v48 = vsub.f32 %v329_v13, %v404_v23  ;;  %v6530_v49 = vsub.f32 %v331_v14, %v408_v24  ;;  %v6536_v51 = vsub.f32 %v353_v38, %v6510_v40  ;;  %v317_v24 = vld [vmem:[%s6440_s27 + $0x40] sm:$0xff]  ;;  %v318_v36 = vld [vmem:[%s6440_s27 + $0x48] sm:$0xff] }
  0x64   : > { %9677 = vst [vmem:[#allocation16_spill] sm:$0xff] %v6500_v35  ;;  %v9193_v41 = vand.u32 4294901760, %v6500_v35  ;;  %9682 = vst [vmem:[#allocation21_spill] sm:$0xff] %v6526_v47  ;;  %v9192_v50 = vand.u32 4294901760, %v6526_v47  ;;  %v359_v53 = vsel %vm345_vm0, %v313_v44, 0  ;;  %v9174_v55 = vand.u32 4294901760, %v6521_v45 }
  0x65   : > { %9683 = vst [vmem:[#allocation22_spill] sm:$0xff] %v6528_v48  ;;  %9684 = vst [vmem:[#allocation23_spill] sm:$0xff] %v6530_v49  ;;  %v9172_v56 = vand.u32 4294901760, %v6523_v46  ;;  %v6545_v57 = vand.u32 4294901760, %v359_v53  ;;  %v9171_v58 = vand.u32 4294901760, %v6528_v48  ;;  %v9191_v59 = vand.u32 4294901760, %v6536_v51 }
  0x66   : > { %1145 = vmatmul.mubr.f32.vlgmr.msra.gmra.mrb[0].mxu0 %v9193_v41  ;;  %9685 = vst [vmem:[#allocation24_spill] sm:$0xff] %v6536_v51  ;;  %9686 = vst [vmem:[#allocation25_spill] sm:$0xff] %v6538_v52  ;;  %v6552_v60 = vsub.f32 %v356_v43, %v6538_v52  ;;  %v9170_v62 = vand.u32 4294901760, %v6530_v49  ;;  %v362_v63 = vsel %vm345_vm0, %v314_v54, 0  ;;  %v365_v8 = vsel %vm345_vm0, %v315_v1, 0  ;;  %v319_v44 = vld [vmem:[%s6440_s27 + $0x50] sm:$0xff] }
  0x67   : > { %5057 = vmatpush1.bf16.msra.mxu0 %v5056_v42  ;;  %1150 = vmatprep.mubr.f32.mxu0 %v9212_v0  ;;  %9687 = vst [vmem:[#allocation26_spill] sm:$0xff] %v6545_v57  ;;  %v5058_v61 = vpack.c.bf16 %v9172_v56, %v9174_v55  ;;  %v6572_v5 = vsub.f32 %v359_v53, %v6545_v57  ;;  %v6574_v6 = vand.u32 4294901760, %v362_v63  ;;  %v1768_v10 = vand.u32 4294901760, %v6566_v3  ;;  %v320_v1 = vld [vmem:[%s6440_s27 + $0x58] sm:$0xff]  ;;  %v1721_v48 = vld [vmem:[#allocation5 + $0x88] sm:$0xff]  ;;  %v1722_v45 = vld [vmem:[#allocation5 + $0x90] sm:$0xff] }
  0x68   : > { %9688 = vst [vmem:[#allocation27_spill] sm:$0xff] %v6552_v60  ;;  %v5060_v2 = vpack.c.bf16 %v9170_v62, %v9171_v58  ;;  %v9190_v4 = vand.u32 4294901760, %v6552_v60  ;;  %v1772_v11 = vand.u32 4294901760, %v6576_v7  ;;  %v6590_v14 = vand.u32 4294901760, %v365_v8  ;;  %v322_v62 = vld [vmem:[%s6440_s27 + $0x68] sm:$0xff]  ;;  %v1723_v46 = vld [vmem:[#allocation5 + $0x98] sm:$0xff] }
  0x69   : > { %5059 = vmatprep.subr.bf16.mxu0 %v5058_v61  ;;  %9689 = vst [vmem:[#allocation28_spill] sm:$0xff] %v6572_v5  ;;  %9690 = vst [vmem:[#allocation29_spill] sm:$0xff] %v6574_v6  ;;  %v9189_v12 = vand.u32 4294901760, %v6572_v5  ;;  %v6588_v13 = vsub.f32 %v362_v63, %v6574_v6  ;;  %v6595_v15 = vsub.f32 %v6566_v3, %v1768_v10  ;;  %v371_v34 = vsel %vm345_vm0, %v317_v24, 0  ;;  %v321_v24 = vld [vmem:[%s6440_s27 + $0x60] sm:$0xff]  ;;  %v1711_v3 = vld [vmem:[#allocation5 + $0x38] sm:$0xff] }
  0x6a   : > { %1154 = vmatmul.mubr.f32.gmra.mrb[2].mxu0 %v9192_v50  ;;  %9692 = vst [vmem:[#allocation31_spill] sm:$0xff] %v6590_v14  ;;  %v6602_v23 = vsub.f32 %v6576_v7, %v1772_v11  ;;  %v6609_v26 = vsub.f32 %v365_v8, %v6590_v14  ;;  %v6622_v42 = vand.u32 4294901760, %v371_v34  ;;  %v374_v43 = vsel %vm345_vm0, %v318_v36, 0  ;;  %v1717_v50 = vld [vmem:[#allocation5 + $0x68] sm:$0xff]  ;;  %v1726_v5 = vld [vmem:[#allocation5 + $0xb0] sm:$0xff]  ;;  %v1731_v47 = vld [vmem:[#allocation5 + $0xd8] sm:$0xff] }
  0x6b   : > { %1159 = vmatprep.mubr.f32.mxu0 %v9212_v0  ;;  %5061 = vmatpush1.bf16.msra.mxu0 %v5060_v2  ;;  %9691 = vst [vmem:[#allocation30_spill] sm:$0xff] %v6588_v13  ;;  %9693 = vst [vmem:[#allocation32_spill] sm:$0xff] %v6595_v15  ;;  %v9188_v25 = vand.u32 4294901760, %v6588_v13  ;;  %v6633_v61 = vand.u32 4294901760, %v374_v43  ;;  %v377_v63 = vsel %vm345_vm0, %v319_v44, 0  ;;  %v1724_v13 = vld [vmem:[#allocation5 + $0xa0] sm:$0xff] }
  0x6c   : > { %5063 = vmatprep.subr.bf16.mxu0 %v6467_v16  ;;  %v368_v16 = vsel %vm345_vm0, %v316_v9, 0  ;;  %9694 = vst [vmem:[#allocation33_spill] sm:$0xff] %v6602_v23  ;;  %9695 = vst [vmem:[#allocation34_spill] sm:$0xff] %v6609_v26  ;;  %v9187_v37 = vand.u32 4294901760, %v6609_v26  ;;  %v6631_v54 = vsub.f32 %v371_v34, %v6622_v42  ;;  %v6644_v9 = vand.u32 4294901760, %v377_v63 }
  0x6d   : > { %v6611_v27 = vand.u32 4294901760, %v368_v16  ;;  %9698 = vst [vmem:[#allocation37_spill] sm:$0xff] %v6622_v42  ;;  %9700 = vst [vmem:[#allocation39_spill] sm:$0xff] %v6633_v61  ;;  %v6642_v8 = vsub.f32 %v374_v43, %v6633_v61  ;;  %v383_v43 = vsel %vm345_vm0, %v321_v24, 0  ;;  %v1806_v26 = vand.u32 4294901760, %v1722_v45 }
  0x6e   : > { %1163 = vmatmul.mubr.f32.gmra.mrb[4].mxu0 %v9191_v59  ;;  %9699 = vst [vmem:[#allocation38_spill] sm:$0xff] %v6631_v54  ;;  %v9173_v2 = vand.u32 4294901760, %v6631_v54  ;;  %9702 = vst [vmem:[#allocation41_spill] sm:$0xff] %v6644_v9  ;;  %v6653_v36 = vsub.f32 %v377_v63, %v6644_v9  ;;  %v6666_v56 = vand.u32 4294901760, %v383_v43  ;;  %v386_v63 = vsel %vm345_vm0, %v322_v62, 0  ;;  %v1720_v54 = vld [vmem:[#allocation5 + $0x80] sm:$0xff] }
  0x6f   : > { %1168 = vmatprep.mubr.f32.mxu0 %v9212_v0  ;;  %9696 = vst [vmem:[#allocation35_spill] sm:$0xff] %v6611_v27  ;;  %v6620_v38 = vsub.f32 %v368_v16, %v6611_v27  ;;  %9701 = vst [vmem:[#allocation40_spill] sm:$0xff] %v6642_v8  ;;  %v380_v16 = vsel %vm345_vm0, %v320_v1, 0  ;;  %v9175_v34 = vand.u32 4294901760, %v6642_v8 }
  0x70   : > { %9703 = vst [vmem:[#allocation42_spill] sm:$0xff] %v6653_v36  ;;  %v6655_v44 = vand.u32 4294901760, %v380_v16  ;;  %v9178_v1 = vand.u32 4294901760, %v6653_v36  ;;  %9706 = vst [vmem:[#allocation45_spill] sm:$0xff] %v6666_v56  ;;  %v6675_v55 = vsub.f32 %v383_v43, %v6666_v56  ;;  %v392_v43 = vsel %vm345_vm0, %v324_v33, 0 }
  0x71   : > { %9697 = vst [vmem:[#allocation36_spill] sm:$0xff] %v6620_v38  ;;  %v9179_v53 = vand.u32 4294901760, %v6620_v38  ;;  %v1727_v38 = vld [vmem:[#allocation5 + $0xb8] sm:$0xff] }
  0x72   : > { %1172 = vmatmul.mubr.f32.gmra.mrb[6].mxu0 %v9190_v4  ;;  %9704 = vst [vmem:[#allocation43_spill] sm:$0xff] %v6655_v44  ;;  %v6664_v58 = vsub.f32 %v380_v16, %v6655_v44  ;;  %9707 = vst [vmem:[#allocation46_spill] sm:$0xff] %v6675_v55  ;;  %v9185_v62 = vand.u32 4294901760, %v6675_v55  ;;  %v1716_v55 = vld [vmem:[#allocation5 + $0x60] sm:$0xff]  ;;  %v1812_v51 = vand.u32 4294901760, %v1727_v38 }
  0x73   : > { %1177 = vmatprep.mubr.f32.mxu0 %v9212_v0 }
  0x74   : > { %9705 = vst [vmem:[#allocation44_spill] sm:$0xff] %v6664_v58  ;;  %v9180_v24 = vand.u32 4294901760, %v6664_v58  ;;  %v1718_v58 = vld [vmem:[#allocation5 + $0x70] sm:$0xff] }
  0x75   : > { %v1798_v21 = vand.u32 4294901760, %v1718_v58 }
  0x76   : > { %1181 = vmatmul.mubr.f32.gmra.mrb[8].mxu0 %v9189_v12  ;;  %v1714_v12 = vld [vmem:[#allocation5 + $0x50] sm:$0xff] }
  0x77   : > { %1186 = vmatprep.mubr.f32.mxu0 %v9212_v0  ;;  %v6785_v35 = vsub.f32 %v1718_v58, %v1798_v21 }
  0x79   : > { %9736 = vst [vmem:[#allocation74_spill] sm:$0xff] %v6785_v35  ;;  %v1820_v35 = vand.u32 4294901760, %v1731_v47 }
  0x7a   : > { %1190 = vmatmul.mubr.f32.gmra.mrb[10].mxu0 %v9188_v25  ;;  %v1712_v25 = vld [vmem:[#allocation5 + $0x40] sm:$0xff] }
  0x7b   : > { %1195 = vmatprep.mubr.f32.mxu0 %v9212_v0  ;;  %v1786_v49 = vand.u32 4294901760, %v1712_v25 }
  0x7e   : > { %1199 = vmatmul.mubr.f32.gmra.mrb[12].mxu0 %v9187_v37 }
  0x7f   : > { %1204 = vmatprep.mubr.f32.mxu0 %v9212_v0 }
  0x82   : > { %1208 = vmatmul.mubr.f32.gmra.mrb[14].mxu0 %v9179_v53 }
  0x83   : > { %1213 = vmatprep.mubr.f32.mxu0 %v9212_v0 }
  0x86   : > { %1217 = vmatmul.mubr.f32.gmra.mrb[16].mxu0 %v9173_v2  ;;  %v323_v2 = vld [vmem:[%s6440_s27 + $0x70] sm:$0xff]  ;;  %s6166_s27 = sshll.u32 %s6239_s25, 4  ;;  %s6167_s27 = int_to_ptr.vmem [resolvable:$false] %s6166_s27 }
  0x87   : > { %1222 = vmatprep.mubr.f32.mxu0 %v9212_v0  ;;  %v389_v16 = vsel %vm345_vm0, %v323_v2, 0  ;;  %s6168_s16 = scalar_lea.vmem %s6167_s27, 256  ;;  %p6169_p13 = scmp.lt.s32.totalorder %s9118_s19, %s6167_s27 }
  0x8a   : > { %1226 = vmatmul.mubr.f32.gmra.mrb[18].mxu0 %v9175_v34  ;;  %v6677_v34 = vand.u32 4294901760, %v386_v63 }
  0x8b   : > { %1231 = vmatprep.mubr.f32.mxu0 %v9212_v0 }
  0x8c   : > { %9708 = vst [vmem:[#allocation47_spill] sm:$0xff] %v6677_v34  ;;  %v6686_v31 = vsub.f32 %v386_v63, %v6677_v34 }
  0x8e   : > { %1235 = vmatmul.mubr.f32.gmra.mrb[20].mxu0 %v9178_v1  ;;  %9709 = vst [vmem:[#allocation48_spill] sm:$0xff] %v6686_v31  ;;  %v6688_v1 = vand.u32 4294901760, %v389_v16  ;;  %v9184_v2 = vand.u32 4294901760, %v6686_v31  ;;  %v1719_v31 = vld [vmem:[#allocation5 + $0x78] sm:$0xff] }
  0x8f   : > { %1240 = vmatprep.mubr.f32.mxu0 %v9212_v0 }
  0x90   : > { %9710 = vst [vmem:[#allocation49_spill] sm:$0xff] %v6688_v1  ;;  %v6696_v53 = vsub.f32 %v389_v16, %v6688_v1  ;;  %v6723_v16 = vpack.c.bf16 %v1772_v11, %v1768_v10  ;;  %v1708_v11 = vld [vmem:[#allocation5 + $0x20] sm:$0xff] }
  0x91   : > { %v1778_v29 = vand.u32 4294901760, %v1708_v11 }
  0x92   : > { %1244 = vmatmul.mubr.f32.gmra.mrb[22].mxu0 %v9180_v24  ;;  %9711 = vst [vmem:[#allocation50_spill] sm:$0xff] %v6696_v53  ;;  %v6698_v24 = vand.u32 4294901760, %v392_v43  ;;  %v9183_v63 = vand.u32 4294901760, %v6696_v53  ;;  %9714 = vst [vmem:[#allocation53_spill] sm:$0xff] %v6723_v16 }
  0x93   : > { %1249 = vmatprep.mubr.f32.mxu0 %v9212_v0 }
  0x94   : > { %9712 = vst [vmem:[#allocation51_spill] sm:$0xff] %v6698_v24  ;;  %v6705_v30 = vsub.f32 %v392_v43, %v6698_v24  ;;  %v1710_v43 = vld [vmem:[#allocation5 + $0x30] sm:$0xff] }
  0x95   : > { %v1782_v37 = vand.u32 4294901760, %v1710_v43 }
  0x96   : > { %1253 = vmatmul.mubr.f32.gmra.mrb[24].mxu0 %v9185_v62  ;;  %9713 = vst [vmem:[#allocation52_spill] sm:$0xff] %v6705_v30  ;;  %v9182_v33 = vand.u32 4294901760, %v6705_v30  ;;  %v1715_v62 = vld [vmem:[#allocation5 + $0x58] sm:$0xff] }
  0x97   : > { %1258 = vmatprep.mubr.f32.mxu0 %v9212_v0  ;;  %v1788_v53 = vand.u32 4294901760, %v1715_v62 }
  0x99   : > { %v6765_v17 = vsub.f32 %v1715_v62, %v1788_v53 }
  0x9a   : > { %1262 = vmatmul.mubr.f32.gmra.mrb[26].mxu0 %v9184_v2  ;;  %v1713_v2 = vld [vmem:[#allocation5 + $0x48] sm:$0xff] }
  0x9b   : > { %1267 = vmatprep.mubr.f32.mxu0 %v9212_v0  ;;  %v1784_v30 = vand.u32 4294901760, %v1713_v2  ;;  %9727 = vst [vmem:[#allocation65_spill] sm:$0xff] %v6765_v17 }
  0x9d   : > { %v6763_v18 = vpack.c.bf16 %v1788_v53, %v1784_v30 }
  0x9e   : > { %1271 = vmatmul.mubr.f32.gmra.mrb[28].mxu0 %v9183_v63  ;;  %v1780_v63 = vand.u32 4294901760, %v1711_v3 }
  0x9f   : > { %1276 = vmatprep.mubr.f32.mxu0 %v9212_v0  ;;  %9726 = vst [vmem:[#allocation64_spill] sm:$0xff] %v6763_v18 }
  0xa0   : > { %v6751_v8 = vsub.f32 %v1711_v3, %v1780_v63  ;;  %v1794_v3 = vand.u32 4294901760, %v1716_v55 }
  0xa2   : > { %1280 = vmatmul.mubr.f32.gmra.mrb[30].mxu0 %v9182_v33  ;;  %9720 = vst [vmem:[#allocation59_spill] sm:$0xff] %v6751_v8 }
  0xa3   : > { %1374 = vmatprep.mubr.f32.mxu0 %v9212_v0 }
  0xa6   : > { %1376 = vmatmul.mubr.f32.vlgmr.msra.gmra.mrb[0].mxu0 %v6487_v28 }
  0xa7   : > { %5065 = vmatpush1.bf16.msra.mxu0 %v6475_v20  ;;  %1381 = vmatprep.mubr.f32.mxu0 %v9212_v0  ;;  %v1704_v20 = vld [vmem:[#allocation5] sm:$0xff] }
  0xa8   : > { %5067 = vmatprep.subr.bf16.mxu0 %v6479_v22  ;;  %v1706_v22 = vld [vmem:[#allocation5 + $0x10] sm:$0xff]  ;;  %v1770_v7 = vand.u32 4294901760, %v1704_v20 }
  0xa9   : > { %v1774_v10 = vand.u32 4294901760, %v1706_v22 }
  0xaa   : > { %1383 = vmatmul.mubr.f32.gmra.mrb[2].mxu0 %v6508_v39  ;;  %v6743_v59 = vsub.f32 %v1704_v20, %v1770_v7  ;;  %v6754_v20 = vpack.c.bf16 %v1782_v37, %v1778_v29 }
  0xab   : > { %1388 = vmatprep.mubr.f32.mxu0 %v9212_v0  ;;  %5069 = vmatpush1.bf16.msra.mxu0 %v6494_v32  ;;  %v1709_v32 = vld [vmem:[#allocation5 + $0x28] sm:$0xff]  ;;  %v6741_v4 = vpack.c.bf16 %v1774_v10, %v1770_v7  ;;  %v6745_v41 = vsub.f32 %v1706_v22, %v1774_v10  ;;  %v6756_v22 = vsub.f32 %v1708_v11, %v1778_v29  ;;  %v1800_v29 = vand.u32 4294901760, %v1721_v48 }
  0xac   : > { %5071 = vmatprep.subr.bf16.mxu0 %v6723_v16  ;;  %v1776_v33 = vand.u32 4294901760, %v1709_v32  ;;  %9716 = vst [vmem:[#allocation55_spill] sm:$0xff] %v6743_v59  ;;  %9721 = vst [vmem:[#allocation60_spill] sm:$0xff] %v6754_v20  ;;  %v6758_v7 = vsub.f32 %v1710_v43, %v1782_v37  ;;  %v6760_v10 = vsub.f32 %v1713_v2, %v1784_v30  ;;  %v1804_v11 = vand.u32 4294901760, %v1723_v46 }
  0xad   : > { %9715 = vst [vmem:[#allocation54_spill] sm:$0xff] %v6741_v4  ;;  %9717 = vst [vmem:[#allocation56_spill] sm:$0xff] %v6745_v41  ;;  %v6769_v2 = vsub.f32 %v1712_v25, %v1786_v49  ;;  %v1802_v43 = vand.u32 4294901760, %v1720_v54  ;;  %v1808_v30 = vand.u32 4294901760, %v1725_v19  ;;  %v6783_v25 = vsub.f32 %v1716_v55, %v1794_v3  ;;  %v1733_v55 = vld [vmem:[#allocation5 + $0xe8] sm:$0xff] }
  0xae   : > { %1390 = vmatmul.mubr.f32.gmra.mrb[4].mxu0 %v6510_v40  ;;  %v6747_v16 = vpack.c.bf16 %v1780_v63, %v1776_v33  ;;  %v6749_v36 = vsub.f32 %v1709_v32, %v1776_v33  ;;  %9722 = vst [vmem:[#allocation61_spill] sm:$0xff] %v6756_v22  ;;  %9723 = vst [vmem:[#allocation62_spill] sm:$0xff] %v6758_v7  ;;  %v9725_v33 = vmov 0.0   ;;  %v1792_v63 = vand.u32 4294901760, %v1717_v50 }
  0xaf   : > { %1395 = vmatprep.mubr.f32.mxu0 %v9212_v0  ;;  %9724 = vst [vmem:[#allocation63_spill] sm:$0xff] %v6760_v10  ;;  %v1796_v32 = vand.u32 4294901760, %v1719_v31  ;;  %9729 = vst [vmem:[#allocation67_spill] sm:$0xff] %v6769_v2 }
  0xb0   : > { %9718 = vst [vmem:[#allocation57_spill] sm:$0xff] %v6747_v16  ;;  %9719 = vst [vmem:[#allocation58_spill] sm:$0xff] %v6749_v36 }
  0xb1   : > { %v6777_v53 = vpack.c.bf16 %v1796_v32, %v1792_v63  ;;  %v6779_v62 = vsub.f32 %v1719_v31, %v1796_v32  ;;  %9735 = vst [vmem:[#allocation73_spill] sm:$0xff] %v6783_v25  ;;  %v6793_v31 = vpack.c.bf16 %v1806_v26, %v1802_v43  ;;  %v6795_v32 = vsub.f32 %v1720_v54, %v1802_v43  ;;  %v1735_v25 = vld [vmem:[#allocation5 + $0xf8] sm:$0xff] }
  0xb2   : > { %1397 = vmatmul.mubr.f32.gmra.mrb[6].mxu0 %v6538_v52  ;;  %v1739_v43 = vld [vmem:[#allocation5 + $0x118] sm:$0xff] }
  0xb3   : > { %1402 = vmatprep.mubr.f32.mxu0 %v9212_v0  ;;  %9732 = vst [vmem:[#allocation70_spill] sm:$0xff] %v6777_v53  ;;  %9733 = vst [vmem:[#allocation71_spill] sm:$0xff] %v6779_v62  ;;  %v1732_v62 = vld [vmem:[#allocation5 + $0xe0] sm:$0xff] }
  0xb4   : > { %9740 = vst [vmem:[#allocation78_spill] sm:$0xff] %v6793_v31  ;;  %9741 = vst [vmem:[#allocation79_spill] sm:$0xff] %v6795_v32  ;;  %v1736_v32 = vld [vmem:[#allocation5 + $0x100] sm:$0xff] }
  0xb6   : > { %1404 = vmatmul.mubr.f32.gmra.mrb[8].mxu0 %v6545_v57 }
  0xb7   : > { %1409 = vmatprep.mubr.f32.mxu0 %v9212_v0 }
  0xba   : > { %1411 = vmatmul.mubr.f32.gmra.mrb[10].mxu0 %v6574_v6  ;;  %v6789_v6 = vsub.f32 %v1721_v48, %v1800_v29  ;;  %v6805_v48 = vsub.f32 %v1727_v38, %v1812_v51  ;;  %v1743_v38 = vld [vmem:[#allocation5 + $0x138] sm:$0xff] }
  0xbb   : > { %1416 = vmatprep.mubr.f32.mxu0 %v9212_v0 }
  0xbc   : > { %9738 = vst [vmem:[#allocation76_spill] sm:$0xff] %v6789_v6  ;;  %9745 = vst [vmem:[#allocation83_spill] sm:$0xff] %v6805_v48  ;;  %v1828_v6 = vand.u32 4294901760, %v1735_v25 }
  0xbe   : > { %1418 = vmatmul.mubr.f32.gmra.mrb[12].mxu0 %v6590_v14  ;;  %v1730_v14 = vld [vmem:[#allocation5 + $0xd0] sm:$0xff]  ;;  %v6831_v31 = vsub.f32 %v1735_v25, %v1828_v6 }
  0xbf   : > { %1423 = vmatprep.mubr.f32.mxu0 %v9212_v0 }
  0xc0   : > { %9757 = vst [vmem:[#allocation95_spill] sm:$0xff] %v6831_v31 }
  0xc2   : > { %1425 = vmatmul.mubr.f32.gmra.mrb[14].mxu0 %v6611_v27  ;;  %v1729_v27 = vld [vmem:[#allocation5 + $0xc8] sm:$0xff] }
  0xc3   : > { %1430 = vmatprep.mubr.f32.mxu0 %v9212_v0  ;;  %v1790_v0 = vand.u32 4294901760, %v1714_v12  ;;  %v1816_v58 = vand.u32 4294901760, %v1729_v27 }
  0xc5   : > { %v6767_v37 = vpack.c.bf16 %v1790_v0, %v1786_v49  ;;  %v6772_v60 = vsub.f32 %v1714_v12, %v1790_v0  ;;  %v6781_v49 = vpack.c.bf16 %v1798_v21, %v1794_v3  ;;  %v6787_v0 = vpack.c.bf16 %v1804_v11, %v1800_v29 }
  0xc6   : > { %1432 = vmatmul.mubr.f32.gmra.mrb[16].mxu0 %v6622_v42  ;;  %v6774_v42 = vsub.f32 %v1717_v50, %v1792_v63  ;;  %v1810_v50 = vand.u32 4294901760, %v1724_v13  ;;  %v1814_v12 = vand.u32 4294901760, %v1726_v5  ;;  %v6791_v63 = vsub.f32 %v1723_v46, %v1804_v11  ;;  %v1737_v11 = vld [vmem:[#allocation5 + $0x108] sm:$0xff] }
  0xc7   : > { %1437 = vmatprep.mubr.f32.mxu0 %v9725_v33  ;;  %9728 = vst [vmem:[#allocation66_spill] sm:$0xff] %v6767_v37  ;;  %9730 = vst [vmem:[#allocation68_spill] sm:$0xff] %v6772_v60  ;;  %v6798_v3 = vsub.f32 %v1722_v45, %v1806_v26  ;;  %v6800_v21 = vpack.c.bf16 %v1812_v51, %v1808_v30  ;;  %v6803_v46 = vsub.f32 %v1725_v19, %v1808_v30  ;;  %v1738_v30 = vld [vmem:[#allocation5 + $0x110] sm:$0xff]  ;;  %v1741_v51 = vld [vmem:[#allocation5 + $0x128] sm:$0xff] }
  0xc8   : > { %9731 = vst [vmem:[#allocation69_spill] sm:$0xff] %v6774_v42  ;;  %9734 = vst [vmem:[#allocation72_spill] sm:$0xff] %v6781_v49  ;;  %v1734_v42 = vld [vmem:[#allocation5 + $0xf0] sm:$0xff]  ;;  %v1822_v29 = vand.u32 4294901760, %v1730_v14  ;;  %v6809_v45 = vsub.f32 %v1724_v13, %v1810_v50  ;;  %v6811_v26 = vsub.f32 %v1726_v5, %v1814_v12  ;;  %v6816_v48 = vpack.c.bf16 %v1820_v35, %v1816_v58 }
  0xc9   : > { %9737 = vst [vmem:[#allocation75_spill] sm:$0xff] %v6787_v0  ;;  %9739 = vst [vmem:[#allocation77_spill] sm:$0xff] %v6791_v63  ;;  %v6813_v63 = vsub.f32 %v1729_v27, %v1816_v58  ;;  %v1830_v19 = vand.u32 4294901760, %v1734_v42  ;;  %v1832_v13 = vand.u32 4294901760, %v1737_v11  ;;  %v1840_v58 = vand.u32 4294901760, %v1741_v51 }
  0xca   : > { %1439 = vmatmul.mubr.f32.gmra.mrb[18].mxu0 %v6633_v61  ;;  %v1728_v61 = vld [vmem:[#allocation5 + $0xc0] sm:$0xff]  ;;  %9742 = vst [vmem:[#allocation80_spill] sm:$0xff] %v6798_v3  ;;  %9743 = vst [vmem:[#allocation81_spill] sm:$0xff] %v6800_v21  ;;  %v1824_v3 = vand.u32 4294901760, %v1733_v55  ;;  %v1826_v21 = vand.u32 4294901760, %v1732_v62 }
  0xcb   : > { %1444 = vmatprep.mubr.f32.mxu0 %v9725_v33  ;;  %9744 = vst [vmem:[#allocation82_spill] sm:$0xff] %v6803_v46  ;;  %v1818_v54 = vand.u32 4294901760, %v1728_v61  ;;  %9747 = vst [vmem:[#allocation85_spill] sm:$0xff] %v6809_v45  ;;  %v6818_v46 = vsub.f32 %v1731_v47, %v1820_v35  ;;  %v1742_v45 = vld [vmem:[#allocation5 + $0x130] sm:$0xff]  ;;  %v1745_v35 = vld [vmem:[#allocation5 + $0x148] sm:$0xff] }
  0xcc   : > { %9748 = vst [vmem:[#allocation86_spill] sm:$0xff] %v6811_v26  ;;  %9749 = vst [vmem:[#allocation87_spill] sm:$0xff] %v6813_v63  ;;  %v6827_v63 = vsub.f32 %v1733_v55, %v1824_v3  ;;  %v1740_v26 = vld [vmem:[#allocation5 + $0x120] sm:$0xff]  ;;  %v1747_v47 = vld [vmem:[#allocation5 + $0x158] sm:$0xff]  ;;  %v6833_v60 = vpack.c.bf16 %v1830_v19, %v1826_v21  ;;  %v6838_v55 = vsub.f32 %v1734_v42, %v1830_v19 }
  0xcd   : > { %9750 = vst [vmem:[#allocation88_spill] sm:$0xff] %v6816_v48  ;;  %9751 = vst [vmem:[#allocation89_spill] sm:$0xff] %v6818_v46  ;;  %v6821_v5 = vpack.c.bf16 %v1822_v29, %v1818_v54  ;;  %v6823_v27 = vsub.f32 %v1728_v61, %v1818_v54  ;;  %v1844_v48 = vand.u32 4294901760, %v1743_v38  ;;  %v6829_v46 = vpack.c.bf16 %v1828_v6, %v1824_v3 }
  0xce   : > { %1446 = vmatmul.mubr.f32.gmra.mrb[20].mxu0 %v6644_v9  ;;  %v6807_v9 = vpack.c.bf16 %v1814_v12, %v1810_v50  ;;  %v1836_v50 = vand.u32 4294901760, %v1739_v43  ;;  %v6825_v12 = vsub.f32 %v1730_v14, %v1822_v29  ;;  %9755 = vst [vmem:[#allocation93_spill] sm:$0xff] %v6827_v63  ;;  %9758 = vst [vmem:[#allocation96_spill] sm:$0xff] %v6833_v60  ;;  %v1744_v14 = vld [vmem:[#allocation5 + $0x140] sm:$0xff]  ;;  %v1842_v29 = vand.u32 4294901760, %v1740_v26  ;;  %v1749_v63 = vld [vmem:[#allocation5 + $0x168] sm:$0xff] }
  0xcf   : > { %1451 = vmatprep.mubr.f32.mxu0 %v9725_v33  ;;  %9752 = vst [vmem:[#allocation90_spill] sm:$0xff] %v6821_v5  ;;  %9753 = vst [vmem:[#allocation91_spill] sm:$0xff] %v6823_v27  ;;  %v6835_v61 = vsub.f32 %v1732_v62, %v1826_v21  ;;  %v1746_v27 = vld [vmem:[#allocation5 + $0x150] sm:$0xff]  ;;  %v1751_v5 = vld [vmem:[#allocation5 + $0x178] sm:$0xff]  ;;  %v6843_v6 = vsub.f32 %v1737_v11, %v1832_v13  ;;  %v1848_v62 = vand.u32 4294901760, %v1745_v35  ;;  %v1852_v3 = vand.u32 4294901760, %v1747_v47 }
  0xd0   : > { %9746 = vst [vmem:[#allocation84_spill] sm:$0xff] %v6807_v9  ;;  %9754 = vst [vmem:[#allocation92_spill] sm:$0xff] %v6825_v12  ;;  %v1834_v9 = vand.u32 4294901760, %v1736_v32  ;;  %v6840_v54 = vpack.c.bf16 %v1836_v50, %v1832_v13  ;;  %v1846_v12 = vand.u32 4294901760, %v1742_v45  ;;  %v6845_v25 = vsub.f32 %v1739_v43, %v1836_v50  ;;  %v1753_v11 = vld [vmem:[#allocation5 + $0x188] sm:$0xff]  ;;  %v1755_v13 = vld [vmem:[#allocation5 + $0x198] sm:$0xff] }
  0xd1   : > { %9756 = vst [vmem:[#allocation94_spill] sm:$0xff] %v6829_v46  ;;  %9759 = vst [vmem:[#allocation97_spill] sm:$0xff] %v6835_v61  ;;  %v6853_v19 = vpack.c.bf16 %v1844_v48, %v1840_v58  ;;  %v1750_v61 = vld [vmem:[#allocation5 + $0x170] sm:$0xff]  ;;  %v1850_v31 = vand.u32 4294901760, %v1744_v14  ;;  %v1856_v60 = vand.u32 4294901760, %v1749_v63  ;;  %v1860_v46 = vand.u32 4294901760, %v1751_v5 }
  0xd2   : > { %1453 = vmatmul.mubr.f32.gmra.mrb[22].mxu0 %v6655_v44  ;;  %v1838_v44 = vand.u32 4294901760, %v1738_v30  ;;  %9760 = vst [vmem:[#allocation98_spill] sm:$0xff] %v6838_v55  ;;  %9761 = vst [vmem:[#allocation99_spill] sm:$0xff] %v6840_v54  ;;  %v1748_v55 = vld [vmem:[#allocation5 + $0x160] sm:$0xff]  ;;  %v1854_v54 = vand.u32 4294901760, %v1746_v27  ;;  %v6856_v43 = vsub.f32 %v1741_v51, %v1840_v58  ;;  %v6858_v50 = vsub.f32 %v1743_v38, %v1844_v48  ;;  %v1757_v58 = vld [vmem:[#allocation5 + $0x1a8] sm:$0xff] }
  0xd3   : > { %1458 = vmatprep.mubr.f32.mxu0 %v9725_v33  ;;  %9762 = vst [vmem:[#allocation100_spill] sm:$0xff] %v6843_v6  ;;  %9763 = vst [vmem:[#allocation101_spill] sm:$0xff] %v6845_v25  ;;  %v1752_v25 = vld [vmem:[#allocation5 + $0x180] sm:$0xff]  ;;  %v1754_v6 = vld [vmem:[#allocation5 + $0x190] sm:$0xff]  ;;  %v6871_v51 = vsub.f32 %v1747_v47, %v1852_v3  ;;  %v1864_v48 = vand.u32 4294901760, %v1753_v11  ;;  %v1868_v38 = vand.u32 4294901760, %v1755_v13  ;;  %v6884_v47 = vsub.f32 %v1751_v5, %v1860_v46 }
  0xd4   : > { %v6847_v21 = vpack.c.bf16 %v1838_v44, %v1834_v9  ;;  %v6851_v42 = vsub.f32 %v1738_v30, %v1838_v44  ;;  %9767 = vst [vmem:[#allocation105_spill] sm:$0xff] %v6853_v19  ;;  %9768 = vst [vmem:[#allocation106_spill] sm:$0xff] %v6856_v43  ;;  %v6862_v44 = vsub.f32 %v1740_v26, %v1842_v29 }
  0xd5   : > { %9769 = vst [vmem:[#allocation107_spill] sm:$0xff] %v6858_v50  ;;  %v6867_v30 = vpack.c.bf16 %v1852_v3, %v1848_v62  ;;  %v6869_v19 = vsub.f32 %v1745_v35, %v1848_v62  ;;  %9775 = vst [vmem:[#allocation113_spill] sm:$0xff] %v6871_v51  ;;  %v6873_v26 = vpack.c.bf16 %v1854_v54, %v1850_v31  ;;  %v1866_v62 = vand.u32 4294901760, %v1752_v25  ;;  %v1761_v51 = vld [vmem:[#allocation5 + $0x1c8] sm:$0xff] }
  0xd6   : > { %1460 = vmatmul.mubr.f32.gmra.mrb[24].mxu0 %v6666_v56  ;;  %9764 = vst [vmem:[#allocation102_spill] sm:$0xff] %v6847_v21  ;;  %v6849_v56 = vsub.f32 %v1736_v32, %v1834_v9  ;;  %9766 = vst [vmem:[#allocation104_spill] sm:$0xff] %v6851_v42  ;;  %v6860_v9 = vpack.c.bf16 %v1846_v12, %v1842_v29  ;;  %v6865_v32 = vsub.f32 %v1742_v45, %v1846_v12 }
  0xd7   : > { %1465 = vmatprep.mubr.f32.mxu0 %v9725_v33  ;;  %9771 = vst [vmem:[#allocation109_spill] sm:$0xff] %v6862_v44  ;;  %9773 = vst [vmem:[#allocation111_spill] sm:$0xff] %v6867_v30  ;;  %v1858_v42 = vand.u32 4294901760, %v1748_v55  ;;  %v6875_v29 = vsub.f32 %v1744_v14, %v1850_v31  ;;  %v6877_v45 = vsub.f32 %v1746_v27, %v1854_v54  ;;  %v1756_v30 = vld [vmem:[#allocation5 + $0x1a0] sm:$0xff]  ;;  %v1870_v3 = vand.u32 4294901760, %v1754_v6 }
  0xd8   : > { %9765 = vst [vmem:[#allocation103_spill] sm:$0xff] %v6849_v56  ;;  %9770 = vst [vmem:[#allocation108_spill] sm:$0xff] %v6860_v9  ;;  %v1862_v56 = vand.u32 4294901760, %v1750_v61  ;;  %v6879_v12 = vpack.c.bf16 %v1860_v46, %v1856_v60  ;;  %v6882_v35 = vsub.f32 %v1749_v63, %v1856_v60  ;;  %v1872_v14 = vand.u32 4294901760, %v1757_v58 }
  0xd9   : > { %9772 = vst [vmem:[#allocation110_spill] sm:$0xff] %v6865_v32  ;;  %9774 = vst [vmem:[#allocation112_spill] sm:$0xff] %v6869_v19  ;;  %v1758_v32 = vld [vmem:[#allocation5 + $0x1b0] sm:$0xff]  ;;  %v6889_v27 = vsub.f32 %v1748_v55, %v1858_v42  ;;  %v6895_v60 = vpack.c.bf16 %v1868_v38, %v1864_v48  ;;  %v1874_v63 = vand.u32 4294901760, %v1756_v30  ;;  %v6897_v5 = vsub.f32 %v1753_v11, %v1864_v48 }
  0xda   : > { %1467 = vmatmul.mubr.f32.gmra.mrb[26].mxu0 %v6677_v34  ;;  %v1759_v34 = vld [vmem:[#allocation5 + $0x1b8] sm:$0xff]  ;;  %9776 = vst [vmem:[#allocation114_spill] sm:$0xff] %v6873_v26  ;;  %9777 = vst [vmem:[#allocation115_spill] sm:$0xff] %v6875_v29  ;;  %v6887_v31 = vpack.c.bf16 %v1862_v56, %v1858_v42  ;;  %v6893_v29 = vsub.f32 %v1750_v61, %v1862_v56  ;;  %v1878_v46 = vand.u32 4294901760, %v1758_v32  ;;  %v1762_v55 = vld [vmem:[#allocation5 + $0x1d0] sm:$0xff] }
  0xdb   : > { %1472 = vmatprep.mubr.f32.mxu0 %v9725_v33  ;;  %9778 = vst [vmem:[#allocation116_spill] sm:$0xff] %v6877_v45  ;;  %9779 = vst [vmem:[#allocation117_spill] sm:$0xff] %v6879_v12  ;;  %v1763_v26 = vld [vmem:[#allocation5 + $0x1d8] sm:$0xff]  ;;  %v1876_v54 = vand.u32 4294901760, %v1759_v34  ;;  %v1673_v12 = vld [vmem:[%s6424_s8 + $0x8] sm:$0xff]  ;;  %v6902_v42 = vpack.c.bf16 %v1870_v3, %v1866_v62  ;;  %v6904_v56 = vsub.f32 %v1752_v25, %v1866_v62 }
  0xdc   : > { %9780 = vst [vmem:[#allocation118_spill] sm:$0xff] %v6882_v35  ;;  %9781 = vst [vmem:[#allocation119_spill] sm:$0xff] %v6884_v47  ;;  %v1672_v45 = vld [vmem:[%s6424_s8] sm:$0xff]  ;;  %v1880_v47 = vand.u32 4294901760, %v1761_v51  ;;  %v1884_v35 = vand.u32 4294901760, %v1763_v26  ;;  %v1765_v61 = vld [vmem:[#allocation5 + $0x1e8] sm:$0xff]  ;;  %v6922_v25 = vsub.f32 %v1756_v30, %v1874_v63 }
  0xdd   : > { %9782 = vst [vmem:[#allocation120_spill] sm:$0xff] %v6887_v31  ;;  %9783 = vst [vmem:[#allocation121_spill] sm:$0xff] %v6889_v27  ;;  %v1760_v31 = vld [vmem:[#allocation5 + $0x1c0] sm:$0xff]  ;;  %v6908_v11 = vand.u32 4294901760, %v1672_v45  ;;  %v6913_v48 = vpack.c.bf16 %v1876_v54, %v1872_v14  ;;  %v6925_v27 = vsub.f32 %v1758_v32, %v1878_v46 }
  0xde   : > { %1474 = vmatmul.mubr.f32.gmra.mrb[28].mxu0 %v6688_v1  ;;  %9784 = vst [vmem:[#allocation122_spill] sm:$0xff] %v6893_v29  ;;  %9785 = vst [vmem:[#allocation123_spill] sm:$0xff] %v6895_v60  ;;  %v6899_v1 = vsub.f32 %v1755_v13, %v1868_v38  ;;  %v1767_v60 = vld [vmem:[#allocation5 + $0x1f8] sm:$0xff]  ;;  %v6906_v29 = vand.u32 4294901760, %v1673_v12  ;;  %v6911_v13 = vsub.f32 %v1754_v6, %v1870_v3  ;;  %v1882_v62 = vand.u32 4294901760, %v1760_v31 }
  0xdf   : > { %1479 = vmatprep.mubr.f32.mxu0 %v9725_v33  ;;  %9786 = vst [vmem:[#allocation124_spill] sm:$0xff] %v6897_v5  ;;  %9788 = vst [vmem:[#allocation126_spill] sm:$0xff] %v6902_v42  ;;  %v6915_v38 = vsub.f32 %v1757_v58, %v1872_v14  ;;  %v1675_v42 = vld [vmem:[%s6424_s8 + $0x18] sm:$0xff]  ;;  %v1674_v5 = vld [vmem:[%s6424_s8 + $0x10] sm:$0xff]  ;;  %v6927_v19 = vpack.c.bf16 %v1884_v35, %v1880_v47  ;;  %v1888_v6 = vand.u32 4294901760, %v1765_v61  ;;  %v1892_v3 = vand.u32 4294901760, %v1767_v60 }
  0xe0   : > { %9787 = vst [vmem:[#allocation125_spill] sm:$0xff] %v6899_v1  ;;  %9789 = vst [vmem:[#allocation127_spill] sm:$0xff] %v6904_v56  ;;  %v6920_v1 = vpack.c.bf16 %v1878_v46, %v1874_v63  ;;  %v1886_v56 = vand.u32 4294901760, %v1762_v55  ;;  %v1764_v58 = vld [vmem:[#allocation5 + $0x1e0] sm:$0xff]  ;;  %v1766_v14 = vld [vmem:[#allocation5 + $0x1f0] sm:$0xff]  ;;  %v6937_v63 = vand.u32 4294901760, %v1675_v42  ;;  %v6941_v32 = vsub.f32 %v1761_v51, %v1880_v47 }
  0xe1   : > { %9790 = vst [vmem:[#allocation128_spill] sm:$0xff] %v6906_v29  ;;  %9791 = vst [vmem:[#allocation129_spill] sm:$0xff] %v6908_v11  ;;  %v6957_v47 = vpack.c.bf16 %v1892_v3, %v1888_v6  ;;  %v1890_v46 = vand.u32 4294901760, %v1764_v58 }
  0xe2   : > { %1481 = vmatmul.mubr.f32.gmra.mrb[30].mxu0 %v6698_v24  ;;  %9792 = vst [vmem:[#allocation130_spill] sm:$0xff] %v6911_v13  ;;  %9793 = vst [vmem:[#allocation131_spill] sm:$0xff] %v6913_v48  ;;  %v6917_v24 = vsub.f32 %v1759_v34, %v1876_v54  ;;  %v6931_v34 = vsub.f32 %v1673_v12, %v6906_v29  ;;  %v6934_v54 = vsub.f32 %v1672_v45, %v6908_v11  ;;  %v9965_v13 = vld [vmem:[#allocation14_spill] sm:$0xff] }
  0xe3   : > { %1559 = vmatprep.mubr.f32.mxu0 %v9725_v33  ;;  %9794 = vst [vmem:[#allocation132_spill] sm:$0xff] %v6915_v38  ;;  %9796 = vst [vmem:[#allocation134_spill] sm:$0xff] %v6920_v1  ;;  %v6945_v12 = vand.u32 4294901760, %v1674_v5  ;;  %v6948_v45 = vsub.f32 %v1763_v26, %v1884_v35  ;;  %v6950_v30 = vpack.c.bf16 %v1886_v56, %v1882_v62  ;;  %v9810_v26 = vand.u32 4294901760, %v6595_v15 }
  0xe4   : > { %9795 = vst [vmem:[#allocation133_spill] sm:$0xff] %v6917_v24  ;;  %9797 = vst [vmem:[#allocation135_spill] sm:$0xff] %v6922_v25  ;;  %v6952_v11 = vsub.f32 %v1760_v31, %v1882_v62  ;;  %v6955_v51 = vsub.f32 %v1762_v55, %v1886_v56  ;;  %v6966_v31 = vsub.f32 %v1675_v42, %v6937_v63  ;;  %v1677_v62 = vld [vmem:[%s6424_s8 + $0x28] sm:$0xff]  ;;  %v1676_v55 = vld [vmem:[%s6424_s8 + $0x20] sm:$0xff]  ;;  %v9812_v56 = vand.u32 4294901760, %v6602_v23 }
  0xe5   : > { %9798 = vst [vmem:[#allocation136_spill] sm:$0xff] %v6925_v27  ;;  %9799 = vst [vmem:[#allocation137_spill] sm:$0xff] %v6927_v19  ;;  %v2156_v35 = vsub.f32 %v6595_v15, %v9810_v26  ;;  %v9813_v29 = vand.u32 4294901760, %v6743_v59  ;;  %v6982_v42 = vsub.f32 %v1765_v61, %v1888_v6  ;;  %v9816_v26 = vand.u32 4294901760, %v6745_v41  ;;  %v9978_v24 = vld [vmem:[#allocation20_spill] sm:$0xff] }
  0xe6   : > { %1561 = vmatmul.mubr.f32.vlgmr.msra.gmra.mrb[0].mxu0 %v6487_v28  ;;  %9800 = vst [vmem:[#allocation138_spill] sm:$0xff] %v6931_v34  ;;  %9801 = vst [vmem:[#allocation139_spill] sm:$0xff] %v6934_v54  ;;  %v1894_v28 = vand.u32 4294901760, %v1766_v14  ;;  %v9821_v61 = vand.u32 4294901760, %v6931_v34 }
  0xe7   : > { %9802 = vst [vmem:[#allocation140_spill] sm:$0xff] %v6937_v63  ;;  %5073 = vmatpush1.bf16.msra.mxu0 %v6741_v4  ;;  %1566 = vmatprep.mubr.f32.mxu0 %v9725_v33  ;;  %9803 = vst [vmem:[#allocation141_spill] sm:$0xff] %v6941_v32  ;;  %v2168_v4 = vsub.f32 %v6602_v23, %v9812_v56  ;;  %v6989_v56 = vsub.f32 %v1767_v60, %v1892_v3  ;;  %v2157_v63 = vand.u32 4294901760, %v2156_v35 }
  0xe8   : > { %9804 = vst [vmem:[#allocation142_spill] sm:$0xff] %v6945_v12  ;;  %5075 = vmatprep.subr.bf16.mxu0 %v6747_v16  ;;  %9805 = vst [vmem:[#allocation143_spill] sm:$0xff] %v6948_v45  ;;  %v2162_v16 = vsub.f32 %v6743_v59, %v9813_v29  ;;  %v6991_v23 = vpack.c.bf16 %v1894_v28, %v1890_v46  ;;  %v6993_v29 = vand.u32 4294901760, %v1677_v62  ;;  %v9824_v3 = vand.u32 4294901760, %v6751_v8  ;;  %v1678_v59 = vld [vmem:[%s6424_s8 + $0x30] sm:$0xff] }
  0xe9   : > { %9806 = vst [vmem:[#allocation144_spill] sm:$0xff] %v6950_v30  ;;  %9807 = vst [vmem:[#allocation145_spill] sm:$0xff] %v6952_v11  ;;  %v7001_v6 = vsub.f32 %v6931_v34, %v9821_v61  ;;  %v7023_v35 = vsub.f32 %v1764_v58, %v1890_v46 }
  0xea   : > { %9808 = vst [vmem:[#allocation146_spill] sm:$0xff] %v6955_v51  ;;  %9809 = vst [vmem:[#allocation147_spill] sm:$0xff] %v6957_v47  ;;  %1568 = vmatmul.mubr.f32.gmra.mrb[2].mxu0 %v6508_v39  ;;  %v6979_v39 = vsub.f32 %v1674_v5, %v6945_v12  ;;  %v6995_v5 = vand.u32 4294901760, %v1676_v55  ;;  %v2163_v12 = vand.u32 4294901760, %v2162_v16  ;;  %v2192_v15 = vsub.f32 %v6751_v8, %v9824_v3  ;;  %v1680_v8 = vld [vmem:[%s6424_s8 + $0x40] sm:$0xff] }
  0xeb   : > { %9811 = vst [vmem:[#allocation148_spill] sm:$0xff] %v6966_v31  ;;  %5077 = vmatpush1.bf16.msra.mxu0 %v6754_v20  ;;  %1573 = vmatprep.mubr.f32.mxu0 %v9725_v33  ;;  %9815 = vst [vmem:[#allocation150_spill] sm:$0xff] %v6982_v42  ;;  %v2174_v20 = vsub.f32 %v6745_v41, %v9816_v26  ;;  %v9822_v26 = vand.u32 4294901760, %v6934_v54  ;;  %v9823_v41 = vand.u32 4294901760, %v6749_v36  ;;  %v7055_v3 = vand.u32 4294901760, %v1678_v59 }
  0xec   : > { %9814 = vst [vmem:[#allocation149_spill] sm:$0xff] %v6979_v39  ;;  %5079 = vmatprep.subr.bf16.mxu0 %v6763_v18  ;;  %9817 = vst [vmem:[#allocation151_spill] sm:$0xff] %v6989_v56  ;;  %v2169_v18 = vand.u32 4294901760, %v2168_v4  ;;  %v7025_v4 = vsub.f32 %v1766_v14, %v1894_v28  ;;  %v7028_v16 = vsub.f32 %v1677_v62, %v6993_v29  ;;  %v9830_v28 = vand.u32 4294901760, %v6756_v22 }
  0xed   : > { %9818 = vst [vmem:[#allocation152_spill] sm:$0xff] %v6991_v23  ;;  %9819 = vst [vmem:[#allocation153_spill] sm:$0xff] %v6993_v29  ;;  %v7006_v60 = vsub.f32 %v6934_v54, %v9822_v26  ;;  %v2175_v34 = vand.u32 4294901760, %v2174_v20  ;;  %v2180_v26 = vsub.f32 %v6749_v36, %v9823_v41  ;;  %v1679_v54 = vld [vmem:[%s6424_s8 + $0x38] sm:$0xff]  ;;  %v7031_v20 = vsub.f32 %v1676_v55, %v6995_v5  ;;  %v9843_v29 = vld [vmem:[#allocation73_spill] sm:$0xff] }
  0xee   : > { %9820 = vst [vmem:[#allocation154_spill] sm:$0xff] %v6995_v5  ;;  %1575 = vmatmul.mubr.f32.gmra.mrb[4].mxu0 %v6510_v40  ;;  %9825 = vst [vmem:[#allocation155_spill] sm:$0xff] %v7023_v35  ;;  %v2186_v58 = vsub.f32 %v6756_v22, %v9830_v28  ;;  %v7046_v14 = vpack.c.bf16 %v2169_v18, %v2157_v63  ;;  %v9831_v46 = vand.u32 4294901760, %v6979_v39  ;;  %v7053_v55 = vand.u32 4294901760, %v1679_v54  ;;  %v9840_v63 = vld [vmem:[#allocation69_spill] sm:$0xff]  ;;  %v9842_v5 = vld [vmem:[#allocation71_spill] sm:$0xff] }
  0xef   : > { %5081 = vmatpush1.bf16.msra.mxu0 %v6767_v37  ;;  %1580 = vmatprep.mubr.f32.mxu0 %v9725_v33  ;;  %9826 = vst [vmem:[#allocation156_spill] sm:$0xff] %v7025_v4  ;;  %9827 = vst [vmem:[#allocation157_spill] sm:$0xff] %v7028_v16  ;;  %v9829_v37 = vand.u32 4294901760, %v6966_v31  ;;  %v2181_v28 = vand.u32 4294901760, %v2180_v26  ;;  %v2193_v41 = vand.u32 4294901760, %v2192_v15  ;;  %v9836_v26 = vld [vmem:[#allocation68_spill] sm:$0xff] }
  0xf0   : > { %5083 = vmatprep.subr.bf16.mxu0 %v6777_v53  ;;  %9828 = vst [vmem:[#allocation158_spill] sm:$0xff] %v7031_v20  ;;  %v7051_v62 = vsub.f32 %v6979_v39, %v9831_v46  ;;  %9833 = vst [vmem:[#allocation160_spill] sm:$0xff] %v7053_v55  ;;  %v7075_v53 = vsub.f32 %v1679_v54, %v7053_v55  ;;  %v7078_v39 = vsub.f32 %v1678_v59, %v7055_v3  ;;  %v9851_v22 = vld [vmem:[#allocation29_spill] sm:$0xff]  ;;  %v9855_v36 = vld [vmem:[#allocation84_spill] sm:$0xff] }
  0xf1   : > { %v7039_v61 = vsub.f32 %v6966_v31, %v9829_v37  ;;  %9834 = vst [vmem:[#allocation161_spill] sm:$0xff] %v7055_v3  ;;  %v7058_v37 = vpack.c.bf16 %v2175_v34, %v2163_v12  ;;  %v2187_v12 = vand.u32 4294901760, %v2186_v58  ;;  %v1681_v31 = vld [vmem:[%s6424_s8 + $0x48] sm:$0xff]  ;;  %v9841_v58 = vld [vmem:[#allocation81_spill] sm:$0xff]  ;;  %v9845_v46 = vand.u32 4294901760, %v7028_v16 }
  0xf2   : > { %1582 = vmatmul.mubr.f32.gmra.mrb[6].mxu0 %v6538_v52  ;;  %9832 = vst [vmem:[#allocation159_spill] sm:$0xff] %v7051_v62  ;;  %9838 = vst [vmem:[#allocation162_spill] sm:$0xff] %v7075_v53  ;;  %v9847_v59 = vand.u32 4294901760, %v7031_v20  ;;  %v7104_v3 = vpack.c.bf16 %v2193_v41, %v2181_v28  ;;  %v9853_v55 = vand.u32 4294901760, %v9836_v26  ;;  %v9856_v41 = vand.u32 4294901760, %v9840_v63  ;;  %v1682_v52 = vld [vmem:[%s6424_s8 + $0x50] sm:$0xff] }
  0xf3   : > { %5085 = vmatpush1.bf16.msra.mxu0 %v6781_v49  ;;  %1587 = vmatprep.mubr.f32.mxu0 %v9725_v33  ;;  %v9835_v49 = vand.u32 4294901760, %v6758_v7  ;;  %9839 = vst [vmem:[#allocation163_spill] sm:$0xff] %v7078_v39  ;;  %v7090_v54 = vsub.f32 %v7028_v16, %v9845_v46  ;;  %v9852_v46 = vand.u32 4294901760, %v6769_v2 }
  0xf4   : > { %5087 = vmatprep.subr.bf16.mxu0 %v6787_v0  ;;  %v7095_v34 = vsub.f32 %v7031_v20, %v9847_v59  ;;  %v9850_v0 = vand.u32 4294901760, %v6765_v17  ;;  %v2222_v59 = vsub.f32 %v9836_v26, %v9853_v55  ;;  %v7112_v20 = vand.u32 4294901760, %v1681_v31 }
  0xf5   : > { %v2198_v18 = vsub.f32 %v6758_v7, %v9835_v49  ;;  %v9837_v49 = vld [vmem:[#allocation78_spill] sm:$0xff]  ;;  %9846 = vst [vmem:[#allocation164_spill] sm:$0xff] %v7090_v54  ;;  %v2210_v16 = vsub.f32 %v6769_v2, %v9852_v46  ;;  %v2228_v28 = vsub.f32 %v9840_v63, %v9856_v41  ;;  %v7121_v46 = vand.u32 4294901760, %v1680_v8  ;;  %v9858_v2 = vld [vmem:[#allocation88_spill] sm:$0xff] }
  0xf6   : > { %1589 = vmatmul.mubr.f32.gmra.mrb[8].mxu0 %v6545_v57  ;;  %v9844_v7 = vld [vmem:[#allocation74_spill] sm:$0xff]  ;;  %9848 = vst [vmem:[#allocation165_spill] sm:$0xff] %v7095_v34  ;;  %9854 = vst [vmem:[#allocation166_spill] sm:$0xff] %v7112_v20  ;;  %v2223_v57 = vand.u32 4294901760, %v2222_v59 }
  0xf7   : > { %5089 = vmatpush1.bf16.msra.mxu0 %v9837_v49  ;;  %1594 = vmatprep.mubr.f32.mxu0 %v9725_v33  ;;  %v2199_v15 = vand.u32 4294901760, %v2198_v18  ;;  %v2216_v49 = vsub.f32 %v6765_v17, %v9850_v0  ;;  %9857 = vst [vmem:[#allocation167_spill] sm:$0xff] %v7121_v46  ;;  %v9861_v0 = vand.u32 4294901760, %v9843_v29  ;;  %v9862_v17 = vand.u32 4294901760, %v9844_v7  ;;  %v9873_v41 = vld [vmem:[#allocation94_spill] sm:$0xff] }
  0xf8   : > { %5091 = vmatprep.subr.bf16.mxu0 %v9841_v58  ;;  %v9849_v58 = vand.u32 4294901760, %v6760_v10  ;;  %v2229_v59 = vand.u32 4294901760, %v2228_v28  ;;  %v7159_v63 = vsub.f32 %v1680_v8, %v7121_v46  ;;  %v9879_v28 = vld [vmem:[#allocation35_spill] sm:$0xff] }
  0xf9   : > { %v7124_v55 = vpack.c.bf16 %v2199_v15, %v2187_v12  ;;  %v9863_v12 = vld [vmem:[#allocation31_spill] sm:$0xff]  ;;  %v2211_v15 = vand.u32 4294901760, %v2210_v16  ;;  %v9870_v16 = vand.u32 4294901760, %v7078_v39 }
  0xfa   : > { %v2204_v18 = vsub.f32 %v6760_v10, %v9849_v58  ;;  %1596 = vmatmul.mubr.f32.gmra.mrb[10].mxu0 %v9851_v22  ;;  %v2234_v58 = vsub.f32 %v9843_v29, %v9861_v0  ;;  %v2246_v10 = vsub.f32 %v9844_v7, %v9862_v17  ;;  %v9865_v0 = vld [vmem:[#allocation16_spill] sm:$0xff]  ;;  %v9867_v17 = vld [vmem:[#allocation90_spill] sm:$0xff]  ;;  %9872 = vst [vmem:[#allocation172_spill] sm:$0xff] %v7159_v63 }
  0xfb   : > { %5093 = vmatpush1.bf16.msra.mxu0 %v9855_v36  ;;  %1601 = vmatprep.mubr.f32.mxu0 %v9725_v33  ;;  %9859 = vst [vmem:[#allocation168_spill] sm:$0xff] %v7124_v55  ;;  %v9860_v36 = vand.u32 4294901760, %v9842_v5  ;;  %v9866_v29 = vand.u32 4294901760, %v9865_v0  ;;  %v9874_v7 = vld [vmem:[#allocation76_spill] sm:$0xff]  ;;  %v9930_v55 = vld [vmem:[#allocation41_spill] sm:$0xff] }
  0xfc   : > { %5095 = vmatprep.subr.bf16.mxu0 %v9858_v2  ;;  %v2205_v22 = vand.u32 4294901760, %v2204_v18  ;;  %v2217_v2 = vand.u32 4294901760, %v2216_v49  ;;  %v9868_v18 = vand.u32 4294901760, %v7075_v53 }
  0xfd   : > { %v2240_v26 = vsub.f32 %v9842_v5, %v9860_v36  ;;  %v7139_v36 = vsub.f32 %v1681_v31, %v7112_v20  ;;  %v1683_v5 = vld [vmem:[%s6424_s8 + $0x58] sm:$0xff]  ;;  %v470_v40 = vsub.f32 %v9865_v0, %v9866_v29  ;;  %v7156_v31 = vsub.f32 %v7078_v39, %v9870_v16 }
  0xfe   : > { %1603 = vmatmul.mubr.f32.gmra.mrb[12].mxu0 %v9863_v12  ;;  %v7151_v49 = vsub.f32 %v7075_v53, %v9868_v18  ;;  %v2247_v0 = vand.u32 4294901760, %v2246_v10  ;;  %v7163_v34 = vand.u32 4294901760, %v1683_v5  ;;  %v7165_v18 = vand.u32 4294901760, %v1682_v52  ;;  %v9877_v53 = vld [vmem:[#allocation21_spill] sm:$0xff] }
  0xff   : > { %9864 = vst [vmem:[#allocation169_spill] sm:$0xff] %v7139_v36  ;;  %5097 = vmatpush1.bf16.msra.mxu0 %v9867_v17  ;;  %1608 = vmatprep.mubr.f32.mxu0 %v9725_v33  ;;  %9871 = vst [vmem:[#allocation171_spill] sm:$0xff] %v7156_v31  ;;  %v2241_v29 = vand.u32 4294901760, %v2240_v26  ;;  %v2235_v17 = vand.u32 4294901760, %v2234_v58  ;;  %v471_v20 = vand.u32 4294901760, %v470_v40  ;;  %v9878_v54 = vand.u32 4294901760, %v9877_v53 }
 0x100   : > { %9869 = vst [vmem:[#allocation170_spill] sm:$0xff] %v7151_v49  ;;  %5099 = vmatprep.subr.bf16.mxu0 %v9873_v41  ;;  %9875 = vst [vmem:[#allocation173_spill] sm:$0xff] %v7163_v34  ;;  %v7171_v8 = vpack.c.bf16 %v2217_v2, %v2205_v22  ;;  %v7173_v39 = vpack.c.bf16 %v2223_v57, %v2211_v15  ;;  %v9882_v10 = vld [vmem:[#allocation77_spill] sm:$0xff]  ;;  %v9883_v58 = vld [vmem:[#allocation96_spill] sm:$0xff]  ;;  %v7202_v2 = vsub.f32 %v1682_v52, %v7165_v18 }
 0x101   : > { %9876 = vst [vmem:[#allocation174_spill] sm:$0xff] %v7165_v18  ;;  %v481_v16 = vsub.f32 %v9877_v53, %v9878_v54  ;;  %472 = vmatmul.mubr.f32.vlgmr.msra.gmra.mrb[0].mxu1 %v471_v20  ;;  %v9884_v41 = vld [vmem:[#allocation79_spill] sm:$0xff]  ;;  %v9885_v53 = vld [vmem:[#allocation24_spill] sm:$0xff]  ;;  %v7187_v20 = vpack.c.bf16 %v2241_v29, %v2229_v59  ;;  %v7191_v12 = vpack.c.bf16 %v2247_v0, %v2235_v17  ;;  %v9894_v15 = vld [vmem:[#allocation37_spill] sm:$0xff]  ;;  %v9895_v59 = vand.u32 4294901760, %v7139_v36 }
 0x102   : > { %1610 = vmatmul.mubr.f32.gmra.mrb[14].mxu0 %v9879_v28  ;;  %9880 = vst [vmem:[#allocation175_spill] sm:$0xff] %v7171_v8  ;;  %9881 = vst [vmem:[#allocation176_spill] sm:$0xff] %v7173_v39  ;;  %v9886_v28 = vand.u32 4294901760, %v9885_v53  ;;  %v9887_v57 = vld [vmem:[#allocation99_spill] sm:$0xff]  ;;  %v9889_v40 = vld [vmem:[#allocation80_spill] sm:$0xff]  ;;  %477 = vmatprep.mubr.f32.mxu1 %v9725_v33  ;;  %v9896_v0 = vand.u32 4294901760, %v9882_v10 }
 0x103   : > { %5101 = vmatpush1.bf16.msra.mxu0 %v9883_v58  ;;  %1615 = vmatprep.mubr.f32.mxu0 %v9725_v33  ;;  %v482_v54 = vand.u32 4294901760, %v481_v16  ;;  %9888 = vst [vmem:[#allocation177_spill] sm:$0xff] %v7187_v20  ;;  %9890 = vst [vmem:[#allocation178_spill] sm:$0xff] %v7191_v12  ;;  %v9891_v16 = vand.u32 4294901760, %v9874_v7  ;;  %v7208_v29 = vsub.f32 %v7139_v36, %v9895_v59  ;;  %v9900_v58 = vand.u32 4294901760, %v9884_v41  ;;  %v9902_v36 = vld [vmem:[#allocation83_spill] sm:$0xff] }
 0x104   : > { %v492_v22 = vsub.f32 %v9885_v53, %v9886_v28  ;;  %5103 = vmatprep.subr.bf16.mxu0 %v9887_v57  ;;  %v7199_v28 = vsub.f32 %v1683_v5, %v7163_v34  ;;  %9893 = vst [vmem:[#allocation180_spill] sm:$0xff] %v7202_v2  ;;  %v7213_v17 = vsub.f32 %v9882_v10, %v9896_v0  ;;  %v9897_v5 = vld [vmem:[#allocation27_spill] sm:$0xff]  ;;  %v9899_v57 = vand.u32 4294901760, %v7159_v63  ;;  %v9903_v18 = vld [vmem:[#allocation105_spill] sm:$0xff]  ;;  %v9906_v10 = vld [vmem:[#allocation86_spill] sm:$0xff] }
 0x105   : > { %v7196_v46 = vsub.f32 %v9874_v7, %v9891_v16  ;;  %483 = vmatmul.mubr.f32.gmra.mrb[2].mxu1 %v482_v54  ;;  %v9898_v26 = vand.u32 4294901760, %v9897_v5  ;;  %v2258_v0 = vsub.f32 %v9884_v41, %v9900_v58  ;;  %v9901_v54 = vld [vmem:[#allocation82_spill] sm:$0xff]  ;;  %v9907_v7 = vld [vmem:[#allocation93_spill] sm:$0xff]  ;;  %v9911_v31 = vld [vmem:[#allocation100_spill] sm:$0xff]  ;;  %v9924_v43 = vand.u32 4294901760, %v9906_v10 }
 0x106   : > { %9892 = vst [vmem:[#allocation179_spill] sm:$0xff] %v7199_v28  ;;  %1617 = vmatmul.mubr.f32.gmra.mrb[16].mxu0 %v9894_v15  ;;  %v493_v16 = vand.u32 4294901760, %v492_v22  ;;  %v7223_v59 = vsub.f32 %v7159_v63, %v9899_v57  ;;  %v1685_v63 = vld [vmem:[%s6424_s8 + $0x68] sm:$0xff]  ;;  %488 = vmatprep.mubr.f32.mxu1 %v9725_v33  ;;  %v9908_v15 = vld [vmem:[#allocation95_spill] sm:$0xff]  ;;  %v9909_v41 = vld [vmem:[#allocation97_spill] sm:$0xff]  ;;  %v2265_v62 = vand.u32 4294901760, %v7213_v17 }
 0x107   : > { %v503_v52 = vsub.f32 %v9897_v5, %v9898_v26  ;;  %5105 = vmatpush1.bf16.msra.mxu0 %v6847_v21  ;;  %1622 = vmatprep.mubr.f32.mxu0 %v9725_v33  ;;  %v9904_v26 = vand.u32 4294901760, %v9889_v40  ;;  %v9905_v5 = vld [vmem:[#allocation85_spill] sm:$0xff]  ;;  %v9914_v49 = vld [vmem:[#allocation28_spill] sm:$0xff]  ;;  %v2253_v53 = vand.u32 4294901760, %v7196_v46  ;;  %v2259_v22 = vand.u32 4294901760, %v2258_v0  ;;  %v9932_v58 = vld [vmem:[#allocation30_spill] sm:$0xff] }
 0x108   : > { %5107 = vmatprep.subr.bf16.mxu0 %v9903_v18  ;;  %v9910_v18 = vld [vmem:[#allocation98_spill] sm:$0xff]  ;;  %v9912_v20 = vld [vmem:[#allocation101_spill] sm:$0xff]  ;;  %v9915_v39 = vand.u32 4294901760, %v9914_v49  ;;  %v9935_v44 = vand.u32 4294901760, %v7202_v2 }
 0x109   : > { %v2270_v21 = vsub.f32 %v9889_v40, %v9904_v26  ;;  %v9913_v40 = vld [vmem:[#allocation39_spill] sm:$0xff]  ;;  %v1684_v34 = vld [vmem:[%s6424_s8 + $0x60] sm:$0xff]  ;;  %494 = vmatmul.mubr.f32.gmra.mrb[4].mxu1 %v493_v16  ;;  %v504_v57 = vand.u32 4294901760, %v503_v52  ;;  %v9918_v26 = vand.u32 4294901760, %v9901_v54  ;;  %v9919_v16 = vand.u32 4294901760, %v9902_v36  ;;  %v9934_v0 = vld [vmem:[#allocation114_spill] sm:$0xff] }
 0x10a   : > { %1624 = vmatmul.mubr.f32.gmra.mrb[18].mxu0 %v9913_v40  ;;  %v514_v8 = vsub.f32 %v9914_v49, %v9915_v39  ;;  %v7263_v40 = vand.u32 4294901760, %v1685_v63  ;;  %v9922_v49 = vld [vmem:[#allocation111_spill] sm:$0xff]  ;;  %499 = vmatprep.mubr.f32.mxu1 %v9725_v33  ;;  %v7279_v39 = vand.u32 4294901760, %v1684_v34 }
 0x10b   : > { %5109 = vmatpush1.bf16.msra.mxu0 %v6860_v9  ;;  %1629 = vmatprep.mubr.f32.mxu0 %v9725_v33  ;;  %v2276_v12 = vsub.f32 %v9901_v54, %v9918_v26  ;;  %v2288_v52 = vsub.f32 %v9902_v36, %v9919_v16  ;;  %v9923_v9 = vand.u32 4294901760, %v9905_v5  ;;  %v2294_v26 = vsub.f32 %v9906_v10, %v9924_v43  ;;  %v9925_v16 = vld [vmem:[#allocation112_spill] sm:$0xff] }
 0x10c   : > { %9920 = vst [vmem:[#allocation181_spill] sm:$0xff] %v7263_v40  ;;  %5111 = vmatprep.subr.bf16.mxu0 %v9922_v49  ;;  %9927 = vst [vmem:[#allocation182_spill] sm:$0xff] %v7279_v39  ;;  %v515_v10 = vand.u32 4294901760, %v514_v8  ;;  %v9933_v54 = vand.u32 4294901760, %v9932_v58  ;;  %v9945_v49 = vld [vmem:[#allocation34_spill] sm:$0xff] }
 0x10d   : > { %v2282_v50 = vsub.f32 %v9905_v5, %v9923_v9  ;;  %v2271_v9 = vand.u32 4294901760, %v2270_v21  ;;  %v9931_v5 = vand.u32 4294901760, %v7199_v28  ;;  %505 = vmatmul.mubr.f32.gmra.mrb[6].mxu1 %v504_v57  ;;  %v2277_v21 = vand.u32 4294901760, %v2276_v12  ;;  %v9938_v57 = vld [vmem:[#allocation117_spill] sm:$0xff] }
 0x10e   : > { %1631 = vmatmul.mubr.f32.gmra.mrb[20].mxu0 %v9930_v55  ;;  %v525_v17 = vsub.f32 %v9932_v58, %v9933_v54  ;;  %v7297_v55 = vsub.f32 %v7202_v2, %v9935_v44  ;;  %v2289_v46 = vand.u32 4294901760, %v2288_v52  ;;  %v2295_v54 = vand.u32 4294901760, %v2294_v26  ;;  %510 = vmatprep.mubr.f32.mxu1 %v9725_v33  ;;  %v9960_v26 = vld [vmem:[#allocation45_spill] sm:$0xff]  ;;  %v9961_v58 = vld [vmem:[#allocation36_spill] sm:$0xff] }
 0x10f   : > { %v7287_v43 = vsub.f32 %v7199_v28, %v9931_v5  ;;  %5113 = vmatpush1.bf16.msra.mxu0 %v9934_v0  ;;  %1636 = vmatprep.mubr.f32.mxu0 %v9725_v33  ;;  %v7300_v5 = vsub.f32 %v1685_v63, %v7263_v40  ;;  %v2283_v28 = vand.u32 4294901760, %v2282_v50  ;;  %v7308_v44 = vpack.c.bf16 %v2265_v62, %v2253_v53  ;;  %v9947_v62 = vld [vmem:[#allocation120_spill] sm:$0xff]  ;;  %v9963_v52 = vld [vmem:[#allocation13_spill] sm:$0xff]  ;;  %v9974_v0 = vld [vmem:[#allocation47_spill] sm:$0xff] }
 0x110   : > { %9936 = vst [vmem:[#allocation183_spill] sm:$0xff] %v7297_v55  ;;  %5115 = vmatprep.subr.bf16.mxu0 %v9938_v57  ;;  %v7311_v12 = vsub.f32 %v1684_v34, %v7279_v39  ;;  %v9944_v57 = vld [vmem:[#allocation43_spill] sm:$0xff]  ;;  %v7316_v50 = vpack.c.bf16 %v2271_v9, %v2259_v22  ;;  %v526_v8 = vand.u32 4294901760, %v525_v17  ;;  %v9946_v40 = vand.u32 4294901760, %v9945_v49  ;;  %v9951_v17 = vld [vmem:[#allocation89_spill] sm:$0xff] }
 0x111   : > { %9937 = vst [vmem:[#allocation184_spill] sm:$0xff] %v7300_v5  ;;  %516 = vmatmul.mubr.f32.gmra.mrb[8].mxu1 %v515_v10  ;;  %v7325_v2 = vpack.c.bf16 %v2289_v46, %v2277_v21  ;;  %v9948_v22 = vld [vmem:[#allocation87_spill] sm:$0xff]  ;;  %v7330_v10 = vpack.c.bf16 %v2295_v54, %v2283_v28  ;;  %v9958_v54 = vld [vmem:[#allocation12_spill] sm:$0xff]  ;;  %v9962_v34 = vand.u32 4294901760, %v9961_v58  ;;  %v9966_v21 = vand.u32 4294901760, %v9965_v13 }
 0x112   : > { %9941 = vst [vmem:[#allocation185_spill] sm:$0xff] %v7311_v12  ;;  %1638 = vmatmul.mubr.f32.gmra.mrb[22].mxu0 %v9944_v57  ;;  %v536_v53 = vsub.f32 %v9945_v49, %v9946_v40  ;;  %v9949_v39 = vld [vmem:[#allocation123_spill] sm:$0xff]  ;;  %v1687_v49 = vld [vmem:[%s6424_s8 + $0x78] sm:$0xff]  ;;  %521 = vmatprep.mubr.f32.mxu1 %v9725_v33  ;;  %v9975_v55 = vand.u32 4294901760, %v9951_v17 }
 0x113   : > { %5117 = vmatpush1.bf16.msra.mxu0 %v9947_v62  ;;  %1643 = vmatprep.mubr.f32.mxu0 %v9725_v33  ;;  %9950 = vst [vmem:[#allocation186_spill] sm:$0xff] %v7330_v10  ;;  %v9952_v57 = vld [vmem:[#allocation91_spill] sm:$0xff]  ;;  %v547_v46 = vsub.f32 %v9961_v58, %v9962_v34  ;;  %v9964_v62 = vand.u32 4294901760, %v9963_v52 }
 0x114   : > { %5119 = vmatprep.subr.bf16.mxu0 %v9949_v39  ;;  %v9956_v9 = vld [vmem:[#allocation11_spill] sm:$0xff]  ;;  %v9959_v39 = vand.u32 4294901760, %v9958_v54  ;;  %v537_v10 = vand.u32 4294901760, %v536_v53  ;;  %v7364_v53 = vand.u32 4294901760, %v1687_v49 }
 0x115   : > { %v9957_v63 = vand.u32 4294901760, %v9956_v9  ;;  %527 = vmatmul.mubr.f32.gmra.mrb[10].mxu1 %v526_v8  ;;  %v652_v36 = vsub.f32 %v9963_v52, %v9964_v62  ;;  %v9970_v62 = vld [vmem:[#allocation92_spill] sm:$0xff]  ;;  %v1686_v52 = vld [vmem:[%s6424_s8 + $0x70] sm:$0xff] }
 0x116   : > { %v658_v40 = vsub.f32 %v9958_v54, %v9959_v39  ;;  %1645 = vmatmul.mubr.f32.gmra.mrb[24].mxu0 %v9960_v26  ;;  %v9968_v39 = vand.u32 4294901760, %v9948_v22  ;;  %9969 = vst [vmem:[#allocation187_spill] sm:$0xff] %v7364_v53  ;;  %532 = vmatprep.mubr.f32.mxu1 %v9725_v33  ;;  %v9971_v54 = vand.u32 4294901760, %v7300_v5 }
 0x117   : > { %v646_v28 = vsub.f32 %v9956_v9, %v9957_v63  ;;  %v664_v63 = vsub.f32 %v9965_v13, %v9966_v21  ;;  %v9967_v9 = vld [vmem:[#allocation126_spill] sm:$0xff]  ;;  %1650 = vmatprep.mubr.f32.mxu0 %v9725_v33 }
 0x118   : > { %5121 = vmatpush1.bf16.msra.mxu0 %v9967_v9  ;;  %v7362_v8 = vsub.f32 %v9948_v22, %v9968_v39  ;;  %v659_v58 = vand.u32 4294901760, %v658_v40  ;;  %v653_v9 = vand.u32 4294901760, %v652_v36  ;;  %v7375_v39 = vsub.f32 %v7300_v5, %v9971_v54  ;;  %v9976_v21 = vld [vmem:[#allocation38_spill] sm:$0xff] }
 0x119   : > { %v647_v34 = vand.u32 4294901760, %v646_v28  ;;  %5123 = vmatprep.subr.bf16.mxu0 %v6913_v48  ;;  %v665_v13 = vand.u32 4294901760, %v664_v63  ;;  %v9972_v48 = vld [vmem:[#allocation19_spill] sm:$0xff]  ;;  %v2312_v36 = vsub.f32 %v9951_v17, %v9975_v55  ;;  %538 = vmatmul.mubr.f32.gmra.mrb[12].mxu1 %v537_v10  ;;  %v548_v63 = vand.u32 4294901760, %v547_v46 }
 0x11a   : > { %v9973_v22 = vand.u32 4294901760, %v9972_v48  ;;  %1652 = vmatmul.mubr.f32.gmra.mrb[26].mxu0 %v9974_v0  ;;  %v9977_v54 = vand.u32 4294901760, %v9976_v21  ;;  %v9979_v40 = vand.u32 4294901760, %v9978_v24  ;;  %v9981_v55 = vand.u32 4294901760, %v9952_v57  ;;  %543 = vmatprep.mubr.f32.mxu1 %v9725_v33 }
 0x11b   : > { %v5030_v28 = vpack.c.bf16 %v659_v58, %v647_v34  ;;  %1657 = vmatprep.mubr.f32.mxu0 %v9725_v33  ;;  %v7405_v46 = vsub.f32 %v1687_v49, %v7364_v53 }
 0x11c   : > { %v670_v26 = vsub.f32 %v9972_v48, %v9973_v22  ;;  %v558_v5 = vsub.f32 %v9976_v21, %v9977_v54  ;;  %v682_v58 = vsub.f32 %v9978_v24, %v9979_v40  ;;  %5125 = vmatpush1.bf16.msra.mxu0 %v6920_v1  ;;  %v9980_v22 = vand.u32 4294901760, %v7311_v12  ;;  %v9988_v24 = vld [vmem:[#allocation49_spill] sm:$0xff] }
 0x11d   : > { %v7402_v10 = vsub.f32 %v9952_v57, %v9981_v55  ;;  %9982 = vst [vmem:[#allocation19_spill] sm:$0xff] %v7405_v46  ;;  %v7407_v54 = vand.u32 4294901760, %v1686_v52  ;;  %5127 = vmatprep.subr.bf16.mxu0 %v6927_v19  ;;  %v2301_v40 = vand.u32 4294901760, %v7362_v8  ;;  %v5032_v1 = vpack.c.bf16 %v665_v13, %v653_v9  ;;  %v1689_v57 = vld [vmem:[%s6424_s8 + $0x88] sm:$0xff]  ;;  %5031 = vmatprep.subr.bf16.mxu1 %v5030_v28  ;;  %v9986_v19 = vld [vmem:[#allocation23_spill] sm:$0xff] }
 0x11e   : > { %v7397_v34 = vsub.f32 %v7311_v12, %v9980_v22  ;;  %v9984_v12 = vld [vmem:[#allocation22_spill] sm:$0xff]  ;;  %v671_v53 = vand.u32 4294901760, %v670_v26  ;;  %v683_v17 = vand.u32 4294901760, %v682_v58  ;;  %v9987_v0 = vand.u32 4294901760, %v9986_v19  ;;  %1659 = vmatmul.mubr.f32.gmra.mrb[28].mxu0 %v9988_v24  ;;  %549 = vmatmul.mubr.f32.gmra.mrb[14].mxu1 %v548_v63  ;;  %v9990_v22 = vld [vmem:[#allocation40_spill] sm:$0xff] }
 0x11f   : > { %9983 = vst [vmem:[#allocation188_spill] sm:$0xff] %v7407_v54  ;;  %v9985_v21 = vand.u32 4294901760, %v9984_v12  ;;  %v9989_v9 = vand.u32 4294901760, %v9970_v62  ;;  %v559_v28 = vand.u32 4294901760, %v558_v5  ;;  %v9991_v49 = vand.u32 4294901760, %v9990_v22  ;;  %1664 = vmatprep.mubr.f32.mxu0 %v9725_v33  ;;  %554 = vmatprep.mubr.f32.mxu1 %v9725_v33  ;;  %v1691_v24 = vld [vmem:[%s6424_s8 + $0x98] sm:$0xff] }
 0x120   : > { %v688_v8 = vsub.f32 %v9986_v19, %v9987_v0  ;;  %5129 = vmatpush1.bf16.msra.mxu0 %v6950_v30  ;;  %v2313_v0 = vand.u32 4294901760, %v2312_v36  ;;  %v7436_v58 = vsub.f32 %v1686_v52, %v7407_v54  ;;  %v2307_v5 = vand.u32 4294901760, %v7402_v10  ;;  %5033 = vmatpush1.bf16.msra.mxu1 %v5032_v1  ;;  %v9995_v54 = vld [vmem:[#allocation42_spill] sm:$0xff] }
 0x121   : > { %v676_v55 = vsub.f32 %v9984_v12, %v9985_v21  ;;  %v7428_v21 = vsub.f32 %v9970_v62, %v9989_v9  ;;  %v569_v26 = vsub.f32 %v9990_v22, %v9991_v49  ;;  %5131 = vmatprep.subr.bf16.mxu0 %v6957_v47  ;;  %v7443_v9 = vand.u32 4294901760, %v1689_v57  ;;  %v1688_v49 = vld [vmem:[%s6424_s8 + $0x80] sm:$0xff]  ;;  %v9994_v47 = vld [vmem:[#allocation51_spill] sm:$0xff] }
 0x122   : > { %9992 = vst [vmem:[#allocation22_spill] sm:$0xff] %v7436_v58  ;;  %v5034_v52 = vpack.c.bf16 %v683_v17, %v671_v53  ;;  %v689_v30 = vand.u32 4294901760, %v688_v8  ;;  %1666 = vmatmul.mubr.f32.gmra.mrb[30].mxu0 %v9994_v47  ;;  %v9489_v63 = vand.u32 4294901760, %v9909_v41  ;;  %560 = vmatmul.mubr.f32.gmra.mrb[16].mxu1 %v559_v28  ;;  %v9996_v62 = vand.u32 4294901760, %v9995_v54 }
 0x123   : > { %9993 = vst [vmem:[#allocation23_spill] sm:$0xff] %v7443_v9  ;;  %v677_v13 = vand.u32 4294901760, %v676_v55  ;;  %v570_v22 = vand.u32 4294901760, %v569_v26  ;;  %v9997_v1 = vand.u32 4294901760, %v7001_v6  ;;  %v9998_v53 = vand.u32 4294901760, %v9907_v7  ;;  %565 = vmatprep.mubr.f32.mxu1 %v9725_v33 }
 0x124   : > { %v580_v36 = vsub.f32 %v9995_v54, %v9996_v62  ;;  %5133 = vmatpush1.bf16.msra.mxu0 %v6991_v23  ;;  %v9999_v8 = vand.u32 4294901760, %v9908_v15  ;;  %v7467_v26 = vand.u32 4294901760, %v1688_v49  ;;  %v7471_v62 = vpack.c.bf16 %v2313_v0, %v2301_v40  ;;  %v1690_v40 = vld [vmem:[%s6424_s8 + $0x90] sm:$0xff]  ;;  %5035 = vmatprep.subr.bf16.mxu1 %v5034_v52  ;;  %v10005_v23 = vld [vmem:[#allocation44_spill] sm:$0xff] }
 0x125   : > { %1901 = vmatprep.mubr.f32.mxu0 %v9997_v1  ;;  %v2324_v55 = vsub.f32 %v9907_v7, %v9998_v53  ;;  %5135 = vmatprep.subr.bf16.mxu0 %v7046_v14  ;;  %v2319_v6 = vand.u32 4294901760, %v7428_v21  ;;  %v10001_v1 = vand.u32 4294901760, %v7405_v46  ;;  %v5036_v0 = vpack.c.bf16 %v689_v30, %v677_v13 }
 0x126   : > { %v2336_v28 = vsub.f32 %v9908_v15, %v9999_v8  ;;  %10000 = vst [vmem:[#allocation51_spill] sm:$0xff] %v7467_v26  ;;  %v7482_v8 = vsub.f32 %v1689_v57, %v7443_v9  ;;  %v10003_v21 = vand.u32 4294901760, %v7006_v60  ;;  %v7494_v53 = vand.u32 4294901760, %v1691_v24  ;;  %571 = vmatmul.mubr.f32.gmra.mrb[18].mxu1 %v570_v22  ;;  %v10045_v9 = vld [vmem:[#allocation171_spill] sm:$0xff] }
 0x127   : > { %v7477_v10 = vsub.f32 %v7405_v46, %v10001_v1  ;;  %v7492_v1 = vsub.f32 %v9909_v41, %v9489_v63  ;;  %v581_v57 = vand.u32 4294901760, %v580_v36  ;;  %v10006_v46 = vand.u32 4294901760, %v10005_v23  ;;  %v10011_v36 = vld [vmem:[#allocation103_spill] sm:$0xff]  ;;  %576 = vmatprep.mubr.f32.mxu1 %v9725_v33  ;;  %5037 = vmatpush1.bf16.msra.mxu1 %v5036_v0 }
 0x128   : > { %10002 = vst [vmem:[#allocation189_spill] sm:$0xff] %v7482_v8  ;;  %1907 = vmatmul.mubr.f32.vlgmr.msra.gmra.mrb[0].mxu0 %v10003_v21  ;;  %10004 = vst [vmem:[#allocation190_spill] sm:$0xff] %v7494_v53  ;;  %v10007_v30 = vand.u32 4294901760, %v7039_v61  ;;  %v10008_v60 = vand.u32 4294901760, %v7436_v58  ;;  %v2325_v52 = vand.u32 4294901760, %v2324_v55  ;;  %v2337_v21 = vand.u32 4294901760, %v2336_v28 }
 0x129   : > { %v591_v17 = vsub.f32 %v10005_v23, %v10006_v46  ;;  %5137 = vmatpush1.bf16.msra.mxu0 %v7058_v37  ;;  %v7508_v22 = vsub.f32 %v1688_v49, %v7467_v26  ;;  %v10010_v46 = vand.u32 4294901760, %v9910_v18  ;;  %v7516_v14 = vand.u32 4294901760, %v1690_v40  ;;  %v10016_v61 = vld [vmem:[#allocation159_spill] sm:$0xff]  ;;  %v10019_v28 = vld [vmem:[#allocation46_spill] sm:$0xff]  ;;  %v10021_v26 = vld [vmem:[#allocation168_spill] sm:$0xff] }
 0x12a   : > { %1917 = vmatprep.mubr.f32.mxu0 %v10007_v30  ;;  %v7505_v13 = vsub.f32 %v7436_v58, %v10008_v60  ;;  %5139 = vmatprep.subr.bf16.mxu0 %v7104_v3  ;;  %v10012_v30 = vld [vmem:[#allocation104_spill] sm:$0xff]  ;;  %v7519_v55 = vpack.c.bf16 %v2319_v6, %v2307_v5  ;;  %v10014_v49 = vand.u32 4294901760, %v9911_v31  ;;  %v10015_v60 = vand.u32 4294901760, %v9912_v20  ;;  %v1693_v5 = vld [vmem:[%s6424_s8 + $0xa8] sm:$0xff] }
 0x12b   : > { %10009 = vst [vmem:[#allocation191_spill] sm:$0xff] %v7508_v22  ;;  %v2342_v37 = vsub.f32 %v9910_v18, %v10010_v46  ;;  %10013 = vst [vmem:[#allocation192_spill] sm:$0xff] %v7516_v14  ;;  %v10017_v58 = vand.u32 4294901760, %v10016_v61  ;;  %v7532_v23 = vsub.f32 %v1691_v24, %v7494_v53  ;;  %582 = vmatmul.mubr.f32.gmra.mrb[20].mxu1 %v581_v57  ;;  %v592_v6 = vand.u32 4294901760, %v591_v17  ;;  %v10024_v53 = vld [vmem:[#allocation175_spill] sm:$0xff] }
 0x12c   : > { %v2348_v3 = vsub.f32 %v9911_v31, %v10014_v49  ;;  %v2360_v46 = vsub.f32 %v9912_v20, %v10015_v60  ;;  %v10020_v54 = vand.u32 4294901760, %v10019_v28  ;;  %v10022_v60 = vld [vmem:[#allocation164_spill] sm:$0xff]  ;;  %v7542_v61 = vpack.c.bf16 %v2337_v21, %v2325_v52  ;;  %v1692_v52 = vld [vmem:[%s6424_s8 + $0xa0] sm:$0xff]  ;;  %587 = vmatprep.mubr.f32.mxu1 %v9725_v33 }
 0x12d   : > { %1923 = vmatmul.mubr.f32.gmra.mrb[2].mxu0 %v10017_v58  ;;  %10018 = vst [vmem:[#allocation159_spill] sm:$0xff] %v7532_v23  ;;  %v10023_v0 = vand.u32 4294901760, %v10022_v60  ;;  %v2331_v24 = vand.u32 4294901760, %v7492_v1  ;;  %v2343_v17 = vand.u32 4294901760, %v2342_v37  ;;  %v10025_v57 = vand.u32 4294901760, %v10011_v36  ;;  %v10035_v20 = vld [vmem:[#allocation176_spill] sm:$0xff] }
 0x12e   : > { %v602_v49 = vsub.f32 %v10019_v28, %v10020_v54  ;;  %5141 = vmatpush1.bf16.msra.mxu0 %v10021_v26  ;;  %v10026_v26 = vand.u32 4294901760, %v10012_v30  ;;  %v10028_v1 = vand.u32 4294901760, %v7482_v8  ;;  %v2361_v37 = vand.u32 4294901760, %v2360_v46  ;;  %v10032_v28 = vld [vmem:[#allocation106_spill] sm:$0xff] }
 0x12f   : > { %1933 = vmatprep.mubr.f32.mxu0 %v10023_v0  ;;  %5143 = vmatprep.subr.bf16.mxu0 %v10024_v53  ;;  %v2354_v54 = vsub.f32 %v10011_v36, %v10025_v57  ;;  %v7554_v0 = vsub.f32 %v1690_v40, %v7516_v14  ;;  %v2349_v53 = vand.u32 4294901760, %v2348_v3  ;;  %v7563_v58 = vand.u32 4294901760, %v1693_v5  ;;  %v10030_v57 = vld [vmem:[#allocation165_spill] sm:$0xff]  ;;  %v10033_v36 = vld [vmem:[#allocation48_spill] sm:$0xff] }
 0x130   : > { %v2366_v60 = vsub.f32 %v10012_v30, %v10026_v26  ;;  %v7561_v21 = vsub.f32 %v7482_v8, %v10028_v1  ;;  %v10031_v63 = vand.u32 4294901760, %v10030_v57  ;;  %593 = vmatmul.mubr.f32.gmra.mrb[22].mxu1 %v592_v6  ;;  %v603_v14 = vand.u32 4294901760, %v602_v49  ;;  %v10036_v1 = vld [vmem:[#allocation170_spill] sm:$0xff]  ;;  %v10040_v8 = vld [vmem:[#allocation109_spill] sm:$0xff] }
 0x131   : > { %10027 = vst [vmem:[#allocation168_spill] sm:$0xff] %v7554_v0  ;;  %10029 = vst [vmem:[#allocation164_spill] sm:$0xff] %v7563_v58  ;;  %v10034_v30 = vand.u32 4294901760, %v10033_v36  ;;  %v10037_v3 = vand.u32 4294901760, %v10036_v1  ;;  %v10038_v46 = vand.u32 4294901760, %v7508_v22  ;;  %v7582_v49 = vand.u32 4294901760, %v1692_v52  ;;  %598 = vmatprep.mubr.f32.mxu1 %v9725_v33 }
 0x132   : > { %1939 = vmatmul.mubr.f32.gmra.mrb[4].mxu0 %v10031_v63  ;;  %v10039_v63 = vld [vmem:[#allocation107_spill] sm:$0xff]  ;;  %v10042_v40 = vld [vmem:[#allocation177_spill] sm:$0xff]  ;;  %v7594_v6 = vsub.f32 %v1693_v5, %v7563_v58  ;;  %v10046_v41 = vand.u32 4294901760, %v10045_v9  ;;  %v10051_v1 = vld [vmem:[#allocation178_spill] sm:$0xff] }
 0x133   : > { %v613_v31 = vsub.f32 %v10033_v36, %v10034_v30  ;;  %5145 = vmatpush1.bf16.msra.mxu0 %v10035_v20  ;;  %1949 = vmatprep.mubr.f32.mxu0 %v10037_v3  ;;  %v7578_v57 = vsub.f32 %v7508_v22, %v10038_v46  ;;  %10041 = vst [vmem:[#allocation175_spill] sm:$0xff] %v7582_v49  ;;  %v2355_v30 = vand.u32 4294901760, %v2354_v54  ;;  %v2367_v20 = vand.u32 4294901760, %v2366_v60  ;;  %v10043_v3 = vld [vmem:[#allocation110_spill] sm:$0xff]  ;;  %v1694_v36 = vld [vmem:[%s6424_s8 + $0xb0] sm:$0xff]  ;;  %v10062_v9 = vld [vmem:[#allocation52_spill] sm:$0xff] }
 0x134   : > { %5147 = vmatprep.subr.bf16.mxu0 %v10042_v40  ;;  %v7588_v46 = vpack.c.bf16 %v2343_v17, %v2331_v24  ;;  %v7591_v22 = vpack.c.bf16 %v2361_v37, %v2349_v53  ;;  %10044 = vst [vmem:[#allocation165_spill] sm:$0xff] %v7594_v6  ;;  %v10047_v54 = vand.u32 4294901760, %v7532_v23  ;;  %v10048_v40 = vand.u32 4294901760, %v10032_v28  ;;  %v1695_v17 = vld [vmem:[%s6424_s8 + $0xb8] sm:$0xff]  ;;  %604 = vmatmul.mubr.f32.gmra.mrb[24].mxu1 %v603_v14  ;;  %v10049_v37 = vld [vmem:[#allocation50_spill] sm:$0xff] }
 0x135   : > { %v614_v53 = vand.u32 4294901760, %v613_v31  ;;  %v10050_v26 = vand.u32 4294901760, %v10049_v37  ;;  %v7622_v31 = vsub.f32 %v1692_v52, %v7582_v49  ;;  %609 = vmatprep.mubr.f32.mxu1 %v9725_v33  ;;  %v10063_v49 = vand.u32 4294901760, %v10062_v9 }
 0x136   : > { %1955 = vmatmul.mubr.f32.gmra.mrb[6].mxu0 %v10046_v41  ;;  %v7601_v60 = vsub.f32 %v7532_v23, %v10047_v54  ;;  %v2372_v24 = vsub.f32 %v10032_v28, %v10048_v40  ;;  %v10052_v41 = vand.u32 4294901760, %v7208_v29  ;;  %v10053_v54 = vand.u32 4294901760, %v10039_v63  ;;  %v10081_v28 = vld [vmem:[#allocation121_spill] sm:$0xff] }
 0x137   : > { %v624_v5 = vsub.f32 %v10049_v37, %v10050_v26  ;;  %5149 = vmatpush1.bf16.msra.mxu0 %v10051_v1  ;;  %v10054_v40 = vand.u32 4294901760, %v10040_v8  ;;  %10055 = vst [vmem:[#allocation176_spill] sm:$0xff] %v7622_v31  ;;  %v7625_v26 = vpack.c.bf16 %v2367_v20, %v2355_v30  ;;  %v10056_v29 = vand.u32 4294901760, %v7554_v0 }
 0x138   : > { %1965 = vmatprep.mubr.f32.mxu0 %v10052_v41  ;;  %v2384_v23 = vsub.f32 %v10039_v63, %v10053_v54  ;;  %5151 = vmatprep.subr.bf16.mxu0 %v7308_v44  ;;  %v10057_v41 = vand.u32 4294901760, %v10043_v3  ;;  %v7639_v30 = vand.u32 4294901760, %v1695_v17  ;;  %v7641_v20 = vand.u32 4294901760, %v1694_v36 }
 0x139   : > { %v2378_v14 = vsub.f32 %v10040_v8, %v10054_v40  ;;  %v7630_v1 = vsub.f32 %v7554_v0, %v10056_v29  ;;  %v10058_v40 = vld [vmem:[#allocation113_spill] sm:$0xff]  ;;  %v10061_v29 = vand.u32 4294901760, %v7223_v59  ;;  %v2373_v37 = vand.u32 4294901760, %v2372_v24  ;;  %615 = vmatmul.mubr.f32.gmra.mrb[26].mxu1 %v614_v53  ;;  %v1697_v0 = vld [vmem:[%s6424_s8 + $0xc8] sm:$0xff] }
 0x13a   : > { %v2390_v54 = vsub.f32 %v10043_v3, %v10057_v41  ;;  %10059 = vst [vmem:[#allocation170_spill] sm:$0xff] %v7639_v30  ;;  %10060 = vst [vmem:[#allocation177_spill] sm:$0xff] %v7641_v20  ;;  %v625_v41 = vand.u32 4294901760, %v624_v5  ;;  %v635_v52 = vsub.f32 %v10062_v9, %v10063_v49  ;;  %v10064_v44 = vand.u32 4294901760, %v7287_v43  ;;  %v1696_v43 = vld [vmem:[%s6424_s8 + $0xc0] sm:$0xff]  ;;  %620 = vmatprep.mubr.f32.mxu1 %v9725_v33  ;;  %v10074_v3 = vld [vmem:[#allocation118_spill] sm:$0xff] }
 0x13b   : > { %1971 = vmatmul.mubr.f32.gmra.mrb[8].mxu0 %v10061_v29  ;;  %v2385_v58 = vand.u32 4294901760, %v2384_v23  ;;  %v2379_v8 = vand.u32 4294901760, %v2378_v14  ;;  %v10065_v29 = vld [vmem:[#allocation115_spill] sm:$0xff]  ;;  %v10066_v5 = vand.u32 4294901760, %v9925_v16  ;;  %v10068_v23 = vand.u32 4294901760, %v7594_v6 }
 0x13c   : > { %5153 = vmatpush1.bf16.msra.mxu0 %v7316_v50  ;;  %1981 = vmatprep.mubr.f32.mxu0 %v10064_v44  ;;  %v2391_v53 = vand.u32 4294901760, %v2390_v54  ;;  %v10067_v50 = vld [vmem:[#allocation116_spill] sm:$0xff]  ;;  %v10069_v44 = vand.u32 4294901760, %v10058_v40  ;;  %v7672_v54 = vsub.f32 %v1695_v17, %v7639_v30  ;;  %v7675_v24 = vsub.f32 %v1694_v36, %v7641_v20 }
 0x13d   : > { %5155 = vmatprep.subr.bf16.mxu0 %v7325_v2  ;;  %v2396_v49 = vsub.f32 %v9925_v16, %v10066_v5  ;;  %v7666_v14 = vsub.f32 %v7594_v6, %v10068_v23  ;;  %v10072_v5 = vld [vmem:[#allocation183_spill] sm:$0xff]  ;;  %v7681_v63 = vand.u32 4294901760, %v1697_v0  ;;  %626 = vmatmul.mubr.f32.gmra.mrb[28].mxu1 %v625_v41  ;;  %v636_v23 = vand.u32 4294901760, %v635_v52  ;;  %v10077_v6 = vld [vmem:[#allocation186_spill] sm:$0xff] }
 0x13e   : > { %v2408_v2 = vsub.f32 %v10058_v40, %v10069_v44  ;;  %10070 = vst [vmem:[#allocation171_spill] sm:$0xff] %v7672_v54  ;;  %10071 = vst [vmem:[#allocation178_spill] sm:$0xff] %v7675_v24  ;;  %v10073_v9 = vand.u32 4294901760, %v10072_v5  ;;  %v10075_v16 = vld [vmem:[#allocation119_spill] sm:$0xff]  ;;  %v10078_v44 = vand.u32 4294901760, %v7375_v39  ;;  %v10079_v36 = vand.u32 4294901760, %v7622_v31  ;;  %631 = vmatprep.mubr.f32.mxu1 %v9725_v33 }
 0x13f   : > { %10076 = vst [vmem:[#allocation116_spill] sm:$0xff] %v7681_v63  ;;  %v7695_v20 = vand.u32 4294901760, %v1696_v43  ;;  %v7700_v39 = vpack.c.bf16 %v2391_v53, %v2379_v8  ;;  %v2397_v52 = vand.u32 4294901760, %v2396_v49  ;;  %v10083_v41 = vld [vmem:[#allocation122_spill] sm:$0xff]  ;;  %v9542_v59 = vand.u32 4294901760, %v7672_v54 }
 0x140   : > { %1987 = vmatmul.mubr.f32.gmra.mrb[10].mxu0 %v10073_v9  ;;  %v7689_v17 = vsub.f32 %v7622_v31, %v10079_v36  ;;  %v10080_v9 = vand.u32 4294901760, %v10065_v29  ;;  %v2409_v36 = vand.u32 4294901760, %v2408_v2  ;;  %v10084_v31 = vand.u32 4294901760, %v10067_v50 }
 0x141   : > { %5157 = vmatpush1.bf16.msra.mxu0 %v10077_v6  ;;  %1997 = vmatprep.mubr.f32.mxu0 %v10078_v44  ;;  %10082 = vst [vmem:[#allocation183_spill] sm:$0xff] %v7695_v20  ;;  %v7698_v6 = vpack.c.bf16 %v2385_v58, %v2373_v37  ;;  %v9537_v44 = vand.u32 4294901760, %v10083_v41  ;;  %v10086_v58 = vand.u32 4294901760, %v10074_v3  ;;  %v10087_v53 = vand.u32 4294901760, %v10075_v16 }
 0x142   : > { %v2402_v5 = vsub.f32 %v10065_v29, %v10080_v9  ;;  %5159 = vmatprep.subr.bf16.mxu0 %v7471_v62  ;;  %v2414_v9 = vsub.f32 %v10067_v50, %v10084_v31  ;;  %v1699_v29 = vld [vmem:[%s6424_s8 + $0xd8] sm:$0xff]  ;;  %v10085_v62 = vand.u32 4294901760, %v7397_v34  ;;  %v7720_v31 = vsub.f32 %v1697_v0, %v7681_v63  ;;  %637 = vmatmul.mubr.f32.gmra.mrb[30].mxu1 %v636_v23 }
 0x143   : > { %v2420_v37 = vsub.f32 %v10074_v3, %v10086_v58  ;;  %v2432_v49 = vsub.f32 %v10075_v16, %v10087_v53  ;;  %v10089_v34 = vand.u32 4294901760, %v7477_v10  ;;  %v10090_v8 = vand.u32 4294901760, %v10081_v28  ;;  %v10093_v10 = vld [vmem:[#allocation125_spill] sm:$0xff]  ;;  %747 = vmatprep.mubr.f32.mxu1 %v9725_v33 }
 0x144   : > { %2003 = vmatmul.mubr.f32.gmra.mrb[12].mxu0 %v10085_v62  ;;  %10088 = vst [vmem:[#allocation118_spill] sm:$0xff] %v7720_v31  ;;  %v2403_v62 = vand.u32 4294901760, %v2402_v5  ;;  %v7730_v30 = vsub.f32 %v1696_v43, %v7695_v20  ;;  %v2438_v0 = vsub.f32 %v10083_v41, %v9537_v44  ;;  %v1698_v5 = vld [vmem:[%s6424_s8 + $0xd0] sm:$0xff]  ;;  %v7742_v2 = vpack.c.bf16 %v2409_v36, %v2397_v52 }
 0x145   : > { %5161 = vmatpush1.bf16.msra.mxu0 %v7519_v55  ;;  %2013 = vmatprep.mubr.f32.mxu0 %v10089_v34  ;;  %v2426_v58 = vsub.f32 %v10081_v28, %v10090_v8  ;;  %v10092_v55 = vld [vmem:[#allocation124_spill] sm:$0xff]  ;;  %v7738_v34 = vand.u32 4294901760, %v1699_v29  ;;  %v2415_v43 = vand.u32 4294901760, %v2414_v9  ;;  %v10095_v8 = vand.u32 4294901760, %v7675_v24  ;;  %v10097_v36 = vld [vmem:[#allocation127_spill] sm:$0xff] }
 0x146   : > { %10091 = vst [vmem:[#allocation186_spill] sm:$0xff] %v7730_v30  ;;  %5163 = vmatprep.subr.bf16.mxu0 %v7542_v61  ;;  %v7747_v61 = vsub.f32 %v7672_v54, %v9542_v59  ;;  %v10096_v53 = vand.u32 4294901760, %v7505_v13  ;;  %v2421_v23 = vand.u32 4294901760, %v2420_v37  ;;  %v2433_v20 = vand.u32 4294901760, %v2432_v49  ;;  %v10098_v9 = vld [vmem:[#allocation15_spill] sm:$0xff]  ;;  %v1701_v37 = vld [vmem:[%s6424_s8 + $0xe8] sm:$0xff] }
 0x147   : > { %10094 = vst [vmem:[#allocation193_spill] sm:$0xff] %v7738_v34  ;;  %v7752_v44 = vsub.f32 %v7675_v24, %v10095_v8  ;;  %v9548_v52 = vand.u32 4294901760, %v7720_v31  ;;  %749 = vmatmul.mubr.f32.vlgmr.msra.gmra.mrb[0].mxu1 %v10098_v9  ;;  %v10099_v59 = vand.u32 4294901760, %v7561_v21  ;;  %v2427_v54 = vand.u32 4294901760, %v2426_v58  ;;  %v10100_v24 = vld [vmem:[#allocation130_spill] sm:$0xff] }
 0x148   : > { %2019 = vmatmul.mubr.f32.gmra.mrb[14].mxu0 %v10096_v53  ;;  %v7764_v13 = vand.u32 4294901760, %v1698_v5  ;;  %v2439_v49 = vand.u32 4294901760, %v2438_v0  ;;  %v10102_v53 = vand.u32 4294901760, %v10092_v55  ;;  %754 = vmatprep.mubr.f32.mxu1 %v9725_v33  ;;  %v5176_v58 = vpack.c.bf16 %v2415_v43, %v2403_v62  ;;  %v10105_v0 = vld [vmem:[#allocation133_spill] sm:$0xff] }
 0x149   : > { %5165 = vmatpush1.bf16.msra.mxu0 %v7588_v46  ;;  %2029 = vmatprep.mubr.f32.mxu0 %v10099_v59  ;;  %v10103_v46 = vand.u32 4294901760, %v10093_v10  ;;  %v7775_v59 = vsub.f32 %v1699_v29, %v7738_v34  ;;  %v2076_v28 = vand.u32 4294901760, %v7747_v61  ;;  %v10106_v63 = vand.u32 4294901760, %v7578_v57  ;;  %v10109_v61 = vld [vmem:[#allocation17_spill] sm:$0xff] }
 0x14a   : > { %10101 = vst [vmem:[#allocation15_spill] sm:$0xff] %v7764_v13  ;;  %5167 = vmatprep.subr.bf16.mxu0 %v7591_v22  ;;  %v2444_v9 = vsub.f32 %v10092_v55, %v10102_v53  ;;  %v5178_v53 = vpack.c.bf16 %v2433_v20, %v2421_v23  ;;  %v10107_v29 = vand.u32 4294901760, %v10097_v36  ;;  %v7791_v43 = vand.u32 4294901760, %v1701_v37  ;;  %v1703_v22 = vld [vmem:[%s6424_s8 + $0xf8] sm:$0xff] }
 0x14b   : > { %v2456_v21 = vsub.f32 %v10093_v10, %v10103_v46  ;;  %10104 = vst [vmem:[#allocation194_spill] sm:$0xff] %v7775_v59  ;;  %v7786_v46 = vsub.f32 %v7720_v31, %v9548_v52  ;;  %756 = vmatmul.mubr.f32.gmra.mrb[2].mxu1 %v10109_v61  ;;  %v10110_v57 = vand.u32 4294901760, %v7601_v60  ;;  %v10111_v20 = vand.u32 4294901760, %v7730_v30  ;;  %v1700_v61 = vld [vmem:[%s6424_s8 + $0xe0] sm:$0xff] }
 0x14c   : > { %2035 = vmatmul.mubr.f32.gmra.mrb[16].mxu0 %v10106_v63  ;;  %v2450_v62 = vsub.f32 %v10097_v36, %v10107_v29  ;;  %10108 = vst [vmem:[#allocation195_spill] sm:$0xff] %v7791_v43  ;;  %v2082_v63 = vand.u32 4294901760, %v7752_v44  ;;  %v10112_v52 = vand.u32 4294901760, %v10100_v24  ;;  %v7807_v8 = vsub.f32 %v1698_v5, %v7764_v13  ;;  %761 = vmatprep.mubr.f32.mxu1 %v9725_v33 }
 0x14d   : > { %5169 = vmatpush1.bf16.msra.mxu0 %v7625_v26  ;;  %2045 = vmatprep.mubr.f32.mxu0 %v10110_v57  ;;  %v7801_v23 = vsub.f32 %v7730_v30, %v10111_v20  ;;  %v5180_v26 = vpack.c.bf16 %v2439_v49, %v2427_v54  ;;  %v2445_v60 = vand.u32 4294901760, %v2444_v9  ;;  %v2457_v57 = vand.u32 4294901760, %v2456_v21 }
 0x14e   : > { %v2462_v29 = vsub.f32 %v10100_v24, %v10112_v52  ;;  %10113 = vst [vmem:[#allocation17_spill] sm:$0xff] %v7807_v8  ;;  %5171 = vmatprep.subr.bf16.mxu0 %v7698_v6  ;;  %v10114_v20 = vand.u32 4294901760, %v6915_v38  ;;  %v10115_v52 = vand.u32 4294901760, %v10105_v0  ;;  %v10116_v6 = vand.u32 4294901760, %v7630_v1 }
 0x14f   : > { %v2092_v49 = vand.u32 4294901760, %v7786_v46  ;;  %v2451_v9 = vand.u32 4294901760, %v2450_v62  ;;  %v7826_v21 = vsub.f32 %v1701_v37, %v7791_v43  ;;  %v7828_v44 = vand.u32 4294901760, %v1700_v61  ;;  %v1702_v46 = vld [vmem:[%s6424_s8 + $0xf0] sm:$0xff]  ;;  %s6162_s8 = scalar_lea.vmem %s9118_s19, 128 }
 0x150   : > { %v2468_v30 = vsub.f32 %v6915_v38, %v10114_v20  ;;  %v2480_v5 = vsub.f32 %v10105_v0, %v10115_v52  ;;  %2051 = vmatmul.mubr.f32.gmra.mrb[18].mxu0 %v10116_v6  ;;  %v10119_v20 = vld [vmem:[#allocation18_spill] sm:$0xff]  ;;  %v10120_v52 = vand.u32 4294901760, %v7666_v14  ;;  %v2098_v54 = vand.u32 4294901760, %v7801_v23  ;;  %p6163_p6 = scmp.ne.s32.totalorder %s9118_s19, %s6162_s8  ;;  %p6170_p3 = scmp.lt.s32.totalorder %s6168_s16, %s6162_s8 }
 0x151   : > { %10117 = vst [vmem:[#allocation196_spill] sm:$0xff] %v7826_v21  ;;  %10118 = vst [vmem:[#allocation197_spill] sm:$0xff] %v7828_v44  ;;  %763 = vmatmul.mubr.f32.gmra.mrb[4].mxu1 %v10119_v20  ;;  %5173 = vmatpush1.bf16.msra.mxu0 %v7700_v39  ;;  %v2463_v31 = vand.u32 4294901760, %v2462_v29  ;;  %v7836_v6 = vand.u32 4294901760, %v1703_v22  ;;  %v5182_v37 = vpack.c.bf16 %v2457_v57, %v2445_v60  ;;  %v10122_v62 = vand.u32 4294901760, %v7775_v59 }
 0x152   : > { %2061 = vmatprep.mubr.f32.mxu0 %v10120_v52  ;;  %5175 = vmatprep.subr.bf16.mxu0 %v7742_v2  ;;  %v2469_v23 = vand.u32 4294901760, %v2468_v30  ;;  %v2481_v29 = vand.u32 4294901760, %v2480_v5  ;;  %v10123_v52 = vand.u32 4294901760, %v6922_v25  ;;  %v10124_v43 = vand.u32 4294901760, %v6925_v27  ;;  %v10128_v5 = vld [vmem:[#allocation25_spill] sm:$0xff]  ;;  %p6164_p8 = pnand %p6163_p6, %p6369_p12  ;;  %p6171_p7 = por %p6170_p3, %p6169_p13 }
 0x153   : > { %10121 = vst [vmem:[#allocation18_spill] sm:$0xff] %v7836_v6  ;;  %v2107_v20 = vsub.f32 %v7775_v59, %v10122_v62  ;;  %768 = vmatprep.mubr.f32.mxu1 %v9725_v33  ;;  %v10125_v60 = vand.u32 4294901760, %v7689_v17  ;;  %v7856_v62 = vsub.f32 %v1700_v61, %v7828_v44  ;;  %v7859_v30 = vand.u32 4294901760, %v1702_v46 }
 0x154   : > { %v2474_v1 = vsub.f32 %v6922_v25, %v10123_v52  ;;  %v2486_v2 = vsub.f32 %v6925_v27, %v10124_v43  ;;  %v5184_v52 = vpack.c.bf16 %v2463_v31, %v2451_v9  ;;  %v10129_v39 = vand.u32 4294901760, %v7807_v8  ;;  %v10135_v31 = vld [vmem:[#allocation26_spill] sm:$0xff]  ;;  %p6165_p10 = pneg %p6164_p8 }
 0x155   : > { %2067 = vmatmul.mubr.f32.gmra.mrb[20].mxu0 %v10125_v60  ;;  %10126 = vst [vmem:[#allocation198_spill] sm:$0xff] %v7856_v62  ;;  %10127 = vst [vmem:[#allocation199_spill] sm:$0xff] %v7859_v30  ;;  %770 = vmatmul.mubr.f32.gmra.mrb[6].mxu1 %v10128_v5  ;;  %v7867_v60 = vsub.f32 %v1703_v22, %v7836_v6  ;;  %v10131_v61 = vand.u32 4294901760, %v6941_v32  ;;  %v10132_v57 = vand.u32 4294901760, %v6948_v45  ;;  %v2108_v9 = vand.u32 4294901760, %v2107_v20 }
 0x156   : > { %5177 = vmatpush1.bf16.msra.mxu0 %v5176_v58  ;;  %2077 = vmatprep.mubr.f32.mxu0 %v2076_v28  ;;  %v2113_v43 = vsub.f32 %v7807_v8, %v10129_v39  ;;  %v5186_v39 = vpack.c.bf16 %v2481_v29, %v2469_v23  ;;  %v2475_v5 = vand.u32 4294901760, %v2474_v1  ;;  %v2487_v22 = vand.u32 4294901760, %v2486_v2  ;;  %v10139_v29 = vld [vmem:[#allocation29_spill] sm:$0xff]  ;;  %p6172_p9 = pnand %p6171_p7, %p6165_p10 }
 0x157   : > { %10130 = vst [vmem:[#allocation25_spill] sm:$0xff] %v7867_v60  ;;  %5179 = vmatprep.subr.bf16.mxu0 %v5178_v53  ;;  %v2492_v14 = vsub.f32 %v6941_v32, %v10131_v61  ;;  %v2504_v58 = vsub.f32 %v6948_v45, %v10132_v57  ;;  %775 = vmatprep.mubr.f32.mxu1 %v9725_v33  ;;  %v10133_v53 = vand.u32 4294901760, %v7826_v21  ;;  %v9557_v61 = vand.u32 4294901760, %v7856_v62 }
 0x158   : > { %v10134_v8 = vand.u32 4294901760, %v6952_v11  ;;  %v7886_v28 = vsub.f32 %v1702_v46, %v7859_v30  ;;  %v10136_v1 = vand.u32 4294901760, %v6955_v51  ;;  %v10137_v46 = vand.u32 4294901760, %v6982_v42 }
 0x159   : > { %2083 = vmatmul.mubr.f32.gmra.mrb[22].mxu0 %v2082_v63  ;;  %v2123_v17 = vsub.f32 %v7826_v21, %v10133_v53  ;;  %777 = vmatmul.mubr.f32.gmra.mrb[8].mxu1 %v10135_v31  ;;  %v2493_v2 = vand.u32 4294901760, %v2492_v14  ;;  %v2114_v31 = vand.u32 4294901760, %v2113_v43  ;;  %v10141_v43 = vand.u32 4294901760, %v7023_v35 }
 0x15a   : > { %v2498_v57 = vsub.f32 %v6952_v11, %v10134_v8  ;;  %5181 = vmatpush1.bf16.msra.mxu0 %v5180_v26  ;;  %2093 = vmatprep.mubr.f32.mxu0 %v2092_v49  ;;  %v2510_v63 = vsub.f32 %v6955_v51, %v10136_v1  ;;  %v2505_v8 = vand.u32 4294901760, %v2504_v58  ;;  %v2516_v53 = vsub.f32 %v6982_v42, %v10137_v46 }
 0x15b   : > { %5183 = vmatprep.subr.bf16.mxu0 %v5182_v37  ;;  %v10138_v26 = vand.u32 4294901760, %v6989_v56  ;;  %782 = vmatprep.mubr.f32.mxu1 %v9725_v33  ;;  %v5188_v1 = vpack.c.bf16 %v2487_v22, %v2475_v5  ;;  %v2124_v20 = vand.u32 4294901760, %v2123_v17  ;;  %v2129_v37 = vsub.f32 %v7856_v62, %v9557_v61 }
 0x15c   : > { %v2499_v14 = vand.u32 4294901760, %v2498_v57  ;;  %v9558_v58 = vand.u32 4294901760, %v7886_v28  ;;  %v2511_v46 = vand.u32 4294901760, %v2510_v63  ;;  %v10142_v17 = vand.u32 4294901760, %v7025_v4 }
 0x15d   : > { %v2528_v49 = vsub.f32 %v6989_v56, %v10138_v26  ;;  %2099 = vmatmul.mubr.f32.gmra.mrb[24].mxu0 %v2098_v54  ;;  %784 = vmatmul.mubr.f32.gmra.mrb[10].mxu1 %v10139_v29  ;;  %v10140_v26 = vand.u32 4294901760, %v7867_v60  ;;  %v2522_v54 = vsub.f32 %v7023_v35, %v10141_v43  ;;  %v5190_v22 = vpack.c.bf16 %v2505_v8, %v2493_v2  ;;  %v10145_v43 = vld [vmem:[#allocation31_spill] sm:$0xff] }
 0x15e   : > { %5185 = vmatpush1.bf16.msra.mxu0 %v5184_v52  ;;  %2109 = vmatprep.mubr.f32.mxu0 %v2108_v9  ;;  %v2534_v5 = vsub.f32 %v7025_v4, %v10142_v17  ;;  %v2517_v57 = vand.u32 4294901760, %v2516_v53  ;;  %v10143_v52 = vld [vmem:[#allocation11_spill] sm:$0xff]  ;;  %v10144_v9 = vld [vmem:[#allocation12_spill] sm:$0xff]  ;;  %v2130_v29 = vand.u32 4294901760, %v2129_v37  ;;  %v5192_v17 = vpack.c.bf16 %v2511_v46, %v2499_v14 }
 0x15f   : > { %v2139_v23 = vsub.f32 %v7867_v60, %v10140_v26  ;;  %5187 = vmatprep.subr.bf16.mxu0 %v5186_v39  ;;  %v2529_v61 = vand.u32 4294901760, %v2528_v49  ;;  %789 = vmatprep.mubr.f32.mxu1 %v9725_v33  ;;  %v5038_v63 = vpack.c.bf16 %v10144_v9, %v10143_v52  ;;  %v2145_v26 = vsub.f32 %v7886_v28, %v9558_v58  ;;  %v10146_v49 = vld [vmem:[#allocation13_spill] sm:$0xff]  ;;  %v10148_v9 = vld [vmem:[#allocation35_spill] sm:$0xff] }
 0x160   : > { %v2523_v2 = vand.u32 4294901760, %v2522_v54  ;;  %v2535_v8 = vand.u32 4294901760, %v2534_v5  ;;  %v10152_v54 = vld [vmem:[#allocation37_spill] sm:$0xff]  ;;  %v10153_v5 = vld [vmem:[#allocation128_spill] sm:$0xff] }
 0x161   : > { %2115 = vmatmul.mubr.f32.gmra.mrb[26].mxu0 %v2114_v31  ;;  %791 = vmatmul.mubr.f32.gmra.mrb[12].mxu1 %v10145_v43  ;;  %v2140_v39 = vand.u32 4294901760, %v2139_v23  ;;  %v5194_v53 = vpack.c.bf16 %v2529_v61, %v2517_v57  ;;  %v10147_v31 = vld [vmem:[#allocation14_spill] sm:$0xff]  ;;  %v2146_v52 = vand.u32 4294901760, %v2145_v26  ;;  %v10150_v23 = vld [vmem:[#allocation33_spill] sm:$0xff]  ;;  %v10151_v61 = vld [vmem:[#allocation20_spill] sm:$0xff] }
 0x162   : > { %5189 = vmatpush1.bf16.msra.mxu0 %v5188_v1  ;;  %2125 = vmatprep.mubr.f32.mxu0 %v2124_v20  ;;  %v5040_v37 = vpack.c.bf16 %v10147_v31, %v10146_v49  ;;  %v5196_v1 = vpack.c.bf16 %v2535_v8, %v2523_v2  ;;  %v10149_v20 = vld [vmem:[#allocation32_spill] sm:$0xff]  ;;  %v5042_v46 = vpack.c.bf16 %v10151_v61, %v9972_v48  ;;  %v10157_v26 = vld [vmem:[#allocation59_spill] sm:$0xff]  ;;  %v10158_v48 = vld [vmem:[#allocation129_spill] sm:$0xff] }
 0x163   : > { %5191 = vmatprep.subr.bf16.mxu0 %v5190_v22  ;;  %796 = vmatprep.mubr.f32.mxu1 %v9725_v33  ;;  %v5198_v14 = vpack.c.bf16 %v10150_v23, %v10149_v20  ;;  %v10154_v22 = vld [vmem:[#allocation55_spill] sm:$0xff]  ;;  %v10155_v57 = vld [vmem:[#allocation56_spill] sm:$0xff]  ;;  %v10161_v8 = vld [vmem:[#allocation61_spill] sm:$0xff] }
 0x164   : > { %5039 = vmatprep.subr.bf16.mxu1 %v5038_v63  ;;  %v5200_v63 = vpack.c.bf16 %v10155_v57, %v10154_v22  ;;  %v10160_v2 = vld [vmem:[#allocation140_spill] sm:$0xff]  ;;  %v10163_v31 = vld [vmem:[#allocation63_spill] sm:$0xff] }
 0x165   : > { %2131 = vmatmul.mubr.f32.gmra.mrb[28].mxu0 %v2130_v29  ;;  %798 = vmatmul.mubr.f32.gmra.mrb[14].mxu1 %v10148_v9  ;;  %v10156_v29 = vld [vmem:[#allocation58_spill] sm:$0xff] }
 0x166   : > { %5193 = vmatpush1.bf16.msra.mxu0 %v5192_v17  ;;  %2141 = vmatprep.mubr.f32.mxu0 %v2140_v39  ;;  %v5202_v43 = vpack.c.bf16 %v10157_v26, %v10156_v29  ;;  %v5044_v17 = vpack.c.bf16 %v9986_v19, %v9984_v12  ;;  %v10159_v39 = vld [vmem:[#allocation39_spill] sm:$0xff]  ;;  %v10165_v9 = vld [vmem:[#allocation142_spill] sm:$0xff]  ;;  %v10166_v19 = vld [vmem:[#allocation41_spill] sm:$0xff] }
 0x167   : > { %5195 = vmatprep.subr.bf16.mxu0 %v5194_v53  ;;  %803 = vmatprep.mubr.f32.mxu1 %v9725_v33  ;;  %v10162_v53 = vld [vmem:[#allocation62_spill] sm:$0xff]  ;;  %v10167_v12 = vld [vmem:[#allocation153_spill] sm:$0xff] }
 0x168   : > { %5041 = vmatpush1.bf16.msra.mxu1 %v5040_v37  ;;  %v5204_v49 = vpack.c.bf16 %v10162_v53, %v10161_v8  ;;  %v10164_v37 = vld [vmem:[#allocation65_spill] sm:$0xff] }
 0x169   : > { %2147 = vmatmul.mubr.f32.gmra.mrb[30].mxu0 %v2146_v52  ;;  %805 = vmatmul.mubr.f32.gmra.mrb[16].mxu1 %v10152_v54  ;;  %v5206_v52 = vpack.c.bf16 %v10164_v37, %v10163_v31  ;;  %v10171_v54 = vld [vmem:[#allocation71_spill] sm:$0xff] }
 0x16a   : > { %5197 = vmatpush1.bf16.msra.mxu0 %v5196_v1  ;;  %2538 = vmatprep.mubr.f32.mxu0 %v10153_v5  ;;  %v10168_v1 = vld [vmem:[#allocation67_spill] sm:$0xff] }
 0x16b   : > { %5199 = vmatprep.subr.bf16.mxu0 %v5198_v14  ;;  %810 = vmatprep.mubr.f32.mxu1 %v9725_v33  ;;  %v10169_v14 = vld [vmem:[#allocation68_spill] sm:$0xff] }
 0x16c   : > { %5043 = vmatprep.subr.bf16.mxu1 %v5042_v46  ;;  %v5208_v61 = vpack.c.bf16 %v10169_v14, %v10168_v1  ;;  %v10170_v46 = vld [vmem:[#allocation69_spill] sm:$0xff] }
 0x16d   : > { %2540 = vmatmul.mubr.f32.vlgmr.msra.gmra.mrb[0].mxu0 %v10158_v48  ;;  %812 = vmatmul.mubr.f32.gmra.mrb[18].mxu1 %v10159_v39  ;;  %v10173_v39 = vld [vmem:[#allocation43_spill] sm:$0xff]  ;;  %v10180_v48 = vld [vmem:[#allocation45_spill] sm:$0xff] }
 0x16e   : > { %5201 = vmatpush1.bf16.msra.mxu0 %v5200_v63  ;;  %2546 = vmatprep.mubr.f32.mxu0 %v10160_v2  ;;  %v5210_v63 = vpack.c.bf16 %v10171_v54, %v10170_v46  ;;  %v10185_v54 = vld [vmem:[#allocation83_spill] sm:$0xff] }
 0x16f   : > { %5203 = vmatprep.subr.bf16.mxu0 %v5202_v43  ;;  %817 = vmatprep.mubr.f32.mxu1 %v9725_v33  ;;  %v10172_v43 = vld [vmem:[#allocation154_spill] sm:$0xff] }
 0x170   : > { %5045 = vmatpush1.bf16.msra.mxu1 %v5044_v17  ;;  %v10174_v17 = vld [vmem:[#allocation160_spill] sm:$0xff] }
 0x171   : > { %2548 = vmatmul.mubr.f32.gmra.mrb[2].mxu0 %v10165_v9  ;;  %819 = vmatmul.mubr.f32.gmra.mrb[20].mxu1 %v10166_v19  ;;  %v10175_v19 = vld [vmem:[#allocation73_spill] sm:$0xff] }
 0x172   : > { %5205 = vmatpush1.bf16.msra.mxu0 %v5204_v49  ;;  %2554 = vmatprep.mubr.f32.mxu0 %v10167_v12  ;;  %v10176_v49 = vld [vmem:[#allocation74_spill] sm:$0xff]  ;;  %v10177_v12 = vld [vmem:[#allocation76_spill] sm:$0xff]  ;;  %v10178_v9 = vld [vmem:[#allocation77_spill] sm:$0xff] }
 0x173   : > { %5207 = vmatprep.subr.bf16.mxu0 %v5206_v52  ;;  %824 = vmatprep.mubr.f32.mxu1 %v9725_v33  ;;  %v5212_v58 = vpack.c.bf16 %v10176_v49, %v10175_v19  ;;  %v5214_v2 = vpack.c.bf16 %v10178_v9, %v10177_v12  ;;  %v10179_v52 = vld [vmem:[#allocation161_spill] sm:$0xff]  ;;  %v10187_v9 = vld [vmem:[#allocation47_spill] sm:$0xff] }
 0x174   : > { %v10192_v19 = vld [vmem:[#allocation89_spill] sm:$0xff] }
 0x175   : > { %2556 = vmatmul.mubr.f32.gmra.mrb[4].mxu0 %v10172_v43  ;;  %826 = vmatmul.mubr.f32.gmra.mrb[22].mxu1 %v10173_v39  ;;  %v10181_v43 = vld [vmem:[#allocation166_spill] sm:$0xff]  ;;  %v10182_v39 = vld [vmem:[#allocation79_spill] sm:$0xff] }
 0x176   : > { %5209 = vmatpush1.bf16.msra.mxu0 %v5208_v61  ;;  %2562 = vmatprep.mubr.f32.mxu0 %v10174_v17  ;;  %v10183_v61 = vld [vmem:[#allocation80_spill] sm:$0xff]  ;;  %v10184_v17 = vld [vmem:[#allocation82_spill] sm:$0xff] }
 0x177   : > { %5211 = vmatprep.subr.bf16.mxu0 %v5210_v63  ;;  %831 = vmatprep.mubr.f32.mxu1 %v9725_v33  ;;  %v5216_v5 = vpack.c.bf16 %v10183_v61, %v10182_v39  ;;  %v5218_v49 = vpack.c.bf16 %v10185_v54, %v10184_v17  ;;  %v10186_v63 = vld [vmem:[#allocation167_spill] sm:$0xff]  ;;  %v10194_v54 = vld [vmem:[#allocation49_spill] sm:$0xff] }
 0x179   : > { %2564 = vmatmul.mubr.f32.gmra.mrb[6].mxu0 %v10179_v52  ;;  %833 = vmatmul.mubr.f32.gmra.mrb[24].mxu1 %v10180_v48  ;;  %v10188_v52 = vld [vmem:[#allocation173_spill] sm:$0xff] }
 0x17a   : > { %5213 = vmatpush1.bf16.msra.mxu0 %v5212_v58  ;;  %2570 = vmatprep.mubr.f32.mxu0 %v10181_v43  ;;  %v10189_v48 = vld [vmem:[#allocation85_spill] sm:$0xff]  ;;  %v10190_v58 = vld [vmem:[#allocation86_spill] sm:$0xff]  ;;  %v10191_v43 = vld [vmem:[#allocation87_spill] sm:$0xff] }
 0x17b   : > { %5215 = vmatprep.subr.bf16.mxu0 %v5214_v2  ;;  %838 = vmatprep.mubr.f32.mxu1 %v9725_v33  ;;  %v5220_v12 = vpack.c.bf16 %v10190_v58, %v10189_v48  ;;  %v5222_v61 = vpack.c.bf16 %v10192_v19, %v10191_v43  ;;  %v10193_v2 = vld [vmem:[#allocation174_spill] sm:$0xff] }
 0x17d   : > { %2572 = vmatmul.mubr.f32.gmra.mrb[8].mxu0 %v10186_v63  ;;  %840 = vmatmul.mubr.f32.gmra.mrb[26].mxu1 %v10187_v9  ;;  %v10195_v63 = vld [vmem:[#allocation181_spill] sm:$0xff]  ;;  %v10196_v9 = vld [vmem:[#allocation91_spill] sm:$0xff] }
 0x17e   : > { %5217 = vmatpush1.bf16.msra.mxu0 %v5216_v5  ;;  %2578 = vmatprep.mubr.f32.mxu0 %v10188_v52  ;;  %v10197_v5 = vld [vmem:[#allocation92_spill] sm:$0xff]  ;;  %v10198_v52 = vld [vmem:[#allocation182_spill] sm:$0xff] }
 0x17f   : > { %5219 = vmatprep.subr.bf16.mxu0 %v5218_v49  ;;  %845 = vmatprep.mubr.f32.mxu1 %v9725_v33  ;;  %v5224_v17 = vpack.c.bf16 %v10197_v5, %v10196_v9  ;;  %v10199_v49 = vld [vmem:[#allocation187_spill] sm:$0xff] }
 0x181   : > { %2580 = vmatmul.mubr.f32.gmra.mrb[10].mxu0 %v10193_v2  ;;  %847 = vmatmul.mubr.f32.gmra.mrb[28].mxu1 %v10194_v54  ;;  %v10200_v2 = vpack.c.bf16 %v9908_v15, %v9907_v7  ;;  %v10202_v54 = vld [vmem:[#allocation16_spill] sm:$0xff] }
 0x182   : > { %5221 = vmatpush1.bf16.msra.mxu0 %v5220_v12  ;;  %2586 = vmatprep.mubr.f32.mxu0 %v10195_v63  ;;  %v10201_v12 = vld [vmem:[#allocation188_spill] sm:$0xff] }
 0x183   : > { %5223 = vmatprep.subr.bf16.mxu0 %v5222_v61  ;;  %852 = vmatprep.mubr.f32.mxu1 %v9725_v33  ;;  %v10203_v61 = vld [vmem:[#allocation97_spill] sm:$0xff]  ;;  %v10211_v15 = vld [vmem:[#allocation104_spill] sm:$0xff] }
 0x184   : > { %v10204_v63 = vpack.c.bf16 %v9910_v18, %v10203_v61  ;;  %v10215_v18 = vld [vmem:[#allocation107_spill] sm:$0xff] }
 0x185   : > { %2588 = vmatmul.mubr.f32.gmra.mrb[12].mxu0 %v10198_v52  ;;  %854 = vmatmul.mubr.f32.gmra.mrb[30].mxu1 %v9994_v47  ;;  %v10205_v52 = vld [vmem:[#allocation23_spill] sm:$0xff]  ;;  %v10206_v47 = vld [vmem:[#allocation101_spill] sm:$0xff] }
 0x186   : > { %5225 = vmatpush1.bf16.msra.mxu0 %v5224_v17  ;;  %2594 = vmatprep.mubr.f32.mxu0 %v10199_v49  ;;  %v10207_v17 = vld [vmem:[#allocation100_spill] sm:$0xff]  ;;  %v10209_v49 = vld [vmem:[#allocation51_spill] sm:$0xff] }
 0x187   : > { %5227 = vmatprep.subr.bf16.mxu0 %v10200_v2  ;;  %940 = vmatprep.mubr.f32.mxu1 %v9725_v33  ;;  %v10208_v5 = vpack.c.bf16 %v10206_v47, %v10207_v17  ;;  %v10210_v2 = vld [vmem:[#allocation21_spill] sm:$0xff]  ;;  %v10220_v47 = vld [vmem:[#allocation110_spill] sm:$0xff] }
 0x189   : > { %2596 = vmatmul.mubr.f32.gmra.mrb[14].mxu0 %v10201_v12  ;;  %943 = vmatmul.mubr.f32.vlgmr.msra.gmra.mrb[0].mxu1 %v10202_v54  ;;  %v10212_v12 = vld [vmem:[#allocation103_spill] sm:$0xff]  ;;  %v10214_v54 = vld [vmem:[#allocation190_spill] sm:$0xff] }
 0x18a   : > { %5229 = vmatpush1.bf16.msra.mxu0 %v10204_v63  ;;  %2602 = vmatprep.mubr.f32.mxu0 %v10205_v52  ;;  %v10213_v7 = vpack.c.bf16 %v10211_v15, %v10212_v12  ;;  %v10216_v63 = vld [vmem:[#allocation106_spill] sm:$0xff]  ;;  %v10218_v52 = vld [vmem:[#allocation192_spill] sm:$0xff] }
 0x18b   : > { %5231 = vmatprep.subr.bf16.mxu0 %v10208_v5  ;;  %948 = vmatprep.mubr.f32.mxu1 %v9725_v33  ;;  %v10217_v61 = vpack.c.bf16 %v10215_v18, %v10216_v63  ;;  %v10219_v5 = vld [vmem:[#allocation24_spill] sm:$0xff] }
 0x18d   : > { %2604 = vmatmul.mubr.f32.gmra.mrb[16].mxu0 %v10209_v49  ;;  %951 = vmatmul.mubr.f32.gmra.mrb[2].mxu1 %v10210_v2  ;;  %v10221_v49 = vld [vmem:[#allocation109_spill] sm:$0xff]  ;;  %v10223_v2 = vld [vmem:[#allocation164_spill] sm:$0xff] }
 0x18e   : > { %5233 = vmatpush1.bf16.msra.mxu0 %v10213_v7  ;;  %2610 = vmatprep.mubr.f32.mxu0 %v10214_v54  ;;  %v10222_v17 = vpack.c.bf16 %v10220_v47, %v10221_v49  ;;  %v10224_v7 = vld [vmem:[#allocation112_spill] sm:$0xff]  ;;  %v10226_v54 = vld [vmem:[#allocation175_spill] sm:$0xff] }
 0x18f   : > { %5235 = vmatprep.subr.bf16.mxu0 %v10217_v61  ;;  %956 = vmatprep.mubr.f32.mxu1 %v9725_v33  ;;  %v10225_v15 = vpack.c.bf16 %v10058_v40, %v10224_v7  ;;  %v10227_v61 = vld [vmem:[#allocation27_spill] sm:$0xff] }
 0x191   : > { %2612 = vmatmul.mubr.f32.gmra.mrb[18].mxu0 %v10218_v52  ;;  %959 = vmatmul.mubr.f32.gmra.mrb[4].mxu1 %v10219_v5  ;;  %v10228_v52 = vld [vmem:[#allocation115_spill] sm:$0xff]  ;;  %v10230_v5 = vld [vmem:[#allocation170_spill] sm:$0xff] }
 0x192   : > { %5237 = vmatpush1.bf16.msra.mxu0 %v10222_v17  ;;  %2618 = vmatprep.mubr.f32.mxu0 %v10223_v2  ;;  %v10229_v18 = vpack.c.bf16 %v10067_v50, %v10228_v52  ;;  %v10231_v17 = vpack.c.bf16 %v10075_v16, %v10074_v3  ;;  %v10232_v2 = vld [vmem:[#allocation177_spill] sm:$0xff]  ;;  %v10309_v16 = vld [vmem:[#allocation126_spill] sm:$0xff] }
 0x193   : > { %5239 = vmatprep.subr.bf16.mxu0 %v10225_v15  ;;  %964 = vmatprep.mubr.f32.mxu1 %v9725_v33  ;;  %v10233_v15 = vld [vmem:[#allocation28_spill] sm:$0xff] }
 0x195   : > { %2620 = vmatmul.mubr.f32.gmra.mrb[20].mxu0 %v10226_v54  ;;  %967 = vmatmul.mubr.f32.gmra.mrb[6].mxu1 %v10227_v61  ;;  %v10234_v54 = vld [vmem:[#allocation121_spill] sm:$0xff]  ;;  %v10236_v61 = vld [vmem:[#allocation116_spill] sm:$0xff] }
 0x196   : > { %5241 = vmatpush1.bf16.msra.mxu0 %v10229_v18  ;;  %2626 = vmatprep.mubr.f32.mxu0 %v10230_v5  ;;  %v10235_v40 = vpack.c.bf16 %v10083_v41, %v10234_v54  ;;  %v10237_v18 = vpack.c.bf16 %v10093_v10, %v10092_v55  ;;  %v10238_v5 = vld [vmem:[#allocation183_spill] sm:$0xff]  ;;  %v10301_v10 = vld [vmem:[#allocation114_spill] sm:$0xff]  ;;  %v10303_v55 = vld [vmem:[#allocation117_spill] sm:$0xff] }
 0x197   : > { %5243 = vmatprep.subr.bf16.mxu0 %v10231_v17  ;;  %972 = vmatprep.mubr.f32.mxu1 %v9725_v33  ;;  %v10239_v17 = vld [vmem:[#allocation30_spill] sm:$0xff]  ;;  %v10305_v41 = vld [vmem:[#allocation120_spill] sm:$0xff]  ;;  %v10307_v54 = vld [vmem:[#allocation123_spill] sm:$0xff] }
 0x199   : > { %2628 = vmatmul.mubr.f32.gmra.mrb[22].mxu0 %v10232_v2  ;;  %975 = vmatmul.mubr.f32.gmra.mrb[8].mxu1 %v10233_v15  ;;  %v10240_v2 = vpack.c.bf16 %v10100_v24, %v10097_v36  ;;  %v10242_v15 = vld [vmem:[#allocation34_spill] sm:$0xff]  ;;  %v10297_v24 = vld [vmem:[#allocation108_spill] sm:$0xff]  ;;  %v10299_v36 = vld [vmem:[#allocation111_spill] sm:$0xff] }
 0x19a   : > { %5245 = vmatpush1.bf16.msra.mxu0 %v10235_v40  ;;  %2634 = vmatprep.mubr.f32.mxu0 %v10236_v61  ;;  %v10241_v40 = vpack.c.bf16 %v10105_v0, %v6915_v38  ;;  %v10262_v61 = vld [vmem:[#allocation64_spill] sm:$0xff]  ;;  %v10291_v0 = vld [vmem:[#allocation99_spill] sm:$0xff] }
 0x19b   : > { %5247 = vmatprep.subr.bf16.mxu0 %v10237_v18  ;;  %980 = vmatprep.mubr.f32.mxu1 %v9725_v33  ;;  %v10243_v18 = vpack.c.bf16 %v6925_v27, %v6922_v25  ;;  %v10287_v27 = vld [vmem:[#allocation94_spill] sm:$0xff]  ;;  %v10294_v38 = vld [vmem:[#allocation159_spill] sm:$0xff] }
 0x19c   : > { %v10288_v25 = vld [vmem:[#allocation22_spill] sm:$0xff] }
 0x19d   : > { %2636 = vmatmul.mubr.f32.gmra.mrb[24].mxu0 %v10238_v5  ;;  %983 = vmatmul.mubr.f32.gmra.mrb[10].mxu1 %v10239_v17  ;;  %v10244_v17 = vld [vmem:[#allocation195_spill] sm:$0xff]  ;;  %v10261_v5 = vld [vmem:[#allocation157_spill] sm:$0xff] }
 0x19e   : > { %5249 = vmatpush1.bf16.msra.mxu0 %v10240_v2  ;;  %2642 = vmatprep.mubr.f32.mxu0 %v7738_v34  ;;  %v10245_v2 = vpack.c.bf16 %v6948_v45, %v6941_v32  ;;  %v10260_v34 = vld [vmem:[#allocation60_spill] sm:$0xff]  ;;  %v10285_v32 = vld [vmem:[#allocation90_spill] sm:$0xff] }
 0x19f   : > { %5251 = vmatprep.subr.bf16.mxu0 %v10241_v40  ;;  %988 = vmatprep.mubr.f32.mxu1 %v9725_v33  ;;  %v10246_v40 = vld [vmem:[#allocation36_spill] sm:$0xff] }
 0x1a0   : > { %v10282_v45 = vld [vmem:[#allocation88_spill] sm:$0xff] }
 0x1a1   : > { %2644 = vmatmul.mubr.f32.gmra.mrb[26].mxu0 %v7764_v13  ;;  %991 = vmatmul.mubr.f32.gmra.mrb[12].mxu1 %v10242_v15  ;;  %v10247_v13 = vpack.c.bf16 %v6955_v51, %v6952_v11  ;;  %v10248_v15 = vpack.c.bf16 %v6989_v56, %v6982_v42  ;;  %v10272_v56 = vld [vmem:[#allocation75_spill] sm:$0xff]  ;;  %v10275_v42 = vld [vmem:[#allocation78_spill] sm:$0xff]  ;;  %v10277_v51 = vld [vmem:[#allocation81_spill] sm:$0xff] }
 0x1a2   : > { %5253 = vmatpush1.bf16.msra.mxu0 %v10243_v18  ;;  %2650 = vmatprep.mubr.f32.mxu0 %v10244_v17  ;;  %v10249_v18 = vld [vmem:[#allocation38_spill] sm:$0xff]  ;;  %v10256_v17 = vld [vmem:[#allocation148_spill] sm:$0xff] }
 0x1a3   : > { %5255 = vmatprep.subr.bf16.mxu0 %v10245_v2  ;;  %996 = vmatprep.mubr.f32.mxu1 %v9725_v33  ;;  %v10250_v2 = vpack.c.bf16 %v7025_v4, %v7023_v35  ;;  %v10267_v4 = vld [vmem:[#allocation70_spill] sm:$0xff]  ;;  %v10270_v35 = vld [vmem:[#allocation72_spill] sm:$0xff] }
 0x1a4   : > { %v10280_v11 = vld [vmem:[#allocation84_spill] sm:$0xff] }
 0x1a5   : > { %2652 = vmatmul.mubr.f32.gmra.mrb[28].mxu0 %v7828_v44  ;;  %999 = vmatmul.mubr.f32.gmra.mrb[14].mxu1 %v10246_v40  ;;  %v10251_v40 = vld [vmem:[#allocation138_spill] sm:$0xff]  ;;  %v10252_v44 = vld [vmem:[#allocation53_spill] sm:$0xff] }
 0x1a6   : > { %5257 = vmatpush1.bf16.msra.mxu0 %v10247_v13  ;;  %2658 = vmatprep.mubr.f32.mxu0 %v7836_v6  ;;  %v10253_v13 = vld [vmem:[#allocation139_spill] sm:$0xff]  ;;  %v10254_v6 = vld [vmem:[#allocation40_spill] sm:$0xff] }
 0x1a7   : > { %5259 = vmatprep.subr.bf16.mxu0 %v10248_v15  ;;  %1004 = vmatprep.mubr.f32.mxu1 %v9725_v33  ;;  %v10255_v15 = vld [vmem:[#allocation54_spill] sm:$0xff] }
 0x1a9   : > { %2660 = vmatmul.mubr.f32.gmra.mrb[30].mxu0 %v7859_v30  ;;  %1007 = vmatmul.mubr.f32.gmra.mrb[16].mxu1 %v10249_v18  ;;  %v10257_v30 = vld [vmem:[#allocation57_spill] sm:$0xff] }
 0x1aa   : > { %5261 = vmatpush1.bf16.msra.mxu0 %v10250_v2  ;;  %2860 = vmatprep.mubr.f32.mxu0 %v10251_v40  ;;  %v10258_v18 = vld [vmem:[#allocation149_spill] sm:$0xff]  ;;  %v10259_v2 = vld [vmem:[#allocation42_spill] sm:$0xff] }
 0x1ab   : > { %5263 = vmatprep.subr.bf16.mxu0 %v10252_v44  ;;  %1012 = vmatprep.mubr.f32.mxu1 %v9725_v33  ;;  %v10265_v44 = vld [vmem:[#allocation66_spill] sm:$0xff] }
 0x1ad   : > { %2863 = vmatmul.mubr.f32.vlgmr.msra.gmra.mrb[0].mxu0 %v10253_v13  ;;  %1015 = vmatmul.mubr.f32.gmra.mrb[18].mxu1 %v10254_v6  ;;  %v10263_v6 = vld [vmem:[#allocation158_spill] sm:$0xff] }
 0x1ae   : > { %5265 = vmatpush1.bf16.msra.mxu0 %v10255_v15  ;;  %2870 = vmatprep.mubr.f32.mxu0 %v10256_v17  ;;  %v10264_v15 = vld [vmem:[#allocation44_spill] sm:$0xff] }
 0x1af   : > { %5267 = vmatprep.subr.bf16.mxu0 %v10257_v30  ;;  %1020 = vmatprep.mubr.f32.mxu1 %v9725_v33  ;;  %v10266_v30 = vld [vmem:[#allocation162_spill] sm:$0xff] }
 0x1b1   : > { %2873 = vmatmul.mubr.f32.gmra.mrb[2].mxu0 %v10258_v18  ;;  %1023 = vmatmul.mubr.f32.gmra.mrb[20].mxu1 %v10259_v2  ;;  %v10268_v2 = vld [vmem:[#allocation163_spill] sm:$0xff] }
 0x1b2   : > { %5269 = vmatpush1.bf16.msra.mxu0 %v10260_v34  ;;  %2880 = vmatprep.mubr.f32.mxu0 %v10261_v5  ;;  %v10269_v34 = vld [vmem:[#allocation46_spill] sm:$0xff] }
 0x1b3   : > { %5271 = vmatprep.subr.bf16.mxu0 %v10262_v61  ;;  %1028 = vmatprep.mubr.f32.mxu1 %v9725_v33  ;;  %v10271_v61 = vld [vmem:[#allocation169_spill] sm:$0xff] }
 0x1b5   : > { %2883 = vmatmul.mubr.f32.gmra.mrb[4].mxu0 %v10263_v6  ;;  %1031 = vmatmul.mubr.f32.gmra.mrb[22].mxu1 %v10264_v15  ;;  %v10273_v15 = vld [vmem:[#allocation172_spill] sm:$0xff] }
 0x1b6   : > { %5273 = vmatpush1.bf16.msra.mxu0 %v10265_v44  ;;  %2890 = vmatprep.mubr.f32.mxu0 %v10266_v30  ;;  %v10274_v44 = vld [vmem:[#allocation48_spill] sm:$0xff] }
 0x1b7   : > { %5275 = vmatprep.subr.bf16.mxu0 %v10267_v4  ;;  %1036 = vmatprep.mubr.f32.mxu1 %v9725_v33  ;;  %v10276_v4 = vld [vmem:[#allocation179_spill] sm:$0xff] }
 0x1b9   : > { %2893 = vmatmul.mubr.f32.gmra.mrb[6].mxu0 %v10268_v2  ;;  %1039 = vmatmul.mubr.f32.gmra.mrb[24].mxu1 %v10269_v34  ;;  %v10278_v34 = vld [vmem:[#allocation180_spill] sm:$0xff] }
 0x1ba   : > { %5277 = vmatpush1.bf16.msra.mxu0 %v10270_v35  ;;  %2900 = vmatprep.mubr.f32.mxu0 %v10271_v61  ;;  %v10279_v35 = vld [vmem:[#allocation50_spill] sm:$0xff] }
 0x1bb   : > { %5279 = vmatprep.subr.bf16.mxu0 %v10272_v56  ;;  %1044 = vmatprep.mubr.f32.mxu1 %v9725_v33  ;;  %v10281_v56 = vld [vmem:[#allocation184_spill] sm:$0xff] }
 0x1bd   : > { %2903 = vmatmul.mubr.f32.gmra.mrb[8].mxu0 %v10273_v15  ;;  %1047 = vmatmul.mubr.f32.gmra.mrb[26].mxu1 %v10274_v44  ;;  %v10283_v44 = vld [vmem:[#allocation185_spill] sm:$0xff] }
 0x1be   : > { %5281 = vmatpush1.bf16.msra.mxu0 %v10275_v42  ;;  %2910 = vmatprep.mubr.f32.mxu0 %v10276_v4  ;;  %v10284_v42 = vld [vmem:[#allocation52_spill] sm:$0xff] }
 0x1bf   : > { %5283 = vmatprep.subr.bf16.mxu0 %v10277_v51  ;;  %1052 = vmatprep.mubr.f32.mxu1 %v9725_v33  ;;  %v10286_v51 = vld [vmem:[#allocation19_spill] sm:$0xff] }
 0x1c1   : > { %2913 = vmatmul.mubr.f32.gmra.mrb[10].mxu0 %v10278_v34  ;;  %1055 = vmatmul.mubr.f32.gmra.mrb[28].mxu1 %v10279_v35  ;;  %v10289_v35 = vld [vmem:[#allocation96_spill] sm:$0xff] }
 0x1c2   : > { %5285 = vmatpush1.bf16.msra.mxu0 %v10280_v11  ;;  %2920 = vmatprep.mubr.f32.mxu0 %v10281_v56  ;;  %v10290_v11 = vld [vmem:[#allocation189_spill] sm:$0xff] }
 0x1c3   : > { %5287 = vmatprep.subr.bf16.mxu0 %v10282_v45  ;;  %1060 = vmatprep.mubr.f32.mxu1 %v9725_v33  ;;  %v10292_v45 = vld [vmem:[#allocation191_spill] sm:$0xff]  ;;  %v10293_v33 = vld [vmem:[#allocation102_spill] sm:$0xff] }
 0x1c5   : > { %2923 = vmatmul.mubr.f32.gmra.mrb[12].mxu0 %v10283_v44  ;;  %1063 = vmatmul.mubr.f32.gmra.mrb[30].mxu1 %v10284_v42  ;;  %v10295_v42 = vld [vmem:[#allocation105_spill] sm:$0xff] }
 0x1c6   : > { %5289 = vmatpush1.bf16.msra.mxu0 %v10285_v32  ;;  %2930 = vmatprep.mubr.f32.mxu0 %v10286_v51  ;;  %v10296_v32 = vld [vmem:[#allocation168_spill] sm:$0xff] }
 0x1c7   : > { %5291 = vmatprep.subr.bf16.mxu0 %v10287_v27  ;;  %v10298_v27 = vld [vmem:[#allocation165_spill] sm:$0xff] }
 0x1c9   : > { %2933 = vmatmul.mubr.f32.gmra.mrb[14].mxu0 %v10288_v25 }
 0x1ca   : > { %5293 = vmatpush1.bf16.msra.mxu0 %v10289_v35  ;;  %2940 = vmatprep.mubr.f32.mxu0 %v10290_v11  ;;  %v10300_v35 = vld [vmem:[#allocation176_spill] sm:$0xff] }
 0x1cb   : > { %5295 = vmatprep.subr.bf16.mxu0 %v10291_v0  ;;  %v10302_v0 = vld [vmem:[#allocation171_spill] sm:$0xff] }
 0x1cd   : > { %2943 = vmatmul.mubr.f32.gmra.mrb[16].mxu0 %v10292_v45 }
 0x1ce   : > { %5297 = vmatpush1.bf16.msra.mxu0 %v10293_v33  ;;  %2950 = vmatprep.mubr.f32.mxu0 %v10294_v38  ;;  %v10304_v33 = vld [vmem:[#allocation178_spill] sm:$0xff] }
 0x1cf   : > { %5299 = vmatprep.subr.bf16.mxu0 %v10295_v42  ;;  %v10306_v42 = vld [vmem:[#allocation118_spill] sm:$0xff] }
 0x1d1   : > { %2953 = vmatmul.mubr.f32.gmra.mrb[18].mxu0 %v10296_v32 }
 0x1d2   : > { %5301 = vmatpush1.bf16.msra.mxu0 %v10297_v24  ;;  %2960 = vmatprep.mubr.f32.mxu0 %v10298_v27  ;;  %v10308_v24 = vld [vmem:[#allocation186_spill] sm:$0xff] }
 0x1d3   : > { %5303 = vmatprep.subr.bf16.mxu0 %v10299_v36  ;;  %v10310_v36 = vld [vmem:[#allocation131_spill] sm:$0xff] }
 0x1d5   : > { %2963 = vmatmul.mubr.f32.gmra.mrb[20].mxu0 %v10300_v35 }
 0x1d6   : > { %5305 = vmatpush1.bf16.msra.mxu0 %v10301_v10  ;;  %2970 = vmatprep.mubr.f32.mxu0 %v10302_v0  ;;  %v10311_v10 = vld [vmem:[#allocation17_spill] sm:$0xff]  ;;  %v10312_v0 = vld [vmem:[#allocation134_spill] sm:$0xff] }
 0x1d7   : > { %5307 = vmatprep.subr.bf16.mxu0 %v10303_v55  ;;  %v10313_v55 = vld [vmem:[#allocation137_spill] sm:$0xff] }
 0x1d9   : > { %2973 = vmatmul.mubr.f32.gmra.mrb[22].mxu0 %v10304_v33 }
 0x1da   : > { %5309 = vmatpush1.bf16.msra.mxu0 %v10305_v41  ;;  %2980 = vmatprep.mubr.f32.mxu0 %v10306_v42  ;;  %v10314_v41 = vld [vmem:[#allocation144_spill] sm:$0xff] }
 0x1db   : > { %5311 = vmatprep.subr.bf16.mxu0 %v10307_v54  ;;  %v10315_v54 = vld [vmem:[#allocation147_spill] sm:$0xff] }
 0x1dd   : > { %2983 = vmatmul.mubr.f32.gmra.mrb[24].mxu0 %v10308_v24 }
 0x1de   : > { %5313 = vmatpush1.bf16.msra.mxu0 %v10309_v16  ;;  %2990 = vmatprep.mubr.f32.mxu0 %v7775_v59  ;;  %v10316_v16 = vand.u32 4294901760, %v10149_v20  ;;  %v10323_v20 = vand.u32 4294901760, %v10157_v26  ;;  %v10333_v26 = vand.u32 4294901760, %v10169_v14  ;;  %v10343_v14 = vld [vmem:[#allocation76_spill] sm:$0xff] }
 0x1df   : > { %5315 = vmatprep.subr.bf16.mxu0 %v10310_v36  ;;  %v10317_v36 = vand.u32 4294901760, %v10150_v23  ;;  %v10327_v23 = vand.u32 4294901760, %v10162_v53  ;;  %v10335_v53 = vld [vmem:[#allocation71_spill] sm:$0xff] }
 0x1e1   : > { %2993 = vmatmul.mubr.f32.gmra.mrb[26].mxu0 %v10311_v10  ;;  %v5326_v59 = vpack.c.bf16 %v10317_v36, %v10316_v16  ;;  %v10324_v16 = vand.u32 4294901760, %v10253_v13  ;;  %v10325_v36 = vand.u32 4294901760, %v10256_v17  ;;  %v10338_v17 = vand.u32 4294901760, %v10266_v30  ;;  %v10341_v13 = vld [vmem:[#allocation74_spill] sm:$0xff] }
 0x1e2   : > { %5317 = vmatpush1.bf16.msra.mxu0 %v10312_v0  ;;  %3000 = vmatprep.mubr.f32.mxu0 %v7826_v21  ;;  %v10318_v0 = vld [vmem:[#allocation152_spill] sm:$0xff]  ;;  %v10319_v21 = vand.u32 4294901760, %v10251_v40  ;;  %v10349_v30 = vand.u32 4294901760, %v10182_v39  ;;  %v10359_v39 = vand.u32 4294901760, %v10190_v58  ;;  %v10367_v58 = vld [vmem:[#allocation93_spill] sm:$0xff] }
 0x1e3   : > { %5319 = vmatprep.subr.bf16.mxu0 %v10313_v55  ;;  %v10320_v55 = vand.u32 4294901760, %v10154_v22 }
 0x1e5   : > { %3003 = vmatmul.mubr.f32.gmra.mrb[28].mxu0 %v7856_v62 }
 0x1e6   : > { %5321 = vmatpush1.bf16.msra.mxu0 %v10314_v41  ;;  %3010 = vmatprep.mubr.f32.mxu0 %v7867_v60  ;;  %v10321_v41 = vand.u32 4294901760, %v10155_v57  ;;  %v10330_v57 = vand.u32 4294901760, %v10258_v18 }
 0x1e7   : > { %5323 = vmatprep.subr.bf16.mxu0 %v10315_v54  ;;  %v10322_v54 = vand.u32 4294901760, %v10156_v29  ;;  %v10332_v29 = vand.u32 4294901760, %v10168_v1  ;;  %v10342_v1 = vand.u32 4294901760, %v10341_v13 }
 0x1e8   : > { %v5328_v62 = vpack.c.bf16 %v10321_v41, %v10320_v55  ;;  %v10328_v41 = vand.u32 4294901760, %v10163_v31  ;;  %v10329_v55 = vand.u32 4294901760, %v10164_v37  ;;  %v10336_v31 = vand.u32 4294901760, %v10335_v53 }
 0x1e9   : > { %3013 = vmatmul.mubr.f32.gmra.mrb[30].mxu0 %v7886_v28  ;;  %v5330_v60 = vpack.c.bf16 %v10323_v20, %v10322_v54  ;;  %v10337_v37 = vand.u32 4294901760, %v10263_v6  ;;  %v10344_v20 = vand.u32 4294901760, %v10343_v14  ;;  %v10348_v6 = vand.u32 4294901760, %v10271_v61 }
 0x1ea   : > { %5325 = vmatpush1.bf16.msra.mxu0 %v10318_v0  ;;  %3150 = vmatprep.mubr.f32.mxu0 %v10319_v21  ;;  %v10326_v21 = vand.u32 4294901760, %v10161_v8  ;;  %v5336_v8 = vpack.c.bf16 %v10333_v26, %v10332_v29  ;;  %v10356_v26 = vand.u32 4294901760, %v10273_v15  ;;  %v10358_v61 = vand.u32 4294901760, %v10189_v48 }
 0x1eb   : > { %5327 = vmatprep.subr.bf16.mxu0 %v5326_v59  ;;  %v5334_v59 = vpack.c.bf16 %v10329_v55, %v10328_v41  ;;  %v10352_v55 = vld [vmem:[#allocation82_spill] sm:$0xff]  ;;  %v10361_v53 = vand.u32 4294901760, %v10192_v19  ;;  %v10363_v15 = vand.u32 4294901760, %v10281_v56  ;;  %v10371_v19 = vand.u32 4294901760, %v10283_v44  ;;  %v10373_v56 = vld [vmem:[#allocation97_spill] sm:$0xff] }
 0x1ec   : > { %v5332_v22 = vpack.c.bf16 %v10327_v23, %v10326_v21  ;;  %v10347_v21 = vand.u32 4294901760, %v10268_v2  ;;  %v10350_v23 = vld [vmem:[#allocation80_spill] sm:$0xff]  ;;  %v10357_v2 = vand.u32 4294901760, %v10276_v4  ;;  %v10364_v4 = vand.u32 4294901760, %v10196_v9 }
 0x1ed   : > { %3154 = vmatmul.mubr.f32.vlgmr.msra.gmra.mrb[0].mxu0 %v10324_v16  ;;  %v10345_v16 = vld [vmem:[#allocation77_spill] sm:$0xff]  ;;  %v10382_v44 = vand.u32 4294901760, %v10290_v11  ;;  %v10391_v11 = vand.u32 4294901760, %v10221_v49  ;;  %v10399_v49 = vand.u32 4294901760, %v10067_v50  ;;  %v10410_v50 = vld [vmem:[#allocation124_spill] sm:$0xff] }
 0x1ee   : > { %5329 = vmatpush1.bf16.msra.mxu0 %v5328_v62  ;;  %3162 = vmatprep.mubr.f32.mxu0 %v10325_v36  ;;  %v10331_v62 = vand.u32 4294901760, %v10261_v5  ;;  %v10339_v5 = vld [vmem:[#allocation73_spill] sm:$0xff] }
 0x1ef   : > { %5331 = vmatprep.subr.bf16.mxu0 %v5330_v60  ;;  %v10334_v60 = vand.u32 4294901760, %v10170_v46  ;;  %v10340_v40 = vand.u32 4294901760, %v10339_v5  ;;  %v10346_v46 = vand.u32 4294901760, %v10345_v16  ;;  %v10368_v5 = vand.u32 4294901760, %v10367_v58 }
 0x1f1   : > { %3166 = vmatmul.mubr.f32.gmra.mrb[2].mxu0 %v10330_v57  ;;  %v5338_v54 = vpack.c.bf16 %v10336_v31, %v10334_v60  ;;  %v5340_v18 = vpack.c.bf16 %v10342_v1, %v10340_v40  ;;  %v5342_v36 = vpack.c.bf16 %v10346_v46, %v10344_v20  ;;  %v10354_v57 = vld [vmem:[#allocation83_spill] sm:$0xff]  ;;  %v10360_v60 = vand.u32 4294901760, %v10191_v43  ;;  %v10377_v20 = vld [vmem:[#allocation100_spill] sm:$0xff]  ;;  %v10379_v46 = vld [vmem:[#allocation101_spill] sm:$0xff] }
 0x1f2   : > { %5333 = vmatpush1.bf16.msra.mxu0 %v5332_v22  ;;  %3174 = vmatprep.mubr.f32.mxu0 %v10331_v62  ;;  %v10351_v22 = vand.u32 4294901760, %v10350_v23  ;;  %v10355_v62 = vand.u32 4294901760, %v10354_v57  ;;  %v10369_v40 = vld [vmem:[#allocation95_spill] sm:$0xff]  ;;  %v10374_v1 = vand.u32 4294901760, %v10373_v56  ;;  %v10378_v16 = vand.u32 4294901760, %v10377_v20  ;;  %v10420_v56 = vld [vmem:[#allocation132_spill] sm:$0xff] }
 0x1f3   : > { %5335 = vmatprep.subr.bf16.mxu0 %v5334_v59  ;;  %v10353_v59 = vand.u32 4294901760, %v10352_v55  ;;  %v5350_v31 = vpack.c.bf16 %v10361_v53, %v10360_v60  ;;  %v10370_v43 = vand.u32 4294901760, %v10369_v40  ;;  %v10387_v55 = vld [vmem:[#allocation107_spill] sm:$0xff]  ;;  %v10424_v20 = vand.u32 4294901760, %v10308_v24  ;;  %v10436_v24 = vld [vmem:[#allocation196_spill] sm:$0xff] }
 0x1f4   : > { %v5344_v41 = vpack.c.bf16 %v10351_v22, %v10349_v30  ;;  %v10384_v30 = vld [vmem:[#allocation104_spill] sm:$0xff]  ;;  %v10401_v60 = vld [vmem:[#allocation119_spill] sm:$0xff] }
 0x1f5   : > { %3178 = vmatmul.mubr.f32.gmra.mrb[4].mxu0 %v10337_v37  ;;  %v5346_v29 = vpack.c.bf16 %v10355_v62, %v10353_v59  ;;  %v10365_v37 = vld [vmem:[#allocation92_spill] sm:$0xff]  ;;  %v5354_v13 = vpack.c.bf16 %v10370_v43, %v10368_v5  ;;  %v10385_v23 = vand.u32 4294901760, %v10384_v30  ;;  %v10388_v59 = vand.u32 4294901760, %v10387_v55  ;;  %v10416_v40 = vld [vmem:[#allocation127_spill] sm:$0xff] }
 0x1f6   : > { %5337 = vmatpush1.bf16.msra.mxu0 %v5336_v8  ;;  %3186 = vmatprep.mubr.f32.mxu0 %v10338_v17  ;;  %v5348_v8 = vpack.c.bf16 %v10359_v39, %v10358_v61  ;;  %v10366_v48 = vand.u32 4294901760, %v10365_v37  ;;  %v10389_v62 = vand.u32 4294901760, %v10292_v45  ;;  %v10396_v39 = vand.u32 4294901760, %v10296_v32  ;;  %v10404_v32 = vld [vmem:[#allocation171_spill] sm:$0xff] }
 0x1f7   : > { %5339 = vmatprep.subr.bf16.mxu0 %v5338_v54  ;;  %v10362_v54 = vand.u32 4294901760, %v10278_v34  ;;  %v10372_v34 = vand.u32 4294901760, %v10286_v51  ;;  %v10383_v51 = vand.u32 4294901760, %v10212_v12  ;;  %v10392_v12 = vand.u32 4294901760, %v10220_v47  ;;  %v10433_v30 = vld [vmem:[#allocation143_spill] sm:$0xff] }
 0x1f8   : > { %v5352_v17 = vpack.c.bf16 %v10366_v48, %v10364_v4  ;;  %v10397_v45 = vand.u32 4294901760, %v10298_v27  ;;  %v10400_v47 = vand.u32 4294901760, %v10074_v3  ;;  %v10406_v27 = vld [vmem:[#allocation121_spill] sm:$0xff]  ;;  %v10408_v4 = vld [vmem:[#allocation122_spill] sm:$0xff]  ;;  %v10411_v48 = vand.u32 4294901760, %v10410_v50 }
 0x1f9   : > { %3190 = vmatmul.mubr.f32.gmra.mrb[6].mxu0 %v10347_v21  ;;  %v5360_v22 = vpack.c.bf16 %v10385_v23, %v10383_v51  ;;  %v10414_v5 = vand.u32 4294901760, %v10304_v33  ;;  %v10417_v43 = vand.u32 4294901760, %v10416_v40  ;;  %v10425_v33 = vld [vmem:[#allocation194_spill] sm:$0xff]  ;;  %v10434_v23 = vand.u32 4294901760, %v10433_v30  ;;  %v10472_v40 = vld [vmem:[#allocation75_spill] sm:$0xff]  ;;  %v10492_v30 = vld [vmem:[#allocation105_spill] sm:$0xff] }
 0x1fa   : > { %5341 = vmatpush1.bf16.msra.mxu0 %v5340_v18  ;;  %3198 = vmatprep.mubr.f32.mxu0 %v10348_v6  ;;  %v10375_v18 = vld [vmem:[#allocation98_spill] sm:$0xff]  ;;  %v10381_v6 = vand.u32 4294901760, %v10288_v25  ;;  %v10390_v25 = vand.u32 4294901760, %v10294_v38  ;;  %v10398_v38 = vand.u32 4294901760, %v10228_v52  ;;  %v10409_v52 = vand.u32 4294901760, %v10408_v4 }
 0x1fb   : > { %5343 = vmatprep.subr.bf16.mxu0 %v5342_v36  ;;  %v10376_v9 = vand.u32 4294901760, %v10375_v18  ;;  %v10380_v36 = vand.u32 4294901760, %v10379_v46  ;;  %v10422_v18 = vld [vmem:[#allocation133_spill] sm:$0xff]  ;;  %v10437_v55 = vand.u32 4294901760, %v10436_v24  ;;  %v10461_v4 = vld [vmem:[#allocation142_spill] sm:$0xff]  ;;  %v10496_v24 = vld [vmem:[#allocation111_spill] sm:$0xff] }
 0x1fc   : > { %v10465_v50 = vld [vmem:[#allocation154_spill] sm:$0xff] }
 0x1fd   : > { %3202 = vmatmul.mubr.f32.gmra.mrb[8].mxu0 %v10356_v26  ;;  %v5356_v14 = vpack.c.bf16 %v10376_v9, %v10374_v1  ;;  %v5358_v21 = vpack.c.bf16 %v10380_v36, %v10378_v16  ;;  %v10393_v26 = vand.u32 4294901760, %v10224_v7  ;;  %v10402_v7 = vand.u32 4294901760, %v10401_v60  ;;  %v10429_v36 = vld [vmem:[#allocation136_spill] sm:$0xff] }
 0x1fe   : > { %5345 = vmatpush1.bf16.msra.mxu0 %v5344_v41  ;;  %3210 = vmatprep.mubr.f32.mxu0 %v10357_v2  ;;  %v10386_v41 = vand.u32 4294901760, %v10216_v63  ;;  %v10394_v2 = vld [vmem:[#allocation113_spill] sm:$0xff]  ;;  %v10421_v1 = vand.u32 4294901760, %v10420_v56  ;;  %v10423_v9 = vand.u32 4294901760, %v10422_v18  ;;  %v10426_v16 = vand.u32 4294901760, %v10425_v33  ;;  %v10477_v56 = vld [vmem:[#allocation174_spill] sm:$0xff] }
 0x1ff   : > { %5347 = vmatprep.subr.bf16.mxu0 %v5346_v29  ;;  %v5364_v29 = vpack.c.bf16 %v10392_v12, %v10391_v11  ;;  %v10395_v63 = vand.u32 4294901760, %v10394_v2  ;;  %v5370_v53 = vpack.c.bf16 %v10402_v7, %v10400_v47  ;;  %v10442_v12 = vld [vmem:[#allocation150_spill] sm:$0xff]  ;;  %v10454_v7 = vand.u32 4294901760, %v7886_v28  ;;  %v10464_v28 = vld [vmem:[#allocation64_spill] sm:$0xff]  ;;  %v10479_v18 = vld [vmem:[#allocation181_spill] sm:$0xff] }
 0x200   : > { %v5362_v57 = vpack.c.bf16 %v10388_v59, %v10386_v41  ;;  %v10435_v41 = vand.u32 4294901760, %v10311_v10  ;;  %v10438_v59 = vld [vmem:[#allocation145_spill] sm:$0xff]  ;;  %v10483_v33 = vld [vmem:[#allocation187_spill] sm:$0xff] }
 0x201   : > { %3214 = vmatmul.mubr.f32.gmra.mrb[10].mxu0 %v10362_v54  ;;  %v5366_v61 = vpack.c.bf16 %v10395_v63, %v10393_v26  ;;  %v10405_v54 = vand.u32 4294901760, %v10404_v32  ;;  %v10444_v26 = vld [vmem:[#allocation151_spill] sm:$0xff]  ;;  %v10448_v10 = vld [vmem:[#allocation25_spill] sm:$0xff] }
 0x202   : > { %5349 = vmatpush1.bf16.msra.mxu0 %v5348_v8  ;;  %3222 = vmatprep.mubr.f32.mxu0 %v10363_v15  ;;  %v5368_v8 = vpack.c.bf16 %v10399_v49, %v10398_v38  ;;  %v10407_v15 = vand.u32 4294901760, %v10406_v27  ;;  %v10445_v2 = vand.u32 4294901760, %v10444_v26  ;;  %v10450_v38 = vld [vmem:[#allocation155_spill] sm:$0xff]  ;;  %v10457_v32 = vld [vmem:[#allocation129_spill] sm:$0xff]  ;;  %v10459_v27 = vld [vmem:[#allocation140_spill] sm:$0xff] }
 0x203   : > { %5351 = vmatprep.subr.bf16.mxu0 %v5350_v31  ;;  %v10403_v31 = vand.u32 4294901760, %v10300_v35  ;;  %v10415_v35 = vand.u32 4294901760, %v10306_v42  ;;  %v10427_v42 = vld [vmem:[#allocation135_spill] sm:$0xff]  ;;  %v10451_v49 = vand.u32 4294901760, %v10450_v38 }
 0x204   : > { %v5372_v37 = vpack.c.bf16 %v10409_v52, %v10407_v15  ;;  %v10428_v46 = vand.u32 4294901760, %v10427_v42  ;;  %v10460_v15 = vld [vmem:[#allocation57_spill] sm:$0xff]  ;;  %v10462_v52 = vld [vmem:[#allocation60_spill] sm:$0xff]  ;;  %v10509_v38 = vld [vmem:[#allocation15_spill] sm:$0xff] }
 0x205   : > { %3226 = vmatmul.mubr.f32.gmra.mrb[12].mxu0 %v10371_v19  ;;  %v10485_v42 = vld [vmem:[#allocation188_spill] sm:$0xff] }
 0x206   : > { %5353 = vmatpush1.bf16.msra.mxu0 %v5352_v17  ;;  %3234 = vmatprep.mubr.f32.mxu0 %v10372_v34  ;;  %v10412_v17 = vld [vmem:[#allocation125_spill] sm:$0xff] }
 0x207   : > { %5355 = vmatprep.subr.bf16.mxu0 %v5354_v13  ;;  %v10413_v3 = vand.u32 4294901760, %v10412_v17  ;;  %v10418_v13 = vld [vmem:[#allocation130_spill] sm:$0xff]  ;;  %v10467_v17 = vld [vmem:[#allocation160_spill] sm:$0xff] }
 0x208   : > { %v10419_v19 = vand.u32 4294901760, %v10418_v13  ;;  %v10474_v13 = vld [vmem:[#allocation78_spill] sm:$0xff] }
 0x209   : > { %3238 = vmatmul.mubr.f32.gmra.mrb[14].mxu0 %v10381_v6  ;;  %v5374_v58 = vpack.c.bf16 %v10413_v3, %v10411_v48  ;;  %v10466_v48 = vld [vmem:[#allocation66_spill] sm:$0xff] }
 0x20a   : > { %5357 = vmatpush1.bf16.msra.mxu0 %v5356_v14  ;;  %3246 = vmatprep.mubr.f32.mxu0 %v10382_v44  ;;  %v5376_v34 = vpack.c.bf16 %v10419_v19, %v10417_v43  ;;  %v5378_v14 = vpack.c.bf16 %v10423_v9, %v10421_v1  ;;  %v10431_v44 = vld [vmem:[#allocation141_spill] sm:$0xff]  ;;  %v10468_v3 = vld [vmem:[#allocation70_spill] sm:$0xff]  ;;  %v10473_v43 = vld [vmem:[#allocation167_spill] sm:$0xff] }
 0x20b   : > { %5359 = vmatprep.subr.bf16.mxu0 %v5358_v21  ;;  %v10430_v21 = vand.u32 4294901760, %v10429_v36  ;;  %v10432_v51 = vand.u32 4294901760, %v10431_v44  ;;  %v10475_v19 = vld [vmem:[#allocation173_spill] sm:$0xff]  ;;  %v10478_v1 = vld [vmem:[#allocation84_spill] sm:$0xff]  ;;  %v10487_v36 = vld [vmem:[#allocation23_spill] sm:$0xff] }
 0x20c   : > { %v10480_v9 = vld [vmem:[#allocation88_spill] sm:$0xff]  ;;  %v10490_v44 = vld [vmem:[#allocation102_spill] sm:$0xff] }
 0x20d   : > { %3250 = vmatmul.mubr.f32.gmra.mrb[16].mxu0 %v10389_v62  ;;  %v5380_v6 = vpack.c.bf16 %v10430_v21, %v10428_v46  ;;  %v10440_v62 = vld [vmem:[#allocation146_spill] sm:$0xff]  ;;  %v10486_v46 = vld [vmem:[#allocation96_spill] sm:$0xff]  ;;  %v10488_v21 = vld [vmem:[#allocation99_spill] sm:$0xff] }
 0x20e   : > { %5361 = vmatpush1.bf16.msra.mxu0 %v5360_v22  ;;  %3258 = vmatprep.mubr.f32.mxu0 %v10390_v25  ;;  %v5382_v22 = vpack.c.bf16 %v10434_v23, %v10432_v51  ;;  %v10441_v25 = vand.u32 4294901760, %v10440_v62  ;;  %v10491_v51 = vld [vmem:[#allocation190_spill] sm:$0xff]  ;;  %v10493_v23 = vld [vmem:[#allocation192_spill] sm:$0xff]  ;;  %v10500_v62 = vld [vmem:[#allocation117_spill] sm:$0xff] }
 0x20f   : > { %5363 = vmatprep.subr.bf16.mxu0 %v5362_v57  ;;  %v10439_v57 = vand.u32 4294901760, %v10438_v59  ;;  %v10498_v59 = vld [vmem:[#allocation114_spill] sm:$0xff] }
 0x211   : > { %3262 = vmatmul.mubr.f32.gmra.mrb[18].mxu0 %v10396_v39  ;;  %v5384_v11 = vpack.c.bf16 %v10441_v25, %v10439_v57  ;;  %v10499_v57 = vld [vmem:[#allocation170_spill] sm:$0xff]  ;;  %v10501_v25 = vld [vmem:[#allocation177_spill] sm:$0xff] }
 0x212   : > { %5365 = vmatpush1.bf16.msra.mxu0 %v5364_v29  ;;  %3270 = vmatprep.mubr.f32.mxu0 %v10397_v45  ;;  %v10443_v29 = vand.u32 4294901760, %v10442_v12  ;;  %v10449_v45 = vand.u32 4294901760, %v10448_v10  ;;  %v10503_v12 = vld [vmem:[#allocation116_spill] sm:$0xff]  ;;  %v10508_v10 = vld [vmem:[#allocation131_spill] sm:$0xff] }
 0x213   : > { %5367 = vmatprep.subr.bf16.mxu0 %v5366_v61  ;;  %v10446_v61 = vld [vmem:[#allocation198_spill] sm:$0xff] }
 0x214   : > { %v5386_v63 = vpack.c.bf16 %v10445_v2, %v10443_v29  ;;  %v10447_v39 = vand.u32 4294901760, %v10446_v61  ;;  %v10504_v29 = vld [vmem:[#allocation123_spill] sm:$0xff]  ;;  %v10506_v61 = vld [vmem:[#allocation126_spill] sm:$0xff] }
 0x215   : > { %3274 = vmatmul.mubr.f32.gmra.mrb[20].mxu0 %v10403_v31  ;;  %v10456_v31 = vld [vmem:[#allocation53_spill] sm:$0xff]  ;;  %v10505_v2 = vld [vmem:[#allocation183_spill] sm:$0xff] }
 0x216   : > { %5369 = vmatpush1.bf16.msra.mxu0 %v5368_v8  ;;  %3282 = vmatprep.mubr.f32.mxu0 %v10405_v54  ;;  %v10452_v8 = vld [vmem:[#allocation156_spill] sm:$0xff]  ;;  %v10458_v54 = vld [vmem:[#allocation54_spill] sm:$0xff] }
 0x217   : > { %5371 = vmatprep.subr.bf16.mxu0 %v5370_v53  ;;  %v10453_v47 = vand.u32 4294901760, %v10452_v8  ;;  %v10455_v53 = vld [vmem:[#allocation128_spill] sm:$0xff]  ;;  %v10510_v8 = vld [vmem:[#allocation134_spill] sm:$0xff] }
 0x219   : > { %3286 = vmatmul.mubr.f32.gmra.mrb[22].mxu0 %v10414_v5  ;;  %v5388_v60 = vpack.c.bf16 %v10453_v47, %v10451_v49  ;;  %v10470_v5 = vld [vmem:[#allocation72_spill] sm:$0xff]  ;;  %v10511_v47 = vld [vmem:[#allocation195_spill] sm:$0xff] }
 0x21a   : > { %5373 = vmatpush1.bf16.msra.mxu0 %v5372_v37  ;;  %3294 = vmatprep.mubr.f32.mxu0 %v10415_v35  ;;  %v10463_v37 = vld [vmem:[#allocation153_spill] sm:$0xff]  ;;  %v10471_v35 = vld [vmem:[#allocation166_spill] sm:$0xff] }
 0x21b   : > { %5375 = vmatprep.subr.bf16.mxu0 %v5374_v58  ;;  %v10469_v58 = vld [vmem:[#allocation161_spill] sm:$0xff] }
 0x21d   : > { %3298 = vmatmul.mubr.f32.gmra.mrb[24].mxu0 %v10424_v20  ;;  %v10482_v20 = vld [vmem:[#allocation90_spill] sm:$0xff] }
 0x21e   : > { %5377 = vmatpush1.bf16.msra.mxu0 %v5376_v34  ;;  %3306 = vmatprep.mubr.f32.mxu0 %v10426_v16  ;;  %v10476_v34 = vld [vmem:[#allocation81_spill] sm:$0xff]  ;;  %v10484_v16 = vld [vmem:[#allocation94_spill] sm:$0xff] }
 0x21f   : > { %5379 = vmatprep.subr.bf16.mxu0 %v5378_v14  ;;  %v10481_v14 = vld [vmem:[#allocation182_spill] sm:$0xff] }
 0x221   : > { %3310 = vmatmul.mubr.f32.gmra.mrb[26].mxu0 %v10435_v41  ;;  %v10495_v41 = vld [vmem:[#allocation164_spill] sm:$0xff] }
 0x222   : > { %5381 = vmatpush1.bf16.msra.mxu0 %v5380_v6  ;;  %3318 = vmatprep.mubr.f32.mxu0 %v10437_v55  ;;  %v10489_v6 = vld [vmem:[#allocation51_spill] sm:$0xff] }
 0x223   : > { %5383 = vmatprep.subr.bf16.mxu0 %v5382_v22  ;;  %v10494_v22 = vld [vmem:[#allocation108_spill] sm:$0xff]  ;;  %v10497_v55 = vld [vmem:[#allocation175_spill] sm:$0xff] }
 0x225   : > { %3322 = vmatmul.mubr.f32.gmra.mrb[28].mxu0 %v10447_v39  ;;  %v10507_v39 = vld [vmem:[#allocation193_spill] sm:$0xff] }
 0x226   : > { %5385 = vmatpush1.bf16.msra.mxu0 %v5384_v11  ;;  %3330 = vmatprep.mubr.f32.mxu0 %v10449_v45  ;;  %v10502_v11 = vld [vmem:[#allocation120_spill] sm:$0xff] }
 0x227   : > { %5387 = vmatprep.subr.bf16.mxu0 %v5386_v63 }
 0x229   : > { %3334 = vmatmul.mubr.f32.gmra.mrb[30].mxu0 %v10454_v7 }
 0x22a   : > { %5389 = vmatpush1.bf16.msra.mxu0 %v5388_v60  ;;  %3597 = vmatprep.mubr.f32.mxu0 %v10455_v53  ;;  %v10512_v60 = vld [vmem:[#allocation137_spill] sm:$0xff] }
 0x22b   : > { %5391 = vmatprep.subr.bf16.mxu0 %v10456_v31  ;;  %v10513_v31 = vld [vmem:[#allocation197_spill] sm:$0xff] }
 0x22d   : > { %3599 = vmatmul.mubr.f32.vlgmr.msra.gmra.mrb[0].mxu0 %v10457_v32 }
 0x22e   : > { %5393 = vmatpush1.bf16.msra.mxu0 %v10458_v54  ;;  %3605 = vmatprep.mubr.f32.mxu0 %v10459_v27 }
 0x22f   : > { %5395 = vmatprep.subr.bf16.mxu0 %v10460_v15  ;;  %v10514_v15 = vld [vmem:[#allocation144_spill] sm:$0xff] }
 0x231   : > { %3607 = vmatmul.mubr.f32.gmra.mrb[2].mxu0 %v10461_v4 }
 0x232   : > { %5397 = vmatpush1.bf16.msra.mxu0 %v10462_v52  ;;  %3613 = vmatprep.mubr.f32.mxu0 %v10463_v37  ;;  %v10515_v52 = vld [vmem:[#allocation18_spill] sm:$0xff] }
 0x233   : > { %5399 = vmatprep.subr.bf16.mxu0 %v10464_v28  ;;  %v10516_v28 = vld [vmem:[#allocation147_spill] sm:$0xff] }
 0x235   : > { %3615 = vmatmul.mubr.f32.gmra.mrb[4].mxu0 %v10465_v50 }
 0x236   : > { %5401 = vmatpush1.bf16.msra.mxu0 %v10466_v48  ;;  %3621 = vmatprep.mubr.f32.mxu0 %v10467_v17 }
 0x237   : > { %5403 = vmatprep.subr.bf16.mxu0 %v10468_v3  ;;  %v10517_v3 = vld [vmem:[#allocation199_spill] sm:$0xff] }
 0x239   : > { %3623 = vmatmul.mubr.f32.gmra.mrb[6].mxu0 %v10469_v58 }
 0x23a   : > { %5405 = vmatpush1.bf16.msra.mxu0 %v10470_v5  ;;  %3629 = vmatprep.mubr.f32.mxu0 %v10471_v35 }
 0x23b   : > { %5407 = vmatprep.subr.bf16.mxu0 %v10472_v40 }
 0x23d   : > { %3631 = vmatmul.mubr.f32.gmra.mrb[8].mxu0 %v10473_v43 }
 0x23e   : > { %5409 = vmatpush1.bf16.msra.mxu0 %v10474_v13  ;;  %3637 = vmatprep.mubr.f32.mxu0 %v10475_v19 }
 0x23f   : > { %5411 = vmatprep.subr.bf16.mxu0 %v10476_v34 }
 0x241   : > { %3639 = vmatmul.mubr.f32.gmra.mrb[10].mxu0 %v10477_v56 }
 0x242   : > { %5413 = vmatpush1.bf16.msra.mxu0 %v10478_v1  ;;  %3645 = vmatprep.mubr.f32.mxu0 %v10479_v18 }
 0x243   : > { %5415 = vmatprep.subr.bf16.mxu0 %v10480_v9 }
 0x245   : > { %3647 = vmatmul.mubr.f32.gmra.mrb[12].mxu0 %v10481_v14 }
 0x246   : > { %5417 = vmatpush1.bf16.msra.mxu0 %v10482_v20  ;;  %3653 = vmatprep.mubr.f32.mxu0 %v10483_v33 }
 0x247   : > { %5419 = vmatprep.subr.bf16.mxu0 %v10484_v16 }
 0x249   : > { %3655 = vmatmul.mubr.f32.gmra.mrb[14].mxu0 %v10485_v42 }
 0x24a   : > { %5421 = vmatpush1.bf16.msra.mxu0 %v10486_v46  ;;  %3661 = vmatprep.mubr.f32.mxu0 %v10487_v36  ;;  %v4015_v46 = vld [vmem:[%s9165_s5 + $0x8] sm:$0xff] }
 0x24b   : > { %5423 = vmatprep.subr.bf16.mxu0 %v10488_v21 }
 0x24d   : > { %3663 = vmatmul.mubr.f32.gmra.mrb[16].mxu0 %v10489_v6 }
 0x24e   : > { %5425 = vmatpush1.bf16.msra.mxu0 %v10490_v44  ;;  %3669 = vmatprep.mubr.f32.mxu0 %v10491_v51 }
 0x24f   : > { %5427 = vmatprep.subr.bf16.mxu0 %v10492_v30  ;;  %v335_v30 = vlaneseq }
 0x251   : > { %3671 = vmatmul.mubr.f32.gmra.mrb[18].mxu0 %v10493_v23 }
 0x252   : > { %5429 = vmatpush1.bf16.msra.mxu0 %v10494_v22  ;;  %3677 = vmatprep.mubr.f32.mxu0 %v10495_v41 }
 0x253   : > { %5431 = vmatprep.subr.bf16.mxu0 %v10496_v24  ;;  %v333_v24 = vld [vmem:[%s9164_s4] sm:$0x3] }
 0x255   : > { %3679 = vmatmul.mubr.f32.gmra.mrb[20].mxu0 %v10497_v55 }
 0x256   : > { %5433 = vmatpush1.bf16.msra.mxu0 %v10498_v59  ;;  %3685 = vmatprep.mubr.f32.mxu0 %v10499_v57 }
 0x257   : > { %5435 = vmatprep.subr.bf16.mxu0 %v10500_v62 }
 0x259   : > { %3687 = vmatmul.mubr.f32.gmra.mrb[22].mxu0 %v10501_v25 }
 0x25a   : > { %5437 = vmatpush1.bf16.msra.mxu0 %v10502_v11  ;;  %3693 = vmatprep.mubr.f32.mxu0 %v10503_v12 }
 0x25b   : > { %5439 = vmatprep.subr.bf16.mxu0 %v10504_v29 }
 0x25c   : > { %v8399_v26 = vpop.f32.mrb[0].mxu1 }
 0x25d   : > { %3695 = vmatmul.mubr.f32.gmra.mrb[24].mxu0 %v10505_v2  ;;  %v8402_v63 = vpop.f32.mrb[1].mxu1 }
 0x25e   : > { %5441 = vmatpush1.bf16.msra.mxu0 %v10506_v61  ;;  %3701 = vmatprep.mubr.f32.mxu0 %v10507_v39 }
 0x25f   : > { %5443 = vmatprep.subr.bf16.mxu0 %v10508_v10 }
 0x260   : > { %v8407_v45 = vpop.f32.mrb[2].mxu1 }
 0x261   : > { %3703 = vmatmul.mubr.f32.gmra.mrb[26].mxu0 %v10509_v38  ;;  %v8410_v49 = vpop.f32.mrb[3].mxu1 }
 0x262   : > { %5445 = vmatpush1.bf16.msra.mxu0 %v10510_v8  ;;  %3709 = vmatprep.mubr.f32.mxu0 %v10511_v47 }
 0x263   : > { %5447 = vmatprep.subr.bf16.mxu0 %v10512_v60 }
 0x264   : > { %v8415_v7 = vpop.f32.mrb[4].mxu1 }
 0x265   : > { %3711 = vmatmul.mubr.f32.gmra.mrb[28].mxu0 %v10513_v31  ;;  %v8418_v54 = vpop.f32.mrb[5].mxu1 }
 0x266   : > { %5449 = vmatpush1.bf16.msra.mxu0 %v10514_v15  ;;  %3717 = vmatprep.mubr.f32.mxu0 %v10515_v52 }
 0x267   : > { %5451 = vmatprep.subr.bf16.mxu0 %v10516_v28 }
 0x268   : > { %v8423_v48 = vpop.f32.mrb[6].mxu1 }
 0x269   : > { %3719 = vmatmul.mubr.f32.gmra.mrb[30].mxu0 %v10517_v3  ;;  %v8426_v5 = vpop.f32.mrb[7].mxu1 }
 0x26a   : > { %5453 = vmatpush1.bf16.msra.mxu0 %v10318_v0  ;;  %3854 = vmatprep.mubr.f32.mxu0 %v10455_v53 }
 0x26c   : > { %v8430_v40 = vpop.f32.mrb[8].mxu1 }
 0x26d   : > { %3856 = vmatmul.mubr.f32.vlgmr.msra.gmra.mrb[0].mxu0 %v10457_v32  ;;  %v8433_v13 = vpop.f32.mrb[9].mxu1 }
 0x26e   : > { %3862 = vmatprep.mubr.f32.mxu0 %v10459_v27 }
 0x270   : > { %v8436_v34 = vpop.f32.mrb[10].mxu1 }
 0x271   : > { %3864 = vmatmul.mubr.f32.gmra.mrb[2].mxu0 %v10461_v4  ;;  %v8439_v1 = vpop.f32.mrb[11].mxu1 }
 0x272   : > { %3870 = vmatprep.mubr.f32.mxu0 %v10463_v37 }
 0x274   : > { %v8442_v9 = vpop.f32.mrb[12].mxu1 }
 0x275   : > { %3872 = vmatmul.mubr.f32.gmra.mrb[4].mxu0 %v10465_v50  ;;  %v8445_v0 = vpop.f32.mrb[13].mxu1 }
 0x276   : > { %3878 = vmatprep.mubr.f32.mxu0 %v10467_v17 }
 0x278   : > { %v8448_v53 = vpop.f32.mrb[14].mxu1 }
 0x279   : > { %3880 = vmatmul.mubr.f32.gmra.mrb[6].mxu0 %v10469_v58  ;;  %v8451_v32 = vpop.f32.mrb[15].mxu1 }
 0x27a   : > { %3886 = vmatprep.mubr.f32.mxu0 %v10471_v35 }
 0x27c   : > { %v8454_v27 = vpop.f32.mrb[16].mxu1 }
 0x27d   : > { %3888 = vmatmul.mubr.f32.gmra.mrb[8].mxu0 %v10473_v43  ;;  %v8457_v4 = vpop.f32.mrb[17].mxu1 }
 0x27e   : > { %3894 = vmatprep.mubr.f32.mxu0 %v10475_v19 }
 0x280   : > { %v8460_v37 = vpop.f32.mrb[18].mxu1 }
 0x281   : > { %3896 = vmatmul.mubr.f32.gmra.mrb[10].mxu0 %v10477_v56  ;;  %v8463_v50 = vpop.f32.mrb[19].mxu1 }
 0x282   : > { %3902 = vmatprep.mubr.f32.mxu0 %v10479_v18 }
 0x284   : > { %v8466_v17 = vpop.f32.mrb[20].mxu1 }
 0x285   : > { %3904 = vmatmul.mubr.f32.gmra.mrb[12].mxu0 %v10481_v14  ;;  %v8469_v58 = vpop.f32.mrb[21].mxu1 }
 0x286   : > { %3910 = vmatprep.mubr.f32.mxu0 %v10483_v33 }
 0x288   : > { %v8472_v35 = vpop.f32.mrb[22].mxu1 }
 0x289   : > { %3912 = vmatmul.mubr.f32.gmra.mrb[14].mxu0 %v10485_v42  ;;  %v8475_v43 = vpop.f32.mrb[23].mxu1 }
 0x28a   : > { %3918 = vmatprep.mubr.f32.mxu0 %v10487_v36  ;;  %v8512_v36 = vand.u32 4294901760, %v4015_v46 }
 0x28c   : > { %v8478_v19 = vpop.f32.mrb[24].mxu1  ;;  %10518 = vst [vmem:[#allocation26_spill] sm:$0xff] %v8512_v36  ;;  %v8515_v21 = vsub.f32 %v4015_v46, %v8512_v36 }
 0x28d   : > { %3920 = vmatmul.mubr.f32.gmra.mrb[16].mxu0 %v10489_v6  ;;  %v8481_v56 = vpop.f32.mrb[25].mxu1 }
 0x28e   : > { %3926 = vmatprep.mubr.f32.mxu0 %v10491_v51  ;;  %10519 = vst [vmem:[#allocation29_spill] sm:$0xff] %v8515_v21  ;;  %v9596_v6 = vand.u32 4294901760, %v8515_v21 }
 0x290   : > { %v8484_v18 = vpop.f32.mrb[26].mxu1  ;;  %v4115_v44 = vsub.f32 %v8515_v21, %v9596_v6 }
 0x291   : > { %3928 = vmatmul.mubr.f32.gmra.mrb[18].mxu0 %v10493_v23  ;;  %v8487_v14 = vpop.f32.mrb[27].mxu1  ;;  %v336_v23 = vshrl.u32 %v335_v30, 7 }
 0x292   : > { %3934 = vmatprep.mubr.f32.mxu0 %v10495_v41  ;;  %v4116_v51 = vand.u32 4294901760, %v4115_v44 }
 0x293   : > { %v337_v22 = vsub.s32 0, %v336_v23  ;;  %v341_v41 = vsub.s32 1, %v336_v23 }
 0x294   : > { %v8490_v20 = vpop.f32.mrb[28].mxu1  ;;  %4117 = vmatprep.mubr.f32.mxu1 %v4116_v51 }
 0x295   : > { %3936 = vmatmul.mubr.f32.gmra.mrb[20].mxu0 %v10497_v55  ;;  %v8493_v33 = vpop.f32.mrb[29].mxu1  ;;  %v4014_v55 = vld [vmem:[%s9165_s5] sm:$0xff]  ;;  %v338_v59 = vrot.slane %v333_v24, %v337_v22 }
 0x296   : > { %3942 = vmatprep.mubr.f32.mxu0 %v10499_v57  ;;  %v342_v57 = vrot.slane %v333_v24, %v341_v41  ;;  %v8527_v62 = vand.u32 4294901760, %v4014_v55 }
 0x297   : > { %v8539_v10 = vadd.f32 %v8423_v48, %v338_v59  ;;  %v8557_v8 = vadd.f32 %v8442_v9, %v338_v59  ;;  %v8588_v9 = vadd.f32 %v8472_v35, %v338_v59 }
 0x298   : > { %v8496_v16 = vpop.f32.mrb[30].mxu1  ;;  %10520 = vst [vmem:[#allocation11_spill] sm:$0xff] %v8527_v62  ;;  %v5648_v11 = vadd.f32 %v8402_v63, %v342_v57  ;;  %v5652_v29 = vadd.f32 %v8410_v49, %v342_v57  ;;  %v8535_v61 = vsub.f32 %v4014_v55, %v8527_v62  ;;  %v8548_v63 = vadd.f32 %v8433_v13, %v342_v57 }
 0x299   : > { %3944 = vmatmul.mubr.f32.gmra.mrb[22].mxu0 %v10501_v25  ;;  %v8499_v42 = vpop.f32.mrb[31].mxu1  ;;  %v5646_v25 = vadd.f32 %v8399_v26, %v338_v59  ;;  %v8545_v26 = vadd.f32 %v8430_v40, %v338_v59  ;;  %v8554_v49 = vadd.f32 %v8439_v1, %v342_v57  ;;  %v8560_v60 = vadd.f32 %v8445_v0, %v342_v57 }
 0x29a   : > { %3950 = vmatprep.mubr.f32.mxu0 %v10503_v12  ;;  %v5650_v12 = vadd.f32 %v8407_v45, %v338_v59  ;;  %10521 = vst [vmem:[#allocation12_spill] sm:$0xff] %v8535_v61  ;;  %v8551_v45 = vadd.f32 %v8436_v34, %v338_v59  ;;  %v8572_v28 = vadd.f32 %v8457_v4, %v342_v57 }
 0x29b   : > { %v8579_v40 = vadd.f32 %v8463_v50, %v342_v57  ;;  %v8582_v13 = vadd.f32 %v8466_v17, %v338_v59  ;;  %v8585_v1 = vadd.f32 %v8469_v58, %v342_v57  ;;  %v8591_v0 = vadd.f32 %v8475_v43, %v342_v57 }
 0x29c   : > { %v8597_v4 = vadd.f32 %v8481_v56, %v342_v57  ;;  %v8600_v58 = vadd.f32 %v8484_v18, %v338_v59  ;;  %v8608_v44 = vadd.f32 %v8487_v14, %v342_v57  ;;  %v8616_v30 = vadd.f32 %v8493_v33, %v342_v57 }
 0x29d   : > { %3952 = vmatmul.mubr.f32.gmra.mrb[24].mxu0 %v10505_v2  ;;  %v5654_v2 = vadd.f32 %v8415_v7, %v338_v59  ;;  %v8563_v7 = vadd.f32 %v8448_v53, %v338_v59  ;;  %v8619_v18 = vadd.f32 %v8496_v16, %v338_v59  ;;  %v8624_v24 = vadd.f32 %v8499_v42, %v342_v57 }
 0x29e   : > { %3958 = vmatprep.mubr.f32.mxu0 %v10507_v39  ;;  %v5656_v39 = vadd.f32 %v8418_v54, %v342_v57 }
 0x2a1   : > { %3960 = vmatmul.mubr.f32.gmra.mrb[26].mxu0 %v10509_v38  ;;  %v8542_v38 = vadd.f32 %v8426_v5, %v342_v57  ;;  %v8576_v5 = vadd.f32 %v8460_v37, %v338_v59 }
 0x2a2   : > { %3966 = vmatprep.mubr.f32.mxu0 %v10511_v47 }
 0x2a5   : > { %3968 = vmatmul.mubr.f32.gmra.mrb[28].mxu0 %v10513_v31  ;;  %v8566_v31 = vadd.f32 %v8451_v32, %v342_v57 }
 0x2a6   : > { %3974 = vmatprep.mubr.f32.mxu0 %v10515_v52  ;;  %v8569_v52 = vadd.f32 %v8454_v27, %v338_v59  ;;  %v8594_v27 = vadd.f32 %v8478_v19, %v338_v59  ;;  %v8611_v19 = vadd.f32 %v8490_v20, %v338_v59 }
 0x2a9   : > { %3976 = vmatmul.mubr.f32.gmra.mrb[30].mxu0 %v10517_v3  ;;  %v9595_v3 = vand.u32 4294901760, %v8535_v61 }
 0x2ab   : > { %v8605_v43 = vsub.f32 %v8535_v61, %v9595_v3 }
 0x340   : > { %v3857_v47 = vpop.f32.mrb[0].mxu0 }
 0x341   : > { %v5647_v54 = vadd.f32 %v5646_v25, %v3857_v47  ;;  %v3859_v15 = vpop.f32.mrb[1].mxu0 }
 0x342   : > { %v5649_v48 = vadd.f32 %v5648_v11, %v3859_v15 }
 0x343   : > { %v3982_v34 = vmax.f32 %v5647_v54, 0.0 }
 0x344   : > { %v3983_v53 = vmax.f32 %v5649_v48, 0.0  ;;  %v3865_v32 = vpop.f32.mrb[2].mxu0 }
 0x345   : > { %v4018_v37 = vand.u32 4294901760, %v3982_v34  ;;  %v5651_v50 = vadd.f32 %v5650_v12, %v3865_v32  ;;  %v3867_v17 = vpop.f32.mrb[3].mxu0 }
 0x346   : > { %v4016_v46 = vand.u32 4294901760, %v3983_v53  ;;  %v5653_v35 = vadd.f32 %v5652_v29, %v3867_v17 }
 0x347   : > { %v8613_v56 = vsub.f32 %v3982_v34, %v4018_v37  ;;  %v3984_v51 = vmax.f32 %v5651_v50, 0.0 }
 0x348   : > { %v8621_v23 = vsub.f32 %v3983_v53, %v4016_v46  ;;  %v3985_v22 = vmax.f32 %v5653_v35, 0.0  ;;  %v3873_v41 = vpop.f32.mrb[4].mxu0 }
 0x349   : > { %v9598_v14 = vand.u32 4294901760, %v8613_v56  ;;  %v4022_v20 = vand.u32 4294901760, %v3984_v51  ;;  %v5655_v55 = vadd.f32 %v5654_v2, %v3873_v41  ;;  %v3875_v25 = vpop.f32.mrb[5].mxu0 }
 0x34a   : > { %10522 = vst [vmem:[#allocation31_spill] sm:$0xff] %v8621_v23  ;;  %v9604_v11 = vand.u32 4294901760, %v8621_v23  ;;  %v4020_v12 = vand.u32 4294901760, %v3985_v22  ;;  %v5657_v33 = vadd.f32 %v5656_v39, %v3875_v25 }
 0x34b   : > { %v4137_v16 = vsub.f32 %v8613_v56, %v9598_v14  ;;  %v8632_v59 = vpack.c.bf16 %v4022_v20, %v4018_v37  ;;  %v8634_v47 = vsub.f32 %v3984_v51, %v4022_v20  ;;  %v3986_v42 = vmax.f32 %v5655_v55, 0.0 }
 0x34c   : > { %v8636_v57 = vsub.f32 %v3985_v22, %v4020_v12  ;;  %v3987_v54 = vmax.f32 %v5657_v33, 0.0  ;;  %v3881_v2 = vpop.f32.mrb[6].mxu0  ;;  %v8638_v15 = vpack.c.bf16 %v4020_v12, %v4016_v46  ;;  %v4131_v39 = vsub.f32 %v8621_v23, %v9604_v11 }
 0x34d   : > { %10523 = vst [vmem:[#allocation13_spill] sm:$0xff] %v8632_v59  ;;  %v4138_v48 = vand.u32 4294901760, %v4137_v16  ;;  %v9597_v34 = vand.u32 4294901760, %v8634_v47  ;;  %v4026_v53 = vand.u32 4294901760, %v3986_v42  ;;  %v5659_v32 = vadd.f32 %v8539_v10, %v3881_v2  ;;  %v3883_v37 = vpop.f32.mrb[7].mxu0 }
 0x34e   : > { %10524 = vst [vmem:[#allocation14_spill] sm:$0xff] %v8638_v15  ;;  %v9603_v50 = vand.u32 4294901760, %v8636_v57  ;;  %v4024_v17 = vand.u32 4294901760, %v3987_v54  ;;  %v5661_v35 = vadd.f32 %v8542_v38, %v3883_v37  ;;  %5455 = vmatprep.subr.bf16.mxu1 %v8638_v15  ;;  %v4132_v46 = vand.u32 4294901760, %v4131_v39 }
 0x34f   : > { %v4149_v51 = vsub.f32 %v8634_v47, %v9597_v34  ;;  %v8651_v22 = vsub.f32 %v3986_v42, %v4026_v53  ;;  %v3988_v41 = vmax.f32 %v5659_v32, 0.0  ;;  %5457 = vmatpush1.bf16.xpose.msra.mxu1 %v8632_v59 }
 0x350   : > { %v8656_v20 = vsub.f32 %v3987_v54, %v4024_v17  ;;  %v3989_v55 = vmax.f32 %v5661_v35, 0.0  ;;  %v3889_v25 = vpop.f32.mrb[8].mxu0  ;;  %v4143_v38 = vsub.f32 %v8636_v57, %v9603_v50 }
 0x351   : > { %v4150_v33 = vand.u32 4294901760, %v4149_v51  ;;  %v9599_v16 = vand.u32 4294901760, %v8651_v22  ;;  %v4030_v42 = vand.u32 4294901760, %v3988_v41  ;;  %v5663_v2 = vadd.f32 %v8545_v26, %v3889_v25  ;;  %v3891_v39 = vpop.f32.mrb[9].mxu0 }
 0x352   : > { %v9602_v32 = vand.u32 4294901760, %v8656_v20  ;;  %v4028_v54 = vand.u32 4294901760, %v3989_v55  ;;  %v5665_v37 = vadd.f32 %v8548_v63, %v3891_v39  ;;  %v4144_v35 = vand.u32 4294901760, %v4143_v38 }
 0x353   : > { %v4161_v3 = vsub.f32 %v8651_v22, %v9599_v16  ;;  %v8670_v6 = vpack.c.bf16 %v4030_v42, %v4026_v53  ;;  %v8672_v12 = vsub.f32 %v3988_v41, %v4030_v42  ;;  %v3990_v51 = vmax.f32 %v5663_v2, 0.0 }
 0x354   : > { %v8674_v10 = vsub.f32 %v3989_v55, %v4028_v54  ;;  %v3991_v29 = vmax.f32 %v5665_v37, 0.0  ;;  %v3897_v26 = vpop.f32.mrb[10].mxu0  ;;  %v8676_v25 = vpack.c.bf16 %v4028_v54, %v4024_v17  ;;  %v8678_v34 = vpack.c.bf16 %v4144_v35, %v4132_v46 }
 0x355   : > { %10525 = vst [vmem:[#allocation35_spill] sm:$0xff] %v8670_v6  ;;  %v4162_v14 = vand.u32 4294901760, %v4161_v3  ;;  %v9600_v63 = vand.u32 4294901760, %v8672_v12  ;;  %v4034_v38 = vand.u32 4294901760, %v3990_v51  ;;  %v5667_v39 = vadd.f32 %v8551_v45, %v3897_v26  ;;  %v3899_v16 = vpop.f32.mrb[11].mxu0 }
 0x356   : > { %10526 = vst [vmem:[#allocation32_spill] sm:$0xff] %v8676_v25  ;;  %v9601_v53 = vand.u32 4294901760, %v8674_v10  ;;  %v4032_v41 = vand.u32 4294901760, %v3991_v29  ;;  %v5669_v42 = vadd.f32 %v8554_v49, %v3899_v16  ;;  %5459 = vmatprep.subr.bf16.mxu1 %v8676_v25  ;;  %v8685_v55 = vpack.c.bf16 %v4150_v33, %v4138_v48 }
 0x357   : > { %v4173_v17 = vsub.f32 %v8672_v12, %v9600_v63  ;;  %v8690_v3 = vsub.f32 %v3990_v51, %v4034_v38  ;;  %v3992_v46 = vmax.f32 %v5667_v39, 0.0  ;;  %5461 = vmatpush1.bf16.xpose.msra.mxu1 %v8670_v6  ;;  %v4155_v45 = vsub.f32 %v8656_v20, %v9602_v32 }
 0x358   : > { %v8696_v2 = vsub.f32 %v3991_v29, %v4032_v41  ;;  %v3993_v49 = vmax.f32 %v5669_v42, 0.0  ;;  %v3905_v16 = vpop.f32.mrb[12].mxu0  ;;  %v4167_v48 = vsub.f32 %v8674_v10, %v9601_v53 }
 0x359   : > { %v4174_v54 = vand.u32 4294901760, %v4173_v17  ;;  %v9609_v37 = vand.u32 4294901760, %v8690_v3  ;;  %v4038_v35 = vand.u32 4294901760, %v3992_v46  ;;  %v5671_v51 = vadd.f32 %v8557_v8, %v3905_v16  ;;  %v3907_v26 = vpop.f32.mrb[13].mxu0 }
 0x35a   : > { %v4036_v29 = vand.u32 4294901760, %v3993_v49  ;;  %v5673_v42 = vadd.f32 %v8560_v60, %v3907_v26  ;;  %v4156_v63 = vand.u32 4294901760, %v4155_v45  ;;  %v4168_v39 = vand.u32 4294901760, %v4167_v48 }
 0x35b   : > { %v4185_v53 = vsub.f32 %v8690_v3, %v9609_v37  ;;  %v8710_v32 = vpack.c.bf16 %v4038_v35, %v4034_v38  ;;  %v8712_v33 = vsub.f32 %v3992_v46, %v4038_v35  ;;  %v3994_v17 = vmax.f32 %v5671_v51, 0.0 }
 0x35c   : > { %v8714_v50 = vsub.f32 %v3993_v49, %v4036_v29  ;;  %v3995_v11 = vmax.f32 %v5673_v42, 0.0  ;;  %v3913_v8 = vpop.f32.mrb[14].mxu0  ;;  %v8716_v16 = vpack.c.bf16 %v4036_v29, %v4032_v41  ;;  %v8723_v49 = vpack.c.bf16 %v4168_v39, %v4156_v63 }
 0x35d   : > { %10527 = vst [vmem:[#allocation33_spill] sm:$0xff] %v8710_v32  ;;  %v4186_v6 = vand.u32 4294901760, %v4185_v53  ;;  %v9610_v60 = vand.u32 4294901760, %v8712_v33  ;;  %v4042_v45 = vand.u32 4294901760, %v3994_v17  ;;  %v5675_v26 = vadd.f32 %v8563_v7, %v3913_v8  ;;  %v3915_v25 = vpop.f32.mrb[15].mxu0 }
 0x35e   : > { %10528 = vst [vmem:[#allocation20_spill] sm:$0xff] %v8716_v16  ;;  %v9611_v38 = vand.u32 4294901760, %v8714_v50  ;;  %v4040_v37 = vand.u32 4294901760, %v3995_v11  ;;  %v5677_v46 = vadd.f32 %v8566_v31, %v3915_v25  ;;  %5463 = vmatprep.subr.bf16.mxu1 %v8716_v16  ;;  %10529 = vst [vmem:[#allocation37_spill] sm:$0xff] %v8723_v49  ;;  %v8731_v7 = vpack.c.bf16 %v4174_v54, %v4162_v14 }
 0x35f   : > { %v4197_v41 = vsub.f32 %v8712_v33, %v9610_v60  ;;  %v8728_v53 = vsub.f32 %v3994_v17, %v4042_v45  ;;  %v3996_v48 = vmax.f32 %v5675_v26, 0.0  ;;  %5465 = vmatpush1.bf16.xpose.msra.mxu1 %v8710_v32  ;;  %v10531_v31 = vand.u32 4294901760, %v8696_v2 }
 0x360   : > { %10530 = vst [vmem:[#allocation55_spill] sm:$0xff] %v8731_v7  ;;  %v8733_v35 = vsub.f32 %v3995_v11, %v4040_v37  ;;  %v3997_v51 = vmax.f32 %v5677_v46, 0.0  ;;  %v3921_v29 = vpop.f32.mrb[16].mxu0  ;;  %v4191_v63 = vsub.f32 %v8714_v50, %v9611_v38  ;;  %v10557_v7 = vand.u32 4294901760, %v8613_v56 }
 0x361   : > { %v4179_v25 = vsub.f32 %v8696_v2, %v10531_v31  ;;  %v4198_v39 = vand.u32 4294901760, %v4197_v41  ;;  %v9620_v42 = vand.u32 4294901760, %v8728_v53  ;;  %v4046_v17 = vand.u32 4294901760, %v3996_v48  ;;  %v3923_v14 = vpop.f32.mrb[17].mxu0 }
 0x362   : > { %v5679_v8 = vadd.f32 %v8569_v52, %v3921_v29  ;;  %v4044_v54 = vand.u32 4294901760, %v3997_v51  ;;  %v5681_v26 = vadd.f32 %v8572_v28, %v3923_v14  ;;  %v4192_v11 = vand.u32 4294901760, %v4191_v63 }
 0x363   : > { %v4180_v46 = vand.u32 4294901760, %v4179_v25  ;;  %v4209_v31 = vsub.f32 %v8728_v53, %v9620_v42  ;;  %v8748_v60 = vpack.c.bf16 %v4046_v17, %v4042_v45  ;;  %v8750_v38 = vsub.f32 %v3996_v48, %v4046_v17 }
 0x364   : > { %v3998_v41 = vmax.f32 %v5679_v8, 0.0  ;;  %v8752_v32 = vsub.f32 %v3997_v51, %v4044_v54  ;;  %v3999_v16 = vmax.f32 %v5681_v26, 0.0  ;;  %v3929_v52 = vpop.f32.mrb[18].mxu0  ;;  %v8754_v29 = vpack.c.bf16 %v4044_v54, %v4040_v37 }
 0x365   : > { %10532 = vst [vmem:[#allocation56_spill] sm:$0xff] %v8748_v60  ;;  %v4210_v59 = vand.u32 4294901760, %v4209_v31  ;;  %v9621_v28 = vand.u32 4294901760, %v8750_v38  ;;  %v5683_v14 = vadd.f32 %v8576_v5, %v3929_v52  ;;  %v3931_v61 = vpop.f32.mrb[19].mxu0  ;;  %v8761_v51 = vpack.c.bf16 %v4192_v11, %v4180_v46 }
 0x366   : > { %10533 = vst [vmem:[#allocation58_spill] sm:$0xff] %v8754_v29  ;;  %v4050_v25 = vand.u32 4294901760, %v3998_v41  ;;  %v9622_v45 = vand.u32 4294901760, %v8752_v32  ;;  %v4048_v42 = vand.u32 4294901760, %v3999_v16  ;;  %v5685_v48 = vadd.f32 %v8579_v40, %v3931_v61  ;;  %5467 = vmatprep.subr.bf16.mxu1 %v8754_v29 }
 0x367   : > { %10534 = vst [vmem:[#allocation59_spill] sm:$0xff] %v8761_v51  ;;  %v4221_v37 = vsub.f32 %v8750_v38, %v9621_v28  ;;  %v4000_v17 = vmax.f32 %v5683_v14, 0.0  ;;  %5469 = vmatpush1.bf16.xpose.msra.mxu1 %v8748_v60  ;;  %v8769_v5 = vpack.c.bf16 %v4198_v39, %v4186_v6  ;;  %v10536_v61 = vand.u32 4294901760, %v8733_v35 }
 0x368   : > { %v8766_v63 = vsub.f32 %v3998_v41, %v4050_v25  ;;  %v8771_v8 = vsub.f32 %v3999_v16, %v4048_v42  ;;  %v4001_v54 = vmax.f32 %v5685_v48, 0.0  ;;  %v3937_v26 = vpop.f32.mrb[20].mxu0  ;;  %v4215_v11 = vsub.f32 %v8752_v32, %v9622_v45 }
 0x369   : > { %10535 = vst [vmem:[#allocation39_spill] sm:$0xff] %v8769_v5  ;;  %v4203_v40 = vsub.f32 %v8733_v35, %v10536_v61  ;;  %v4222_v46 = vand.u32 4294901760, %v4221_v37  ;;  %v4054_v41 = vand.u32 4294901760, %v4000_v17  ;;  %v5687_v52 = vadd.f32 %v8582_v13, %v3937_v26  ;;  %v3939_v6 = vpop.f32.mrb[21].mxu0 }
 0x36a   : > { %v9631_v31 = vand.u32 4294901760, %v8766_v63  ;;  %v4052_v39 = vand.u32 4294901760, %v4001_v54  ;;  %v5689_v14 = vadd.f32 %v8585_v1, %v3939_v6  ;;  %v4216_v16 = vand.u32 4294901760, %v4215_v11 }
 0x36b   : > { %v4204_v48 = vand.u32 4294901760, %v4203_v40  ;;  %v8786_v28 = vpack.c.bf16 %v4054_v41, %v4050_v25  ;;  %v8788_v45 = vsub.f32 %v4000_v17, %v4054_v41  ;;  %v4002_v37 = vmax.f32 %v5687_v52, 0.0 }
 0x36c   : > { %v4233_v61 = vsub.f32 %v8766_v63, %v9631_v31  ;;  %v8790_v60 = vsub.f32 %v4001_v54, %v4052_v39  ;;  %v4003_v29 = vmax.f32 %v5689_v14, 0.0  ;;  %v3945_v13 = vpop.f32.mrb[22].mxu0  ;;  %v8792_v26 = vpack.c.bf16 %v4052_v39, %v4048_v42 }
 0x36d   : > { %10537 = vst [vmem:[#allocation61_spill] sm:$0xff] %v8786_v28  ;;  %v9632_v1 = vand.u32 4294901760, %v8788_v45  ;;  %v4058_v40 = vand.u32 4294901760, %v4002_v37  ;;  %v5691_v6 = vadd.f32 %v8588_v9, %v3945_v13  ;;  %v3947_v21 = vpop.f32.mrb[23].mxu0  ;;  %v8799_v54 = vpack.c.bf16 %v4216_v16, %v4204_v48 }
 0x36e   : > { %10538 = vst [vmem:[#allocation62_spill] sm:$0xff] %v8792_v26  ;;  %v4234_v15 = vand.u32 4294901760, %v4233_v61  ;;  %v9633_v25 = vand.u32 4294901760, %v8790_v60  ;;  %v4056_v31 = vand.u32 4294901760, %v4003_v29  ;;  %v5693_v17 = vadd.f32 %v8591_v0, %v3947_v21  ;;  %5471 = vmatprep.subr.bf16.mxu1 %v8792_v26 }
 0x36f   : > { %10539 = vst [vmem:[#allocation63_spill] sm:$0xff] %v8799_v54  ;;  %v4245_v42 = vsub.f32 %v8788_v45, %v9632_v1  ;;  %v8804_v11 = vsub.f32 %v4002_v37, %v4058_v40  ;;  %v4004_v41 = vmax.f32 %v5691_v6, 0.0  ;;  %5473 = vmatpush1.bf16.xpose.msra.mxu1 %v8786_v28  ;;  %v8807_v9 = vpack.c.bf16 %v4222_v46, %v4210_v59 }
 0x370   : > { %v8809_v52 = vsub.f32 %v4003_v29, %v4056_v31  ;;  %v4005_v39 = vmax.f32 %v5693_v17, 0.0  ;;  %v3953_v14 = vpop.f32.mrb[24].mxu0  ;;  %v10541_v21 = vand.u32 4294901760, %v8771_v8  ;;  %v4239_v16 = vsub.f32 %v8790_v60, %v9633_v25 }
 0x371   : > { %10540 = vst [vmem:[#allocation65_spill] sm:$0xff] %v8807_v9  ;;  %v4246_v48 = vand.u32 4294901760, %v4245_v42  ;;  %v9640_v61 = vand.u32 4294901760, %v8804_v11  ;;  %v4062_v37 = vand.u32 4294901760, %v4004_v41  ;;  %v5695_v13 = vadd.f32 %v8594_v27, %v3953_v14  ;;  %v3955_v59 = vpop.f32.mrb[25].mxu0 }
 0x372   : > { %v4227_v0 = vsub.f32 %v8771_v8, %v10541_v21  ;;  %v4060_v46 = vand.u32 4294901760, %v4005_v39  ;;  %v5697_v6 = vadd.f32 %v8597_v4, %v3955_v59  ;;  %v4240_v29 = vand.u32 4294901760, %v4239_v16 }
 0x373   : > { %v4257_v21 = vsub.f32 %v8804_v11, %v9640_v61  ;;  %v8824_v1 = vpack.c.bf16 %v4062_v37, %v4058_v40  ;;  %v8826_v25 = vsub.f32 %v4004_v41, %v4062_v37  ;;  %v4006_v42 = vmax.f32 %v5695_v13, 0.0 }
 0x374   : > { %v4228_v17 = vand.u32 4294901760, %v4227_v0  ;;  %v8828_v28 = vsub.f32 %v4005_v39, %v4060_v46  ;;  %v4007_v26 = vmax.f32 %v5697_v6, 0.0  ;;  %v3961_v27 = vpop.f32.mrb[26].mxu0  ;;  %v8830_v14 = vpack.c.bf16 %v4060_v46, %v4056_v31 }
 0x375   : > { %10542 = vst [vmem:[#allocation41_spill] sm:$0xff] %v8824_v1  ;;  %v4258_v62 = vand.u32 4294901760, %v4257_v21  ;;  %v9641_v4 = vand.u32 4294901760, %v8826_v25  ;;  %v4066_v0 = vand.u32 4294901760, %v4006_v42  ;;  %v5699_v59 = vadd.f32 %v8600_v58, %v3961_v27  ;;  %v3963_v9 = vpop.f32.mrb[27].mxu0 }
 0x376   : > { %10543 = vst [vmem:[#allocation67_spill] sm:$0xff] %v8830_v14  ;;  %v9642_v40 = vand.u32 4294901760, %v8828_v28  ;;  %v4064_v61 = vand.u32 4294901760, %v4007_v26  ;;  %v5701_v41 = vadd.f32 %v8608_v44, %v3963_v9  ;;  %5475 = vmatprep.subr.bf16.mxu1 %v8830_v14  ;;  %v8837_v39 = vpack.c.bf16 %v4240_v29, %v4228_v17 }
 0x377   : > { %v4269_v31 = vsub.f32 %v8826_v25, %v9641_v4  ;;  %v8842_v16 = vsub.f32 %v4006_v42, %v4066_v0  ;;  %v4008_v37 = vmax.f32 %v5699_v59, 0.0  ;;  %5477 = vmatpush1.bf16.xpose.msra.mxu1 %v8824_v1  ;;  %v8845_v58 = vpack.c.bf16 %v4246_v48, %v4234_v15 }
 0x378   : > { %10544 = vst [vmem:[#allocation68_spill] sm:$0xff] %v8837_v39  ;;  %v8847_v13 = vsub.f32 %v4007_v26, %v4064_v61  ;;  %v4009_v46 = vmax.f32 %v5701_v41, 0.0  ;;  %v3969_v6 = vpop.f32.mrb[28].mxu0  ;;  %v10546_v44 = vand.u32 4294901760, %v8809_v52  ;;  %v4263_v29 = vsub.f32 %v8828_v28, %v9642_v40 }
 0x379   : > { %10545 = vst [vmem:[#allocation69_spill] sm:$0xff] %v8845_v58  ;;  %v4270_v17 = vand.u32 4294901760, %v4269_v31  ;;  %v9647_v21 = vand.u32 4294901760, %v8842_v16  ;;  %v4070_v42 = vand.u32 4294901760, %v4008_v37  ;;  %v5703_v27 = vadd.f32 %v8611_v19, %v3969_v6  ;;  %v3971_v15 = vpop.f32.mrb[29].mxu0 }
 0x37a   : > { %v4251_v9 = vsub.f32 %v8809_v52, %v10546_v44  ;;  %v4068_v48 = vand.u32 4294901760, %v4009_v46  ;;  %v5705_v59 = vadd.f32 %v8616_v30, %v3971_v15  ;;  %v4264_v26 = vand.u32 4294901760, %v4263_v29 }
 0x37b   : > { %v4281_v44 = vsub.f32 %v8842_v16, %v9647_v21  ;;  %v8862_v4 = vpack.c.bf16 %v4070_v42, %v4066_v0  ;;  %v8864_v40 = vsub.f32 %v4008_v37, %v4070_v42  ;;  %v4010_v31 = vmax.f32 %v5703_v27, 0.0 }
 0x37c   : > { %v4252_v41 = vand.u32 4294901760, %v4251_v9  ;;  %v8866_v1 = vsub.f32 %v4009_v46, %v4068_v48  ;;  %v4011_v14 = vmax.f32 %v5705_v59, 0.0  ;;  %v3977_v19 = vpop.f32.mrb[30].mxu0  ;;  %v8868_v6 = vpack.c.bf16 %v4068_v48, %v4064_v61 }
 0x37d   : > { %10547 = vst [vmem:[#allocation43_spill] sm:$0xff] %v8862_v4  ;;  %v4282_v58 = vand.u32 4294901760, %v4281_v44  ;;  %v9648_v30 = vand.u32 4294901760, %v8864_v40  ;;  %v4074_v9 = vand.u32 4294901760, %v4010_v31  ;;  %v5707_v15 = vadd.f32 %v8619_v18, %v3977_v19  ;;  %v3979_v39 = vpop.f32.mrb[31].mxu0 }
 0x37e   : > { %10548 = vst [vmem:[#allocation45_spill] sm:$0xff] %v8868_v6  ;;  %v9649_v0 = vand.u32 4294901760, %v8866_v1  ;;  %v4072_v21 = vand.u32 4294901760, %v4011_v14  ;;  %v5709_v37 = vadd.f32 %v8624_v24, %v3979_v39  ;;  %5479 = vmatprep.subr.bf16.mxu1 %v8868_v6  ;;  %v8875_v46 = vpack.c.bf16 %v4264_v26, %v4252_v41 }
 0x37f   : > { %v4293_v61 = vsub.f32 %v8864_v40, %v9648_v30  ;;  %v8880_v29 = vsub.f32 %v4010_v31, %v4074_v9  ;;  %v4012_v42 = vmax.f32 %v5707_v15, 0.0  ;;  %5481 = vmatpush1.bf16.xpose.msra.mxu1 %v8862_v4  ;;  %v8883_v18 = vpack.c.bf16 %v4270_v17, %v4258_v62 }
 0x380   : > { %10549 = vst [vmem:[#allocation79_spill] sm:$0xff] %v8875_v46  ;;  %v8885_v27 = vsub.f32 %v4011_v14, %v4072_v21  ;;  %v4013_v48 = vmax.f32 %v5709_v37, 0.0  ;;  %v10551_v24 = vand.u32 4294901760, %v8847_v13  ;;  %v4287_v26 = vsub.f32 %v8866_v1, %v9649_v0 }
 0x381   : > { %10550 = vst [vmem:[#allocation47_spill] sm:$0xff] %v8883_v18  ;;  %v4294_v59 = vand.u32 4294901760, %v4293_v61  ;;  %v4304_v41 = vand.u32 4294901760, %v8880_v29  ;;  %v4078_v44 = vand.u32 4294901760, %v4012_v42  ;;  %v10555_v54 = vand.u32 4294901760, %v8636_v57 }
 0x382   : > { %v4275_v39 = vsub.f32 %v8847_v13, %v10551_v24  ;;  %v4298_v62 = vand.u32 4294901760, %v8885_v27  ;;  %v4076_v14 = vand.u32 4294901760, %v4013_v48  ;;  %v4288_v19 = vand.u32 4294901760, %v4287_v26 }
 0x383   : > { %v4305_v15 = vsub.f32 %v8880_v29, %v4304_v41  ;;  %v8898_v37 = vpack.c.bf16 %v4078_v44, %v4074_v9  ;;  %v8900_v24 = vsub.f32 %v4012_v42, %v4078_v44  ;;  %v5512_v30 = vpack.c.bf16 %v4294_v59, %v4282_v58 }
 0x384   : > { %v4276_v17 = vand.u32 4294901760, %v4275_v39  ;;  %v8902_v0 = vsub.f32 %v4013_v48, %v4076_v14  ;;  %v8904_v61 = vpack.c.bf16 %v4076_v14, %v4072_v21  ;;  %v4299_v6 = vsub.f32 %v8885_v27, %v4298_v62 }
 0x385   : > { %10552 = vst [vmem:[#allocation85_spill] sm:$0xff] %v8898_v37  ;;  %v4306_v31 = vand.u32 4294901760, %v4305_v15  ;;  %v4316_v18 = vand.u32 4294901760, %v8900_v24  ;;  %v5526_v39 = vpack.c.bf16 %v8714_v50, %v8696_v2  ;;  %v5528_v9 = vpack.c.bf16 %v8712_v33, %v8690_v3 }
 0x386   : > { %10553 = vst [vmem:[#allocation86_spill] sm:$0xff] %v8904_v61  ;;  %v5510_v4 = vpack.c.bf16 %v4288_v19, %v4276_v17  ;;  %v4310_v42 = vand.u32 4294901760, %v8902_v0  ;;  %5483 = vmatprep.subr.bf16.mxu1 %v8904_v61  ;;  %v4300_v58 = vand.u32 4294901760, %v4299_v6  ;;  %v5530_v21 = vpack.c.bf16 %v8752_v32, %v8733_v35 }
 0x387   : > { %v5532_v48 = vpack.c.bf16 %v8750_v38, %v8728_v53  ;;  %v4317_v26 = vsub.f32 %v8900_v24, %v4316_v18  ;;  %5485 = vmatpush1.bf16.xpose.msra.mxu1 %v8898_v37  ;;  %v5534_v59 = vpack.c.bf16 %v8790_v60, %v8771_v8  ;;  %v5536_v44 = vpack.c.bf16 %v8788_v45, %v8766_v63 }
 0x388   : > { %v5538_v14 = vpack.c.bf16 %v8828_v28, %v8809_v52  ;;  %5487 = vmatprep.subr.bf16.mxu1 %v8678_v34  ;;  %v4311_v6 = vsub.f32 %v8902_v0, %v4310_v42  ;;  %v5540_v17 = vpack.c.bf16 %v8826_v25, %v8804_v11  ;;  %v5542_v19 = vpack.c.bf16 %v8866_v1, %v8847_v13 }
 0x389   : > { %v5544_v15 = vpack.c.bf16 %v8864_v40, %v8842_v16  ;;  %v4318_v37 = vand.u32 4294901760, %v4317_v26  ;;  %v5546_v61 = vpack.c.bf16 %v8902_v0, %v8885_v27  ;;  %v5548_v46 = vpack.c.bf16 %v8900_v24, %v8880_v29 }
 0x38a   : > { %v10554_v34 = vand.u32 4294901760, %v8621_v23  ;;  %v4312_v51 = vand.u32 4294901760, %v4311_v6  ;;  %v10558_v49 = vand.u32 4294901760, %v8634_v47  ;;  %v10560_v26 = vand.u32 4294901760, %v8656_v20 }
 0x38b   : > { %v10561_v0 = vand.u32 4294901760, %v8674_v10  ;;  %v10563_v29 = vand.u32 4294901760, %v8651_v22  ;;  %v10564_v24 = vand.u32 4294901760, %v8672_v12  ;;  %v10565_v6 = vand.u32 4294901760, %v8696_v2 }
 0x38c   : > { %v8942_v5 = vpack.c.bf16 %v10555_v54, %v10554_v34  ;;  %v8948_v36 = vpack.c.bf16 %v10558_v49, %v10557_v7  ;;  %v5516_v54 = vpack.c.bf16 %v4318_v37, %v4306_v31  ;;  %v10566_v34 = vand.u32 4294901760, %v8714_v50 }
 0x38d   : > { %v8954_v27 = vpack.c.bf16 %v10561_v0, %v10560_v26  ;;  %v8960_v23 = vpack.c.bf16 %v10564_v24, %v10563_v29  ;;  %v10567_v49 = vand.u32 4294901760, %v8690_v3  ;;  %v10568_v7 = vand.u32 4294901760, %v8712_v33 }
 0x38e   : > { %10556 = vst [vmem:[#allocation87_spill] sm:$0xff] %v8942_v5  ;;  %10559 = vst [vmem:[#allocation89_spill] sm:$0xff] %v8948_v36  ;;  %v8966_v5 = vpack.c.bf16 %v10566_v34, %v10565_v6  ;;  %v10569_v26 = vand.u32 4294901760, %v8733_v35  ;;  %v10570_v0 = vand.u32 4294901760, %v8752_v32  ;;  %v5514_v29 = vpack.c.bf16 %v4312_v51, %v4300_v58 }
 0x38f   : > { %10562 = vst [vmem:[#allocation49_spill] sm:$0xff] %v8954_v27  ;;  %v8972_v36 = vpack.c.bf16 %v10568_v7, %v10567_v49  ;;  %v10571_v31 = vand.u32 4294901760, %v8728_v53  ;;  %v10572_v2 = vand.u32 4294901760, %v8750_v38  ;;  %v10573_v37 = vand.u32 4294901760, %v8771_v8  ;;  %v10588_v7 = vld [vmem:[#allocation55_spill] sm:$0xff] }
 0x390   : > { %v8978_v27 = vpack.c.bf16 %v10570_v0, %v10569_v26  ;;  %v10574_v3 = vand.u32 4294901760, %v8790_v60  ;;  %v10575_v24 = vand.u32 4294901760, %v8766_v63  ;;  %v10576_v35 = vand.u32 4294901760, %v8788_v45  ;;  %v10591_v26 = vld [vmem:[#allocation63_spill] sm:$0xff] }
 0x391   : > { %v8984_v50 = vpack.c.bf16 %v10572_v2, %v10571_v31  ;;  %v10577_v51 = vand.u32 4294901760, %v8809_v52  ;;  %v10578_v53 = vand.u32 4294901760, %v8828_v28  ;;  %v10579_v38 = vand.u32 4294901760, %v8804_v11  ;;  %v10599_v31 = vld [vmem:[#allocation11_spill] sm:$0xff] }
 0x392   : > { %v8990_v33 = vpack.c.bf16 %v10574_v3, %v10573_v37  ;;  %v8996_v32 = vpack.c.bf16 %v10576_v35, %v10575_v24  ;;  %v10580_v8 = vand.u32 4294901760, %v8826_v25  ;;  %v10581_v60 = vand.u32 4294901760, %v8847_v13  ;;  %v10586_v13 = vld [vmem:[#allocation26_spill] sm:$0xff]  ;;  %v10601_v37 = vld [vmem:[#allocation29_spill] sm:$0xff] }
 0x393   : > { %v9002_v58 = vpack.c.bf16 %v10578_v53, %v10577_v51  ;;  %v10582_v63 = vand.u32 4294901760, %v8866_v1  ;;  %v10583_v45 = vand.u32 4294901760, %v8842_v16  ;;  %v10584_v52 = vand.u32 4294901760, %v8864_v40  ;;  %v10587_v1 = vld [vmem:[#allocation37_spill] sm:$0xff]  ;;  %v10589_v16 = vld [vmem:[#allocation59_spill] sm:$0xff] }
 0x394   : > { %v9008_v6 = vpack.c.bf16 %v10580_v8, %v10579_v38  ;;  %v10585_v28 = vand.u32 4294901760, %v8605_v43  ;;  %v9024_v11 = vpack.c.bf16 %v4310_v42, %v4298_v62  ;;  %v9026_v25 = vpack.c.bf16 %v4316_v18, %v4304_v41  ;;  %v10590_v40 = vld [vmem:[#allocation39_spill] sm:$0xff]  ;;  %v10592_v43 = vld [vmem:[#allocation65_spill] sm:$0xff]  ;;  %v10593_v62 = vld [vmem:[#allocation68_spill] sm:$0xff] }
 0x395   : > { %v9014_v34 = vpack.c.bf16 %v10582_v63, %v10581_v60  ;;  %v9020_v49 = vpack.c.bf16 %v10584_v52, %v10583_v45  ;;  %v10594_v18 = vld [vmem:[#allocation69_spill] sm:$0xff]  ;;  %v10595_v41 = vld [vmem:[#allocation79_spill] sm:$0xff]  ;;  %v10600_v2 = vpack.c.bf16 %v8634_v47, %v8613_v56  ;;  %v10602_v3 = vpack.c.bf16 %v8674_v10, %v8656_v20  ;;  %v10604_v56 = vld [vmem:[#allocation14_spill] sm:$0xff] }
 0x396   : > { %4123 = vmatmul.mubr.f32.vlgmr.msra.gmra.mrb[32].mxu1 %v10585_v28  ;;  %v10597_v42 = vld [vmem:[#allocation31_spill] sm:$0xff]  ;;  %v10605_v47 = vld [vmem:[#allocation12_spill] sm:$0xff] }
 0x397   : > { %5489 = vmatpush1.bf16.xpose.msra.mxu1 %v8685_v55  ;;  %4353 = vmatprep.mubr.f32.mxu1 %v10586_v13  ;;  %v10596_v55 = vld [vmem:[#allocation47_spill] sm:$0xff]  ;;  %v10598_v0 = vpack.c.bf16 %v8636_v57, %v10597_v42  ;;  %v10606_v57 = vld [vmem:[#allocation13_spill] sm:$0xff]  ;;  %v10608_v10 = vld [vmem:[#allocation32_spill] sm:$0xff] }
 0x398   : > { %5491 = vmatprep.subr.bf16.mxu1 %v10587_v1  ;;  %v10609_v20 = vld [vmem:[#allocation35_spill] sm:$0xff] }
 0x39f   : > { %5493 = vmatpush1.bf16.xpose.msra.mxu1 %v10588_v7 }
 0x3a0   : > { %5495 = vmatprep.subr.bf16.mxu1 %v10589_v16 }
 0x3a7   : > { %5497 = vmatpush1.bf16.xpose.msra.mxu1 %v10590_v40 }
 0x3a8   : > { %5499 = vmatprep.subr.bf16.mxu1 %v10591_v26 }
 0x3af   : > { %5501 = vmatpush1.bf16.xpose.msra.mxu1 %v10592_v43 }
 0x3b0   : > { %5503 = vmatprep.subr.bf16.mxu1 %v10593_v62 }
 0x3b7   : > { %5505 = vmatpush1.bf16.xpose.msra.mxu1 %v10594_v18 }
 0x3b8   : > { %5507 = vmatprep.subr.bf16.mxu1 %v10595_v41 }
 0x3bf   : > { %5509 = vmatpush1.bf16.xpose.msra.mxu1 %v10596_v55 }
 0x3c0   : > { %5511 = vmatprep.subr.bf16.mxu1 %v5510_v4  ;;  %v10603_v4 = vpack.c.bf16 %v8672_v12, %v8651_v22  ;;  %v10607_v22 = vand.u32 4294901760, %v10601_v37  ;;  %v10610_v12 = vld [vmem:[#allocation20_spill] sm:$0xff] }
 0x3c7   : > { %5513 = vmatpush1.bf16.xpose.msra.mxu1 %v5512_v30  ;;  %v10611_v30 = vld [vmem:[#allocation33_spill] sm:$0xff] }
 0x3c8   : > { %5515 = vmatprep.subr.bf16.mxu1 %v5514_v29  ;;  %v10625_v29 = vld [vmem:[#allocation49_spill] sm:$0xff] }
 0x3cf   : > { %5517 = vmatpush1.bf16.xpose.msra.mxu1 %v5516_v54  ;;  %v10624_v54 = vld [vmem:[#allocation89_spill] sm:$0xff] }
 0x3d0   : > { %5519 = vmatprep.subr.bf16.mxu1 %v10598_v0 }
 0x3d6   : > { %4355 = vmatmul.mubr.f32.vlgmr.msra.gmra.mrb[32].mxu1 %v10599_v31 }
 0x3d7   : > { %5521 = vmatpush1.bf16.xpose.msra.mxu1 %v10600_v2  ;;  %4490 = vmatprep.mubr.f32.mxu1 %v10601_v37 }
 0x3d8   : > { %5523 = vmatprep.subr.bf16.mxu1 %v10602_v3 }
 0x3df   : > { %5525 = vmatpush1.bf16.xpose.msra.mxu1 %v10603_v4 }
 0x3e0   : > { %5527 = vmatprep.subr.bf16.mxu1 %v5526_v39  ;;  %v10612_v39 = vld [vmem:[#allocation58_spill] sm:$0xff] }
 0x3e7   : > { %5529 = vmatpush1.bf16.xpose.msra.mxu1 %v5528_v9  ;;  %v10615_v9 = vld [vmem:[#allocation61_spill] sm:$0xff] }
 0x3e8   : > { %5531 = vmatprep.subr.bf16.mxu1 %v5530_v21  ;;  %v10616_v21 = vld [vmem:[#allocation67_spill] sm:$0xff] }
 0x3ef   : > { %5533 = vmatpush1.bf16.xpose.msra.mxu1 %v5532_v48  ;;  %v10617_v48 = vld [vmem:[#allocation41_spill] sm:$0xff] }
 0x3f0   : > { %5535 = vmatprep.subr.bf16.mxu1 %v5534_v59  ;;  %v10618_v59 = vld [vmem:[#allocation45_spill] sm:$0xff] }
 0x3f7   : > { %5537 = vmatpush1.bf16.xpose.msra.mxu1 %v5536_v44  ;;  %v10619_v44 = vld [vmem:[#allocation43_spill] sm:$0xff] }
 0x3f8   : > { %5539 = vmatprep.subr.bf16.mxu1 %v5538_v14  ;;  %v10620_v14 = vld [vmem:[#allocation86_spill] sm:$0xff] }
 0x3ff   : > { %5541 = vmatpush1.bf16.xpose.msra.mxu1 %v5540_v17  ;;  %v10621_v17 = vld [vmem:[#allocation85_spill] sm:$0xff] }
 0x400   : > { %5543 = vmatprep.subr.bf16.mxu1 %v5542_v19  ;;  %v10622_v19 = vld [vmem:[#allocation87_spill] sm:$0xff] }
 0x407   : > { %5545 = vmatpush1.bf16.xpose.msra.mxu1 %v5544_v15  ;;  %v10623_v15 = vand.u32 4294901760, %v10605_v47 }
 0x408   : > { %5547 = vmatprep.subr.bf16.mxu1 %v5546_v61  ;;  %v10614_v61 = vld [vmem:[#allocation62_spill] sm:$0xff] }
 0x40f   : > { %5549 = vmatpush1.bf16.xpose.msra.mxu1 %v5548_v46  ;;  %v10613_v46 = vld [vmem:[#allocation56_spill] sm:$0xff] }
 0x410   : > { %5551 = vmatprep.subr.bf16.mxu1 %v10604_v56 }
 0x416   : > { %4493 = vmatmul.mubr.f32.vlgmr.msra.gmra.mrb[32].mxu1 %v10605_v47 }
 0x417   : > { %5553 = vmatpush1.bf16.xpose.msra.mxu1 %v10606_v57  ;;  %4597 = vmatprep.mubr.f32.mxu1 %v10607_v22 }
 0x418   : > { %5555 = vmatprep.subr.bf16.mxu1 %v10608_v10 }
 0x41f   : > { %5557 = vmatpush1.bf16.xpose.msra.mxu1 %v10609_v20 }
 0x420   : > { %5559 = vmatprep.subr.bf16.mxu1 %v10610_v12 }
 0x427   : > { %5561 = vmatpush1.bf16.xpose.msra.mxu1 %v10611_v30 }
 0x428   : > { %5563 = vmatprep.subr.bf16.mxu1 %v10612_v39 }
 0x42f   : > { %5565 = vmatpush1.bf16.xpose.msra.mxu1 %v10613_v46 }
 0x430   : > { %5567 = vmatprep.subr.bf16.mxu1 %v10614_v61 }
 0x437   : > { %5569 = vmatpush1.bf16.xpose.msra.mxu1 %v10615_v9 }
 0x438   : > { %5571 = vmatprep.subr.bf16.mxu1 %v10616_v21 }
 0x43f   : > { %5573 = vmatpush1.bf16.xpose.msra.mxu1 %v10617_v48 }
 0x440   : > { %5575 = vmatprep.subr.bf16.mxu1 %v10618_v59 }
 0x447   : > { %5577 = vmatpush1.bf16.xpose.msra.mxu1 %v10619_v44 }
 0x448   : > { %5579 = vmatprep.subr.bf16.mxu1 %v10620_v14 }
 0x44f   : > { %5581 = vmatpush1.bf16.xpose.msra.mxu1 %v10621_v17 }
 0x450   : > { %5583 = vmatprep.subr.bf16.mxu1 %v10622_v19 }
 0x456   : > { %4601 = vmatmul.mubr.f32.vlgmr.msra.gmra.mrb[32].mxu1 %v10623_v15 }
 0x457   : > { %5585 = vmatpush1.bf16.xpose.msra.mxu1 %v10624_v54  ;;  %4767 = vmatprep.mubr.f32.mxu1 %v10586_v13 }
 0x458   : > { %5587 = vmatprep.subr.bf16.mxu1 %v10625_v29 }
 0x45f   : > { %5589 = vmatpush1.bf16.xpose.msra.mxu1 %v8960_v23 }
 0x460   : > { %5591 = vmatprep.subr.bf16.mxu1 %v8966_v5 }
 0x467   : > { %5593 = vmatpush1.bf16.xpose.msra.mxu1 %v8972_v36 }
 0x468   : > { %5595 = vmatprep.subr.bf16.mxu1 %v8978_v27 }
 0x46f   : > { %5597 = vmatpush1.bf16.xpose.msra.mxu1 %v8984_v50 }
 0x470   : > { %5599 = vmatprep.subr.bf16.mxu1 %v8990_v33 }
 0x477   : > { %5601 = vmatpush1.bf16.xpose.msra.mxu1 %v8996_v32 }
 0x478   : > { %5603 = vmatprep.subr.bf16.mxu1 %v9002_v58 }
 0x47f   : > { %5605 = vmatpush1.bf16.xpose.msra.mxu1 %v9008_v6 }
 0x480   : > { %5607 = vmatprep.subr.bf16.mxu1 %v9014_v34 }
 0x487   : > { %5609 = vmatpush1.bf16.xpose.msra.mxu1 %v9020_v49 }
 0x488   : > { %5611 = vmatprep.subr.bf16.mxu1 %v9024_v11 }
 0x48f   : > { %5613 = vmatpush1.bf16.xpose.msra.mxu1 %v9026_v25 }
 0x490   : > { %5615 = vmatprep.subr.bf16.mxu1 %v10604_v56 }
 0x496   : > { %4769 = vmatmul.mubr.f32.vlgmr.msra.gmra.mrb[32].mxu1 %v10599_v31 }
 0x497   : > { %5617 = vmatpush1.bf16.xpose.msra.mxu1 %v10606_v57  ;;  %4871 = vmatprep.mubr.f32.mxu1 %v10586_v13 }
 0x498   : > { %5619 = vmatprep.subr.bf16.mxu1 %v10608_v10 }
 0x49f   : > { %5621 = vmatpush1.bf16.xpose.msra.mxu1 %v10609_v20 }
 0x4a0   : > { %5623 = vmatprep.subr.bf16.mxu1 %v10610_v12 }
 0x4a7   : > { %5625 = vmatpush1.bf16.xpose.msra.mxu1 %v10611_v30 }
 0x4a8   : > { %5627 = vmatprep.subr.bf16.mxu1 %v10612_v39 }
 0x4af   : > { %5629 = vmatpush1.bf16.xpose.msra.mxu1 %v10613_v46 }
 0x4b0   : > { %5631 = vmatprep.subr.bf16.mxu1 %v10614_v61 }
 0x4b7   : > { %5633 = vmatpush1.bf16.xpose.msra.mxu1 %v10615_v9 }
 0x4b8   : > { %5635 = vmatprep.subr.bf16.mxu1 %v10616_v21 }
 0x4bf   : > { %5637 = vmatpush1.bf16.xpose.msra.mxu1 %v10617_v48 }
 0x4c0   : > { %5639 = vmatprep.subr.bf16.mxu1 %v10618_v59 }
 0x4c7   : > { %5641 = vmatpush1.bf16.xpose.msra.mxu1 %v10619_v44 }
 0x4c8   : > { %5643 = vmatprep.subr.bf16.mxu1 %v10620_v14 }
 0x4cf   : > { %5645 = vmatpush1.bf16.xpose.msra.mxu1 %v10621_v17 }
 0x4d6   : > { %4873 = vmatmul.mubr.f32.vlgmr.msra.gmra.mrb[32].mxu1 %v10599_v31 }
 0x5a9   : > { %v4874_v36 = vpop.f32.mrb[32].mxu1 }
 0x5aa   : > { %v4878_v23 = vrot.slane %v4874_v36, 4  ;;  %v4876_v5 = vpop.f32.mrb[33].mxu1 }
 0x5ac   : > { %v4879_v27 = vmax.f32 %v4874_v36, %v4878_v23 }
 0x5ae   : > { %v4880_v50 = vrot.slane %v4879_v27, 2 }
 0x5b0   : > { %v4881_v33 = vmax.f32 %v4879_v27, %v4880_v50 }
 0x5b2   : > { %v4882_v24 = vrot.slane %v4881_v33, 1 }
 0x5b4   : > { %v4883_v35 = vmax.f32 %v4881_v33, %v4882_v24 }
 0x5b6   : > { %v4884_v32 = vsub.f32 %v4874_v36, %v4883_v35 }
 0x5b8   : > { %v4885_v51 = vmul.f32 1.442695, %v4884_v32 }
 0x5ba   : > { %6100 = vpow2.f32 %v4885_v51 }
 0x5c4   : > { %v6101_v53 = vpop.eup %6100 }
 0x5c5   : > { %v4887_v58 = vrot.slane %v6101_v53, 4 }
 0x5c7   : > { %v4888_v38 = vadd.f32 %v6101_v53, %v4887_v58 }
 0x5c9   : > { %v4889_v8 = vrot.slane %v4888_v38, 2 }
 0x5cb   : > { %v4890_v6 = vadd.f32 %v4889_v8, %v4888_v38 }
 0x5cd   : > { %v4891_v60 = vrot.slane %v4890_v6, 1 }
 0x5cf   : > { %v4892_v63 = vadd.f32 %v4891_v60, %v4890_v6 }
 0x5d1   : > { %6102 = vrcp.f32 %v4892_v63 }
 0x5db   : > { %v6103_v34 = vpop.eup %6102 }
 0x5dc   : > { %v4894_v45 = vmul.f32 %v6103_v34, %v6101_v53 }
 0x5de   : > { %4895 = vst [vmem:[%s301_s26] sm:$0xff] %v4894_v45 }
 0x5df   : > { %6175 = shalt.err (!%p6172_p9)
}
 0x5e0   : > { %s6176_s12 = scalar_lea.hbm %s9116_s30, 128  ;;  %s6180_s7 = scalar_lea.hbm %s9166_s6, 256 }
 0x5e1   : > { %p6177_p1 = scmp.ne.s32.totalorder %s9116_s30, %s6176_s12  ;;  %p6181_p11 = scmp.lt.u32.totalorder %s9116_s30, %s9166_s6 }
 0x5e2   : > { %p6182_p2 = scmp.lt.u32.totalorder %s6180_s7, %s6176_s12  ;;  %p6184_p6 = scmp.lt.u32.totalorder %s6176_s12, %s9116_s30 }
 0x5e3   : > { %p6178_p0 = pnand %p6177_p1, %p6369_p12 }
 0x5e4   : > { %p6183_p4 = por %p6182_p2, %p6181_p11 }
 0x5e5   : > { %p6179_p5 = pneg %p6178_p0 }
 0x5e6   : > { %p6185_p8 = por %p6184_p6, %p6183_p4 }
 0x5e8   : > { %p6186_p10 = pnand %p6185_p8, %p6179_p5 }
 0x5ea   : > { %6189 = shalt.err (!%p6186_p10)
}
 0x5eb   : > { %6046 = dma.vmem_to_hbm [thread:$0]  (%p6369_p12), %s9118_s19, 128, %s9116_s30, %s4897_s15  }
 0x5ec PF: > { %s4922_s26 = sand.u32 1, %s6220_s21   ;;  %p10626_p13 = scmp.ne.s32.totalorder %s9662_s28, 0 }
 0x5ed   : > { %p10627_p3 = scmp.ge.s32.totalorder %s6232_s24, 2  ;;  %s4923_s10 = scalar_lea.sflag [#allocation4], %s4922_s26 }
 0x5ef   : > { %p6057_p7 = pnand %p10627_p3, %p10626_p13 }
 0x5f1   : > { %6215 = dma.done.wait (!%p6057_p7), %s4923_s10, 128  }
 0x5f2   : > { %6217 = vsyncadd (!%p6057_p7), %s4923_s10, 4294967168  ;;  %p20_p9 = scmp.ge.s32.totalorder %s6331_s9, 4   ;;  %s10628_s21 = smov %s6224_s22 }
 0x5f3   : > { %s10629_s22 = smov %s6228_s23  ;;  %s10630_s23 = smov %s6365_s13 }
 0x5f4   : > { %s10631_s24 = smov %s6331_s9  ;;  %22 = sbr.rel (!%p20_p9) target bundleno = 6 (0x6), region = 96 }
 0x5fb   :  { %4928 = vsyncpa [#allocation3], 1 }
 0x5fc   :  { %4930 = vsyncpa [#allocation3 + $0x1], 1 }
 0x5fd   :  { %4931 = vsyncpa [#allocation6], 1 }
 0x5fe   :  { %4932 = vsyncpa [#allocation4], 1 }
 0x5ff   :  { %4934 = vsyncpa [#allocation4 + $0x1], 1 }

</bundles_post_ra>
